<compile_context>
chip_gen: v7x
topology: tpu7x:2x2x1
jax: 0.10.0
libtpu: 0.0.40
codegen_flags: <defaults>
</compile_context>

<pallas_src>
import jax
import jax.numpy as jnp
import numpy as np
from jax.experimental import pallas as pl
from jax.experimental.pallas import tpu as pltpu

# ------------------------- architecture constants -------------------------- #
K = 5
C0, C1, C2, C3 = 6, 12, 24, 48
L0, L1, L2, L3 = 60, 56, 52, 48
FEAT = L3 * C3                    # 2304
H1, H2, OUT = 256, 64, 4

# Packed conv-parameter slab layout (every segment starts at a multiple of 8).
W1_R, B1_R = 0, 32
W2_R, B2_R = 40, 104
W3_R, B3_R = 112, 232
CONV_ROWS, CONV_COLS = 240, 48

# Packed fc-parameter slab layout (fw2/fb2/fw3/fb3).
FW2_R, FB2_R = 0, 256
FW3_R, FB3_R = 264, 328
FC_ROWS, FC_COLS = 336, 64


# ------------------------------ fused kernel ------------------------------- #

def make_kernel(use_reshape):
    """Build the fused kernel.  `use_reshape` picks how the conv->fc flatten
    is materialized (single value reshape vs. per-row stores into scratch)."""

    def kernel(x_ref,                       # (TB*60, 6)   input, channels-last
               conv_ref,                    # (240, 48)    packed conv params
               fw1_ref,                     # (2304, 256)  bf16, row-permuted
               fb1_ref,                     # (1, 256)
               fc_ref,                      # (336, 64)    packed fc2/fc3 params
               o_ref,                       # (TB, 4)
               col1_ref, col2_ref, col3_ref,  # im2col scratch
               h1_ref, h2_ref,              # conv activation scratch
               *flat_scratch):              # (h3_ref, feat_ref) fallback only
        TB = x_ref.shape[0] // L0

        # Static, 8-row-aligned views into the packed parameter slabs (free).
        w1 = conv_ref[W1_R:W1_R + K * C0, 0:C1]
        b1 = conv_ref[B1_R:B1_R + 1, 0:C1]
        w2 = conv_ref[W2_R:W2_R + K * C1, 0:C2]
        b2 = conv_ref[B2_R:B2_R + 1, 0:C2]
        w3 = conv_ref[W3_R:W3_R + K * C2, 0:C3]
        b3 = conv_ref[B3_R:B3_R + 1, 0:C3]
        fw2 = fc_ref[FW2_R:FW2_R + H1, 0:H2]
        fb2 = fc_ref[FB2_R:FB2_R + 1, 0:H2]
        fw3 = fc_ref[FW3_R:FW3_R + H2, 0:OUT]
        fb3 = fc_ref[FB3_R:FB3_R + 1, 0:OUT]

        def conv_relu(src_ref, lin, cin, col_ref, w, b, lout):
            # im2col: build the (TB*lout, K*cin) window matrix from *ref reads*
            # (no value-slice relayouts), then one MXU matmul with the batch
            # folded into the M rows.
            for bb in range(TB):
                for k in range(K):
                    col_ref[bb * lout:(bb + 1) * lout, k * cin:(k + 1) * cin] = \
                        src_ref[bb * lin + k: bb * lin + k + lout, :]
            acc = jnp.dot(col_ref[...], w, preferred_element_type=jnp.float32)
            return jnp.maximum(acc + b, 0.0)

        h1_ref[...] = conv_relu(x_ref, L0, C0, col1_ref, w1, b1, L1)  # (TB*56,12)
        h2_ref[...] = conv_relu(h1_ref, L1, C1, col2_ref, w2, b2, L2)  # (TB*52,24)
        h3 = conv_relu(h2_ref, L2, C2, col3_ref, w3, b3, L3)           # (TB*48,48)

        # Flatten (L, C) row-major per batch -> (TB, 2304).  fw1's rows were
        # permuted at prepare time so this reproduces PyTorch's channel-major
        # view(-1, 48*48) exactly.
        if use_reshape:
            f = h3.reshape(TB, FEAT)
        else:
            h3_ref, feat_ref = flat_scratch
            h3_ref[...] = h3
            for bb in range(TB):
                for l in range(L3):
                    feat_ref[bb:bb + 1, l * C3:(l + 1) * C3] = \
                        h3_ref[bb * L3 + l: bb * L3 + l + 1, :]
            f = feat_ref[...]

        # fc1 in bf16 (weights already bf16 in HBM), f32 accumulation on MXU.
        h4 = jnp.maximum(
            jnp.dot(f.astype(jnp.bfloat16), fw1_ref[...],
                    preferred_element_type=jnp.float32) + fb1_ref[...], 0.0)
        h5 = jnp.maximum(
            jnp.dot(h4, fw2, preferred_element_type=jnp.float32) + fb2, 0.0)
        o_ref[...] = jnp.dot(h5, fw3, preferred_element_type=jnp.float32) + fb3

    return kernel


# ------------------------------ host wrappers ------------------------------ #

def prepare_kernel_params(p):
    """One-time packing of PyTorch-layout params into kernel layout."""
    conv = jnp.zeros((CONV_ROWS, CONV_COLS), jnp.float32)
    conv = conv.at[W1_R:W1_R + K * C0, :C1].set(p["w1"].reshape(K * C0, C1))
    conv = conv.at[B1_R:B1_R + 1, :C1].set(p["b1"])
    conv = conv.at[W2_R:W2_R + K * C1, :C2].set(p["w2"].reshape(K * C1, C2))
    conv = conv.at[B2_R:B2_R + 1, :C2].set(p["b2"])
    conv = conv.at[W3_R:W3_R + K * C2, :C3].set(p["w3"].reshape(K * C2, C3))
    conv = conv.at[B3_R:B3_R + 1, :C3].set(p["b3"])

    fc = jnp.zeros((FC_ROWS, FC_COLS), jnp.float32)
    fc = fc.at[FW2_R:FW2_R + H1, :H2].set(p["fw2"])
    fc = fc.at[FB2_R:FB2_R + 1, :H2].set(p["fb2"])
    fc = fc.at[FW3_R:FW3_R + H2, :OUT].set(p["fw3"])
    fc = fc.at[FB3_R:FB3_R + 1, :OUT].set(p["fb3"])

    # fc1 rows reordered from PyTorch's channel-major (c*48+l) flatten to the
    # (l*48+c) flatten the kernel produces, then cast to bf16 (dominant DMA).
    fw1 = (p["fw1"].reshape(C3, L3, H1)      # rows indexed (c, l)
           .transpose(1, 0, 2)               # -> (l, c)
           .reshape(L3 * C3, H1)
           .astype(jnp.bfloat16))

    return {"conv": conv, "fc": fc, "fw1": fw1, "fb1": p["fb1"]}


def build_forward(B, tb, use_reshape):
    """Returns a jitted forward fn for batch B with batch tile tb."""
    assert B % tb == 0 and (tb == B or tb % 8 == 0)
    kernel = make_kernel(use_reshape)

    scratch = [
        pltpu.VMEM((tb * L1, K * C0), jnp.float32),   # conv1 im2col
        pltpu.VMEM((tb * L2, K * C1), jnp.float32),   # conv2 im2col
        pltpu.VMEM((tb * L3, K * C2), jnp.float32),   # conv3 im2col
        pltpu.VMEM((tb * L1, C1), jnp.float32),       # h1
        pltpu.VMEM((tb * L2, C2), jnp.float32),       # h2
    ]
    if not use_reshape:
        scratch += [pltpu.VMEM((tb * L3, C3), jnp.float32),   # h3
                    pltpu.VMEM((tb, FEAT), jnp.float32)]      # flattened feats

    call = pl.pallas_call(
        kernel,
        out_shape=jax.ShapeDtypeStruct((B, OUT), jnp.float32),
        grid_spec=pltpu.PrefetchScalarGridSpec(
            num_scalar_prefetch=0,
            grid=(B // tb,),
            in_specs=[
                pl.BlockSpec((tb * L0, C0), lambda i: (i, 0)),          # x
                pl.BlockSpec((CONV_ROWS, CONV_COLS), lambda i: (0, 0)),  # conv
                pl.BlockSpec((FEAT, H1), lambda i: (0, 0)),              # fw1
                pl.BlockSpec((1, H1), lambda i: (0, 0)),                 # fb1
                pl.BlockSpec((FC_ROWS, FC_COLS), lambda i: (0, 0)),      # fc
            ],
            out_specs=pl.BlockSpec((tb, OUT), lambda i: (i, 0)),
            scratch_shapes=scratch),
        compiler_params=pltpu.CompilerParams(
            dimension_semantics=("parallel",)),
    )

    @jax.jit
    def fwd(x_ncl, kp):
        # x_ncl: (B, 6, 60) PyTorch NCL layout.  Returns (B, 4).
        x = jnp.transpose(x_ncl.astype(jnp.float32), (0, 2, 1))
        x = x.reshape(B * L0, C0)
        return call(x, kp["conv"], kp["fw1"], kp["fb1"], kp["fc"])

    return fwd


# ------------------------------ pure-JAX ref -------------------------------- #

def reference_forward(x_ncl, p):
    x = jnp.transpose(x_ncl.astype(jnp.float32), (0, 2, 1))
    for w, b in ((p["w1"], p["b1"]), (p["w2"], p["b2"]), (p["w3"], p["b3"])):
        kk = w.shape[0]
        lout = x.shape[1] - kk + 1
        acc = sum(jnp.einsum("blc,co->blo", x[:, k:k + lout, :], w[k])
                  for k in range(kk))
        x = jnp.maximum(acc + b[None], 0.0)
    # PyTorch view(-1, 48*48): channel-major flatten.
    x = jnp.transpose(x, (0, 2, 1)).reshape(x.shape[0], -1)
    x = jnp.maximum(x @ p["fw1"] + p["fb1"], 0.0)
    x = jnp.maximum(x @ p["fw2"] + p["fb2"], 0.0)
    return x @ p["fw3"] + p["fb3"]


# ------------------------------ param init ---------------------------------- #

def init_params(key):
    def unif(k, shape, fan_in):
        bound = 1.0 / np.sqrt(fan_in)
        return jax.random.uniform(k, shape, jnp.float32, -bound, bound)

    ks = jax.random.split(key, 12)
    p = {}
    # Conv1d weights stored as (K, Cin, Cout)  (PyTorch stores (Cout, Cin, K)).
    p["w1"] = unif(ks[0], (K, C0, C1), C0 * K)
    p["b1"] = unif(ks[1], (1, C1), C0 * K)
    p["w2"] = unif(ks[2], (K, C1, C2), C1 * K)
    p["b2"] = unif(ks[3], (1, C2), C1 * K)
    p["w3"] = unif(ks[4], (K, C2, C3), C2 * K)
    p["b3"] = unif(ks[5], (1, C3), C2 * K)
    # Linear weights stored as (in, out)  (PyTorch stores (out, in)).
    p["fw1"] = unif(ks[6], (FEAT, H1), FEAT)
    p["fb1"] = unif(ks[7], (1, H1), FEAT)
    p["fw2"] = unif(ks[8], (H1, H2), H1)
    p["fb2"] = unif(ks[9], (1, H2), H1)
    p["fw3"] = unif(ks[10], (H2, OUT), H2)
    p["fb3"] = unif(ks[11], (1, OUT), H2)
    return p


# --------------------------------- main ------------------------------------- #

if __name__ == "__main__":
    key = jax.random.PRNGKey(0)
    pkey, xkey = jax.random.split(key)
    params = init_params(pkey)
    kparams = prepare_kernel_params(params)

    B = 2
    x = jax.random.normal(xkey, (B, C0, L0), jnp.float32)   # NCL, like PyTorch

    ref = np.asarray(jax.block_until_ready(reference_forward(x, params)))

    def close(o):
        return np.allclose(np.asarray(o), ref, rtol=1e-2, atol=1e-2)

    # Primary path: single-reshape flatten.  Fall back to the per-row flatten
    # variant if the installed Mosaic rejects (or mishandles) the relayout.
    out = None
    try:
        cand = jax.block_until_ready(build_forward(B, B, True)(x, kparams))
        if close(cand):
            out = cand
    except Exception:
        out = None
    if out is None:
        out = jax.block_until_ready(build_forward(B, B, False)(x, kparams))

    out_np = np.asarray(out)
    assert out_np.shape == (B, OUT), out_np.shape
    assert close(out_np), float(np.max(np.abs(out_np - ref)))
    print("KERNEL_OK")
</pallas_src>

<mosaic_0001>
module attributes {stable_mosaic.version = 11 : i64} {
  func.func @kernel(%arg0: i32, %arg1: memref<120x6xf32, #tpu.memory_space<vmem>>, %arg2: memref<240x48xf32, #tpu.memory_space<vmem>>, %arg3: memref<2304x256xbf16, #tpu.memory_space<vmem>>, %arg4: memref<1x256xf32, #tpu.memory_space<vmem>>, %arg5: memref<336x64xf32, #tpu.memory_space<vmem>>, %arg6: memref<2x4xf32, #tpu.memory_space<vmem>>, %arg7: memref<112x30xf32, #tpu.memory_space<vmem>>, %arg8: memref<104x60xf32, #tpu.memory_space<vmem>>, %arg9: memref<96x120xf32, #tpu.memory_space<vmem>>, %arg10: memref<112x12xf32, #tpu.memory_space<vmem>>, %arg11: memref<104x24xf32, #tpu.memory_space<vmem>>) attributes {dimension_semantics = [#tpu.dimension_semantics<parallel>], iteration_bounds = array<i64: 1>, scalar_prefetch = 0 : i64, scratch_operands = 5 : i64, tpu.core_type = #tpu.core_type<tc>, window_params = [{transform_indices = @transform_0, window_bounds = array<i64: 120, 6>}, {pipeline_mode = #tpu.pipeline_mode<synchronous>, transform_indices = @transform_1, window_bounds = array<i64: 240, 48>}, {pipeline_mode = #tpu.pipeline_mode<synchronous>, transform_indices = @transform_2, window_bounds = array<i64: 2304, 256>}, {pipeline_mode = #tpu.pipeline_mode<synchronous>, transform_indices = @transform_3, window_bounds = array<i64: 1, 256>}, {pipeline_mode = #tpu.pipeline_mode<synchronous>, transform_indices = @transform_4, window_bounds = array<i64: 336, 64>}, {transform_indices = @transform_5, window_bounds = array<i64: 2, 4>}]} {
    %c0 = arith.constant 0 : index
    %c0_0 = arith.constant 0 : index
    %0 = vector.load %arg2[%c0, %c0_0] : memref<240x48xf32, #tpu.memory_space<vmem>>, vector<30x12xf32>
    %c32 = arith.constant 32 : index
    %c0_1 = arith.constant 0 : index
    %1 = vector.load %arg2[%c32, %c0_1] : memref<240x48xf32, #tpu.memory_space<vmem>>, vector<1x12xf32>
    %c40 = arith.constant 40 : index
    %c0_2 = arith.constant 0 : index
    %2 = vector.load %arg2[%c40, %c0_2] : memref<240x48xf32, #tpu.memory_space<vmem>>, vector<60x24xf32>
    %c104 = arith.constant 104 : index
    %c0_3 = arith.constant 0 : index
    %3 = vector.load %arg2[%c104, %c0_3] : memref<240x48xf32, #tpu.memory_space<vmem>>, vector<1x24xf32>
    %c112 = arith.constant 112 : index
    %c0_4 = arith.constant 0 : index
    %4 = vector.load %arg2[%c112, %c0_4] : memref<240x48xf32, #tpu.memory_space<vmem>>, vector<120x48xf32>
    %c232 = arith.constant 232 : index
    %c0_5 = arith.constant 0 : index
    %5 = vector.load %arg2[%c232, %c0_5] : memref<240x48xf32, #tpu.memory_space<vmem>>, vector<1x48xf32>
    %c0_6 = arith.constant 0 : index
    %c0_7 = arith.constant 0 : index
    %6 = vector.load %arg5[%c0_6, %c0_7] : memref<336x64xf32, #tpu.memory_space<vmem>>, vector<256x64xf32>
    %c256 = arith.constant 256 : index
    %c0_8 = arith.constant 0 : index
    %7 = vector.load %arg5[%c256, %c0_8] : memref<336x64xf32, #tpu.memory_space<vmem>>, vector<1x64xf32>
    %c264 = arith.constant 264 : index
    %c0_9 = arith.constant 0 : index
    %8 = vector.load %arg5[%c264, %c0_9] : memref<336x64xf32, #tpu.memory_space<vmem>>, vector<64x4xf32>
    %c328 = arith.constant 328 : index
    %c0_10 = arith.constant 0 : index
    %9 = vector.load %arg5[%c328, %c0_10] : memref<336x64xf32, #tpu.memory_space<vmem>>, vector<1x4xf32>
    %c0_11 = arith.constant 0 : index
    %c0_12 = arith.constant 0 : index
    %10 = vector.load %arg1[%c0_11, %c0_12] : memref<120x6xf32, #tpu.memory_space<vmem>>, vector<56x6xf32>
    %c0_13 = arith.constant 0 : index
    %c0_14 = arith.constant 0 : index
    %11 = vector.load %arg7[%c0_13, %c0_14] : memref<112x30xf32, #tpu.memory_space<vmem>>, vector<56x6xf32>
    tpu.vector_store %arg7[%c0_13, %c0_14], %10 {strides = array<i32>} : memref<112x30xf32, #tpu.memory_space<vmem>>, vector<56x6xf32>,
    %c1 = arith.constant 1 : index
    %c0_15 = arith.constant 0 : index
    %12 = vector.load %arg1[%c1, %c0_15] : memref<120x6xf32, #tpu.memory_space<vmem>>, vector<56x6xf32>
    %c0_16 = arith.constant 0 : index
    %c6 = arith.constant 6 : index
    %13 = vector.load %arg7[%c0_16, %c6] : memref<112x30xf32, #tpu.memory_space<vmem>>, vector<56x6xf32>
    tpu.vector_store %arg7[%c0_16, %c6], %12 {strides = array<i32>} : memref<112x30xf32, #tpu.memory_space<vmem>>, vector<56x6xf32>,
    %c2 = arith.constant 2 : index
    %c0_17 = arith.constant 0 : index
    %14 = vector.load %arg1[%c2, %c0_17] : memref<120x6xf32, #tpu.memory_space<vmem>>, vector<56x6xf32>
    %c0_18 = arith.constant 0 : index
    %c12 = arith.constant 12 : index
    %15 = vector.load %arg7[%c0_18, %c12] : memref<112x30xf32, #tpu.memory_space<vmem>>, vector<56x6xf32>
    tpu.vector_store %arg7[%c0_18, %c12], %14 {strides = array<i32>} : memref<112x30xf32, #tpu.memory_space<vmem>>, vector<56x6xf32>,
    %c3 = arith.constant 3 : index
    %c0_19 = arith.constant 0 : index
    %16 = vector.load %arg1[%c3, %c0_19] : memref<120x6xf32, #tpu.memory_space<vmem>>, vector<56x6xf32>
    %c0_20 = arith.constant 0 : index
    %c18 = arith.constant 18 : index
    %17 = vector.load %arg7[%c0_20, %c18] : memref<112x30xf32, #tpu.memory_space<vmem>>, vector<56x6xf32>
    tpu.vector_store %arg7[%c0_20, %c18], %16 {strides = array<i32>} : memref<112x30xf32, #tpu.memory_space<vmem>>, vector<56x6xf32>,
    %c4 = arith.constant 4 : index
    %c0_21 = arith.constant 0 : index
    %18 = vector.load %arg1[%c4, %c0_21] : memref<120x6xf32, #tpu.memory_space<vmem>>, vector<56x6xf32>
    %c0_22 = arith.constant 0 : index
    %c24 = arith.constant 24 : index
    %19 = vector.load %arg7[%c0_22, %c24] : memref<112x30xf32, #tpu.memory_space<vmem>>, vector<56x6xf32>
    tpu.vector_store %arg7[%c0_22, %c24], %18 {strides = array<i32>} : memref<112x30xf32, #tpu.memory_space<vmem>>, vector<56x6xf32>,
    %c60 = arith.constant 60 : index
    %c0_23 = arith.constant 0 : index
    %20 = vector.load %arg1[%c60, %c0_23] : memref<120x6xf32, #tpu.memory_space<vmem>>, vector<56x6xf32>
    %c56 = arith.constant 56 : index
    %c0_24 = arith.constant 0 : index
    %21 = vector.load %arg7[%c56, %c0_24] : memref<112x30xf32, #tpu.memory_space<vmem>>, vector<56x6xf32>
    tpu.vector_store %arg7[%c56, %c0_24], %20 {strides = array<i32>} : memref<112x30xf32, #tpu.memory_space<vmem>>, vector<56x6xf32>,
    %c61 = arith.constant 61 : index
    %c0_25 = arith.constant 0 : index
    %22 = vector.load %arg1[%c61, %c0_25] : memref<120x6xf32, #tpu.memory_space<vmem>>, vector<56x6xf32>
    %c56_26 = arith.constant 56 : index
    %c6_27 = arith.constant 6 : index
    %23 = vector.load %arg7[%c56_26, %c6_27] : memref<112x30xf32, #tpu.memory_space<vmem>>, vector<56x6xf32>
    tpu.vector_store %arg7[%c56_26, %c6_27], %22 {strides = array<i32>} : memref<112x30xf32, #tpu.memory_space<vmem>>, vector<56x6xf32>,
    %c62 = arith.constant 62 : index
    %c0_28 = arith.constant 0 : index
    %24 = vector.load %arg1[%c62, %c0_28] : memref<120x6xf32, #tpu.memory_space<vmem>>, vector<56x6xf32>
    %c56_29 = arith.constant 56 : index
    %c12_30 = arith.constant 12 : index
    %25 = vector.load %arg7[%c56_29, %c12_30] : memref<112x30xf32, #tpu.memory_space<vmem>>, vector<56x6xf32>
    tpu.vector_store %arg7[%c56_29, %c12_30], %24 {strides = array<i32>} : memref<112x30xf32, #tpu.memory_space<vmem>>, vector<56x6xf32>,
    %c63 = arith.constant 63 : index
    %c0_31 = arith.constant 0 : index
    %26 = vector.load %arg1[%c63, %c0_31] : memref<120x6xf32, #tpu.memory_space<vmem>>, vector<56x6xf32>
    %c56_32 = arith.constant 56 : index
    %c18_33 = arith.constant 18 : index
    %27 = vector.load %arg7[%c56_32, %c18_33] : memref<112x30xf32, #tpu.memory_space<vmem>>, vector<56x6xf32>
    tpu.vector_store %arg7[%c56_32, %c18_33], %26 {strides = array<i32>} : memref<112x30xf32, #tpu.memory_space<vmem>>, vector<56x6xf32>,
    %c64 = arith.constant 64 : index
    %c0_34 = arith.constant 0 : index
    %28 = vector.load %arg1[%c64, %c0_34] : memref<120x6xf32, #tpu.memory_space<vmem>>, vector<56x6xf32>
    %c56_35 = arith.constant 56 : index
    %c24_36 = arith.constant 24 : index
    %29 = vector.load %arg7[%c56_35, %c24_36] : memref<112x30xf32, #tpu.memory_space<vmem>>, vector<56x6xf32>
    tpu.vector_store %arg7[%c56_35, %c24_36], %28 {strides = array<i32>} : memref<112x30xf32, #tpu.memory_space<vmem>>, vector<56x6xf32>,
    %c0_37 = arith.constant 0 : index
    %c0_38 = arith.constant 0 : index
    %30 = vector.load %arg7[%c0_37, %c0_38] : memref<112x30xf32, #tpu.memory_space<vmem>>, vector<112x30xf32>
    %cst = arith.constant dense<0.000000e+00> : vector<112x12xf32>
    %31 = tpu.matmul %30, %0, %cst {dimension_numbers = #tpu.dot_dimension_numbers<[1], [0], [0], [1], [0, 0, 1, 1], [], []>} : vector<112x30xf32>, vector<30x12xf32>, vector<112x12xf32> -> vector<112x12xf32>
    %32 = vector.broadcast %1 : vector<1x12xf32> to vector<112x12xf32>
    %33 = arith.addf %31, %32 : vector<112x12xf32>
    %cst_39 = arith.constant 0.000000e+00 : f32
    %34 = vector.broadcast %cst_39 : f32 to vector<112x12xf32>
    %35 = arith.maximumf %33, %34 : vector<112x12xf32>
    %c0_40 = arith.constant 0 : index
    %c0_41 = arith.constant 0 : index
    %36 = vector.load %arg10[%c0_40, %c0_41] : memref<112x12xf32, #tpu.memory_space<vmem>>, vector<112x12xf32>
    tpu.vector_store %arg10[%c0_40, %c0_41], %35 {strides = array<i32>} : memref<112x12xf32, #tpu.memory_space<vmem>>, vector<112x12xf32>,
    %c0_42 = arith.constant 0 : index
    %c0_43 = arith.constant 0 : index
    %37 = vector.load %arg10[%c0_42, %c0_43] : memref<112x12xf32, #tpu.memory_space<vmem>>, vector<52x12xf32>
    %c0_44 = arith.constant 0 : index
    %c0_45 = arith.constant 0 : index
    %38 = vector.load %arg8[%c0_44, %c0_45] : memref<104x60xf32, #tpu.memory_space<vmem>>, vector<52x12xf32>
    tpu.vector_store %arg8[%c0_44, %c0_45], %37 {strides = array<i32>} : memref<104x60xf32, #tpu.memory_space<vmem>>, vector<52x12xf32>,
    %c1_46 = arith.constant 1 : index
    %c0_47 = arith.constant 0 : index
    %39 = vector.load %arg10[%c1_46, %c0_47] : memref<112x12xf32, #tpu.memory_space<vmem>>, vector<52x12xf32>
    %c0_48 = arith.constant 0 : index
    %c12_49 = arith.constant 12 : index
    %40 = vector.load %arg8[%c0_48, %c12_49] : memref<104x60xf32, #tpu.memory_space<vmem>>, vector<52x12xf32>
    tpu.vector_store %arg8[%c0_48, %c12_49], %39 {strides = array<i32>} : memref<104x60xf32, #tpu.memory_space<vmem>>, vector<52x12xf32>,
    %c2_50 = arith.constant 2 : index
    %c0_51 = arith.constant 0 : index
    %41 = vector.load %arg10[%c2_50, %c0_51] : memref<112x12xf32, #tpu.memory_space<vmem>>, vector<52x12xf32>
    %c0_52 = arith.constant 0 : index
    %c24_53 = arith.constant 24 : index
    %42 = vector.load %arg8[%c0_52, %c24_53] : memref<104x60xf32, #tpu.memory_space<vmem>>, vector<52x12xf32>
    tpu.vector_store %arg8[%c0_52, %c24_53], %41 {strides = array<i32>} : memref<104x60xf32, #tpu.memory_space<vmem>>, vector<52x12xf32>,
    %c3_54 = arith.constant 3 : index
    %c0_55 = arith.constant 0 : index
    %43 = vector.load %arg10[%c3_54, %c0_55] : memref<112x12xf32, #tpu.memory_space<vmem>>, vector<52x12xf32>
    %c0_56 = arith.constant 0 : index
    %c36 = arith.constant 36 : index
    %44 = vector.load %arg8[%c0_56, %c36] : memref<104x60xf32, #tpu.memory_space<vmem>>, vector<52x12xf32>
    tpu.vector_store %arg8[%c0_56, %c36], %43 {strides = array<i32>} : memref<104x60xf32, #tpu.memory_space<vmem>>, vector<52x12xf32>,
    %c4_57 = arith.constant 4 : index
    %c0_58 = arith.constant 0 : index
    %45 = vector.load %arg10[%c4_57, %c0_58] : memref<112x12xf32, #tpu.memory_space<vmem>>, vector<52x12xf32>
    %c0_59 = arith.constant 0 : index
    %c48 = arith.constant 48 : index
    %46 = vector.load %arg8[%c0_59, %c48] : memref<104x60xf32, #tpu.memory_space<vmem>>, vector<52x12xf32>
    tpu.vector_store %arg8[%c0_59, %c48], %45 {strides = array<i32>} : memref<104x60xf32, #tpu.memory_space<vmem>>, vector<52x12xf32>,
    %c56_60 = arith.constant 56 : index
    %c0_61 = arith.constant 0 : index
    %47 = vector.load %arg10[%c56_60, %c0_61] : memref<112x12xf32, #tpu.memory_space<vmem>>, vector<52x12xf32>
    %c52 = arith.constant 52 : index
    %c0_62 = arith.constant 0 : index
    %48 = vector.load %arg8[%c52, %c0_62] : memref<104x60xf32, #tpu.memory_space<vmem>>, vector<52x12xf32>
    tpu.vector_store %arg8[%c52, %c0_62], %47 {strides = array<i32>} : memref<104x60xf32, #tpu.memory_space<vmem>>, vector<52x12xf32>,
    %c57 = arith.constant 57 : index
    %c0_63 = arith.constant 0 : index
    %49 = vector.load %arg10[%c57, %c0_63] : memref<112x12xf32, #tpu.memory_space<vmem>>, vector<52x12xf32>
    %c52_64 = arith.constant 52 : index
    %c12_65 = arith.constant 12 : index
    %50 = vector.load %arg8[%c52_64, %c12_65] : memref<104x60xf32, #tpu.memory_space<vmem>>, vector<52x12xf32>
    tpu.vector_store %arg8[%c52_64, %c12_65], %49 {strides = array<i32>} : memref<104x60xf32, #tpu.memory_space<vmem>>, vector<52x12xf32>,
    %c58 = arith.constant 58 : index
    %c0_66 = arith.constant 0 : index
    %51 = vector.load %arg10[%c58, %c0_66] : memref<112x12xf32, #tpu.memory_space<vmem>>, vector<52x12xf32>
    %c52_67 = arith.constant 52 : index
    %c24_68 = arith.constant 24 : index
    %52 = vector.load %arg8[%c52_67, %c24_68] : memref<104x60xf32, #tpu.memory_space<vmem>>, vector<52x12xf32>
    tpu.vector_store %arg8[%c52_67, %c24_68], %51 {strides = array<i32>} : memref<104x60xf32, #tpu.memory_space<vmem>>, vector<52x12xf32>,
    %c59 = arith.constant 59 : index
    %c0_69 = arith.constant 0 : index
    %53 = vector.load %arg10[%c59, %c0_69] : memref<112x12xf32, #tpu.memory_space<vmem>>, vector<52x12xf32>
    %c52_70 = arith.constant 52 : index
    %c36_71 = arith.constant 36 : index
    %54 = vector.load %arg8[%c52_70, %c36_71] : memref<104x60xf32, #tpu.memory_space<vmem>>, vector<52x12xf32>
    tpu.vector_store %arg8[%c52_70, %c36_71], %53 {strides = array<i32>} : memref<104x60xf32, #tpu.memory_space<vmem>>, vector<52x12xf32>,
    %c60_72 = arith.constant 60 : index
    %c0_73 = arith.constant 0 : index
    %55 = vector.load %arg10[%c60_72, %c0_73] : memref<112x12xf32, #tpu.memory_space<vmem>>, vector<52x12xf32>
    %c52_74 = arith.constant 52 : index
    %c48_75 = arith.constant 48 : index
    %56 = vector.load %arg8[%c52_74, %c48_75] : memref<104x60xf32, #tpu.memory_space<vmem>>, vector<52x12xf32>
    tpu.vector_store %arg8[%c52_74, %c48_75], %55 {strides = array<i32>} : memref<104x60xf32, #tpu.memory_space<vmem>>, vector<52x12xf32>,
    %c0_76 = arith.constant 0 : index
    %c0_77 = arith.constant 0 : index
    %57 = vector.load %arg8[%c0_76, %c0_77] : memref<104x60xf32, #tpu.memory_space<vmem>>, vector<104x60xf32>
    %cst_78 = arith.constant dense<0.000000e+00> : vector<104x24xf32>
    %58 = tpu.matmul %57, %2, %cst_78 {dimension_numbers = #tpu.dot_dimension_numbers<[1], [0], [0], [1], [0, 0, 1, 1], [], []>} : vector<104x60xf32>, vector<60x24xf32>, vector<104x24xf32> -> vector<104x24xf32>
    %59 = vector.broadcast %3 : vector<1x24xf32> to vector<104x24xf32>
    %60 = arith.addf %58, %59 : vector<104x24xf32>
    %cst_79 = arith.constant 0.000000e+00 : f32
    %61 = vector.broadcast %cst_79 : f32 to vector<104x24xf32>
    %62 = arith.maximumf %60, %61 : vector<104x24xf32>
    %c0_80 = arith.constant 0 : index
    %c0_81 = arith.constant 0 : index
    %63 = vector.load %arg11[%c0_80, %c0_81] : memref<104x24xf32, #tpu.memory_space<vmem>>, vector<104x24xf32>
    tpu.vector_store %arg11[%c0_80, %c0_81], %62 {strides = array<i32>} : memref<104x24xf32, #tpu.memory_space<vmem>>, vector<104x24xf32>,
    %c0_82 = arith.constant 0 : index
    %c0_83 = arith.constant 0 : index
    %64 = vector.load %arg11[%c0_82, %c0_83] : memref<104x24xf32, #tpu.memory_space<vmem>>, vector<48x24xf32>
    %c0_84 = arith.constant 0 : index
    %c0_85 = arith.constant 0 : index
    %65 = vector.load %arg9[%c0_84, %c0_85] : memref<96x120xf32, #tpu.memory_space<vmem>>, vector<48x24xf32>
    tpu.vector_store %arg9[%c0_84, %c0_85], %64 {strides = array<i32>} : memref<96x120xf32, #tpu.memory_space<vmem>>, vector<48x24xf32>,
    %c1_86 = arith.constant 1 : index
    %c0_87 = arith.constant 0 : index
    %66 = vector.load %arg11[%c1_86, %c0_87] : memref<104x24xf32, #tpu.memory_space<vmem>>, vector<48x24xf32>
    %c0_88 = arith.constant 0 : index
    %c24_89 = arith.constant 24 : index
    %67 = vector.load %arg9[%c0_88, %c24_89] : memref<96x120xf32, #tpu.memory_space<vmem>>, vector<48x24xf32>
    tpu.vector_store %arg9[%c0_88, %c24_89], %66 {strides = array<i32>} : memref<96x120xf32, #tpu.memory_space<vmem>>, vector<48x24xf32>,
    %c2_90 = arith.constant 2 : index
    %c0_91 = arith.constant 0 : index
    %68 = vector.load %arg11[%c2_90, %c0_91] : memref<104x24xf32, #tpu.memory_space<vmem>>, vector<48x24xf32>
    %c0_92 = arith.constant 0 : index
    %c48_93 = arith.constant 48 : index
    %69 = vector.load %arg9[%c0_92, %c48_93] : memref<96x120xf32, #tpu.memory_space<vmem>>, vector<48x24xf32>
    tpu.vector_store %arg9[%c0_92, %c48_93], %68 {strides = array<i32>} : memref<96x120xf32, #tpu.memory_space<vmem>>, vector<48x24xf32>,
    %c3_94 = arith.constant 3 : index
    %c0_95 = arith.constant 0 : index
    %70 = vector.load %arg11[%c3_94, %c0_95] : memref<104x24xf32, #tpu.memory_space<vmem>>, vector<48x24xf32>
    %c0_96 = arith.constant 0 : index
    %c72 = arith.constant 72 : index
    %71 = vector.load %arg9[%c0_96, %c72] : memref<96x120xf32, #tpu.memory_space<vmem>>, vector<48x24xf32>
    tpu.vector_store %arg9[%c0_96, %c72], %70 {strides = array<i32>} : memref<96x120xf32, #tpu.memory_space<vmem>>, vector<48x24xf32>,
    %c4_97 = arith.constant 4 : index
    %c0_98 = arith.constant 0 : index
    %72 = vector.load %arg11[%c4_97, %c0_98] : memref<104x24xf32, #tpu.memory_space<vmem>>, vector<48x24xf32>
    %c0_99 = arith.constant 0 : index
    %c96 = arith.constant 96 : index
    %73 = vector.load %arg9[%c0_99, %c96] : memref<96x120xf32, #tpu.memory_space<vmem>>, vector<48x24xf32>
    tpu.vector_store %arg9[%c0_99, %c96], %72 {strides = array<i32>} : memref<96x120xf32, #tpu.memory_space<vmem>>, vector<48x24xf32>,
    %c52_100 = arith.constant 52 : index
    %c0_101 = arith.constant 0 : index
    %74 = vector.load %arg11[%c52_100, %c0_101] : memref<104x24xf32, #tpu.memory_space<vmem>>, vector<48x24xf32>
    %c48_102 = arith.constant 48 : index
    %c0_103 = arith.constant 0 : index
    %75 = vector.load %arg9[%c48_102, %c0_103] : memref<96x120xf32, #tpu.memory_space<vmem>>, vector<48x24xf32>
    tpu.vector_store %arg9[%c48_102, %c0_103], %74 {strides = array<i32>} : memref<96x120xf32, #tpu.memory_space<vmem>>, vector<48x24xf32>,
    %c53 = arith.constant 53 : index
    %c0_104 = arith.constant 0 : index
    %76 = vector.load %arg11[%c53, %c0_104] : memref<104x24xf32, #tpu.memory_space<vmem>>, vector<48x24xf32>
    %c48_105 = arith.constant 48 : index
    %c24_106 = arith.constant 24 : index
    %77 = vector.load %arg9[%c48_105, %c24_106] : memref<96x120xf32, #tpu.memory_space<vmem>>, vector<48x24xf32>
    tpu.vector_store %arg9[%c48_105, %c24_106], %76 {strides = array<i32>} : memref<96x120xf32, #tpu.memory_space<vmem>>, vector<48x24xf32>,
    %c54 = arith.constant 54 : index
    %c0_107 = arith.constant 0 : index
    %78 = vector.load %arg11[%c54, %c0_107] : memref<104x24xf32, #tpu.memory_space<vmem>>, vector<48x24xf32>
    %c48_108 = arith.constant 48 : index
    %c48_109 = arith.constant 48 : index
    %79 = vector.load %arg9[%c48_108, %c48_109] : memref<96x120xf32, #tpu.memory_space<vmem>>, vector<48x24xf32>
    tpu.vector_store %arg9[%c48_108, %c48_109], %78 {strides = array<i32>} : memref<96x120xf32, #tpu.memory_space<vmem>>, vector<48x24xf32>,
    %c55 = arith.constant 55 : index
    %c0_110 = arith.constant 0 : index
    %80 = vector.load %arg11[%c55, %c0_110] : memref<104x24xf32, #tpu.memory_space<vmem>>, vector<48x24xf32>
    %c48_111 = arith.constant 48 : index
    %c72_112 = arith.constant 72 : index
    %81 = vector.load %arg9[%c48_111, %c72_112] : memref<96x120xf32, #tpu.memory_space<vmem>>, vector<48x24xf32>
    tpu.vector_store %arg9[%c48_111, %c72_112], %80 {strides = array<i32>} : memref<96x120xf32, #tpu.memory_space<vmem>>, vector<48x24xf32>,
    %c56_113 = arith.constant 56 : index
    %c0_114 = arith.constant 0 : index
    %82 = vector.load %arg11[%c56_113, %c0_114] : memref<104x24xf32, #tpu.memory_space<vmem>>, vector<48x24xf32>
    %c48_115 = arith.constant 48 : index
    %c96_116 = arith.constant 96 : index
    %83 = vector.load %arg9[%c48_115, %c96_116] : memref<96x120xf32, #tpu.memory_space<vmem>>, vector<48x24xf32>
    tpu.vector_store %arg9[%c48_115, %c96_116], %82 {strides = array<i32>} : memref<96x120xf32, #tpu.memory_space<vmem>>, vector<48x24xf32>,
    %c0_117 = arith.constant 0 : index
    %c0_118 = arith.constant 0 : index
    %84 = vector.load %arg9[%c0_117, %c0_118] : memref<96x120xf32, #tpu.memory_space<vmem>>, vector<96x120xf32>
    %cst_119 = arith.constant dense<0.000000e+00> : vector<96x48xf32>
    %85 = tpu.matmul %84, %4, %cst_119 {dimension_numbers = #tpu.dot_dimension_numbers<[1], [0], [0], [1], [0, 0, 1, 1], [], []>} : vector<96x120xf32>, vector<120x48xf32>, vector<96x48xf32> -> vector<96x48xf32>
    %86 = vector.broadcast %5 : vector<1x48xf32> to vector<96x48xf32>
    %87 = arith.addf %85, %86 : vector<96x48xf32>
    %cst_120 = arith.constant 0.000000e+00 : f32
    %88 = vector.broadcast %cst_120 : f32 to vector<96x48xf32>
    %89 = arith.maximumf %87, %88 : vector<96x48xf32>
    %90 = vector.shape_cast %89 : vector<96x48xf32> to vector<2x2304xf32>
    %91 = arith.truncf %90 : vector<2x2304xf32> to vector<2x2304xbf16>
    %c0_121 = arith.constant 0 : index
    %c0_122 = arith.constant 0 : index
    %92 = vector.load %arg3[%c0_121, %c0_122] : memref<2304x256xbf16, #tpu.memory_space<vmem>>, vector<2304x256xbf16>
    %cst_123 = arith.constant dense<0.000000e+00> : vector<2x256xf32>
    %93 = tpu.matmul %91, %92, %cst_123 {dimension_numbers = #tpu.dot_dimension_numbers<[1], [0], [0], [1], [0, 0, 1, 1], [], []>} : vector<2x2304xbf16>, vector<2304x256xbf16>, vector<2x256xf32> -> vector<2x256xf32>
    %c0_124 = arith.constant 0 : index
    %c0_125 = arith.constant 0 : index
    %94 = vector.load %arg4[%c0_124, %c0_125] : memref<1x256xf32, #tpu.memory_space<vmem>>, vector<1x256xf32>
    %95 = vector.broadcast %94 : vector<1x256xf32> to vector<2x256xf32>
    %96 = arith.addf %93, %95 : vector<2x256xf32>
    %cst_126 = arith.constant 0.000000e+00 : f32
    %97 = vector.broadcast %cst_126 : f32 to vector<2x256xf32>
    %98 = arith.maximumf %96, %97 : vector<2x256xf32>
    %cst_127 = arith.constant dense<0.000000e+00> : vector<2x64xf32>
    %99 = tpu.matmul %98, %6, %cst_127 {dimension_numbers = #tpu.dot_dimension_numbers<[1], [0], [0], [1], [0, 0, 1, 1], [], []>} : vector<2x256xf32>, vector<256x64xf32>, vector<2x64xf32> -> vector<2x64xf32>
    %100 = vector.broadcast %7 : vector<1x64xf32> to vector<2x64xf32>
    %101 = arith.addf %99, %100 : vector<2x64xf32>
    %cst_128 = arith.constant 0.000000e+00 : f32
    %102 = vector.broadcast %cst_128 : f32 to vector<2x64xf32>
    %103 = arith.maximumf %101, %102 : vector<2x64xf32>
    %cst_129 = arith.constant dense<0.000000e+00> : vector<2x4xf32>
    %104 = tpu.matmul %103, %8, %cst_129 {dimension_numbers = #tpu.dot_dimension_numbers<[1], [0], [0], [1], [0, 0, 1, 1], [], []>} : vector<2x64xf32>, vector<64x4xf32>, vector<2x4xf32> -> vector<2x4xf32>
    %105 = vector.broadcast %9 : vector<1x4xf32> to vector<2x4xf32>
    %106 = arith.addf %104, %105 : vector<2x4xf32>
    %c0_130 = arith.constant 0 : index
    %c0_131 = arith.constant 0 : index
    %107 = vector.load %arg6[%c0_130, %c0_131] : memref<2x4xf32, #tpu.memory_space<vmem>>, vector<2x4xf32>
    tpu.vector_store %arg6[%c0_130, %c0_131], %106 {strides = array<i32>} : memref<2x4xf32, #tpu.memory_space<vmem>>, vector<2x4xf32>,
    return
  }
  func.func @transform_0(%arg0: i32) -> (i32, i32) {
    %c0_i32 = arith.constant 0 : i32
    %c0_i32_0 = arith.constant 0 : i32
    return %arg0, %c0_i32 : i32, i32
  }
  func.func @transform_1(%arg0: i32) -> (i32, i32) {
    %c0_i32 = arith.constant 0 : i32
    %c0_i32_0 = arith.constant 0 : i32
    %c0_i32_1 = arith.constant 0 : i32
    return %c0_i32, %c0_i32_0 : i32, i32
  }
  func.func @transform_2(%arg0: i32) -> (i32, i32) {
    %c0_i32 = arith.constant 0 : i32
    %c0_i32_0 = arith.constant 0 : i32
    %c0_i32_1 = arith.constant 0 : i32
    return %c0_i32, %c0_i32_0 : i32, i32
  }
  func.func @transform_3(%arg0: i32) -> (i32, i32) {
    %c0_i32 = arith.constant 0 : i32
    %c0_i32_0 = arith.constant 0 : i32
    %c0_i32_1 = arith.constant 0 : i32
    return %c0_i32, %c0_i32_0 : i32, i32
  }
  func.func @transform_4(%arg0: i32) -> (i32, i32) {
    %c0_i32 = arith.constant 0 : i32
    %c0_i32_0 = arith.constant 0 : i32
    %c0_i32_1 = arith.constant 0 : i32
    return %c0_i32, %c0_i32_0 : i32, i32
  }
  func.func @transform_5(%arg0: i32) -> (i32, i32) {
    %c0_i32 = arith.constant 0 : i32
    %c0_i32_0 = arith.constant 0 : i32
    return %arg0, %c0_i32 : i32, i32
  }
}

module attributes {stable_mosaic.version = 11 : i64} {
  func.func @kernel(%arg0: i32, %arg1: memref<120x6xf32, #tpu.memory_space<vmem>>, %arg2: memref<240x48xf32, #tpu.memory_space<vmem>>, %arg3: memref<2304x256xbf16, #tpu.memory_space<vmem>>, %arg4: memref<1x256xf32, #tpu.memory_space<vmem>>, %arg5: memref<336x64xf32, #tpu.memory_space<vmem>>, %arg6: memref<2x4xf32, #tpu.memory_space<vmem>>, %arg7: memref<112x30xf32, #tpu.memory_space<vmem>>, %arg8: memref<104x60xf32, #tpu.memory_space<vmem>>, %arg9: memref<96x120xf32, #tpu.memory_space<vmem>>, %arg10: memref<112x12xf32, #tpu.memory_space<vmem>>, %arg11: memref<104x24xf32, #tpu.memory_space<vmem>>, %arg12: memref<96x48xf32, #tpu.memory_space<vmem>>, %arg13: memref<2x2304xf32, #tpu.memory_space<vmem>>) attributes {dimension_semantics = [#tpu.dimension_semantics<parallel>], iteration_bounds = array<i64: 1>, scalar_prefetch = 0 : i64, scratch_operands = 7 : i64, tpu.core_type = #tpu.core_type<tc>, window_params = [{transform_indices = @transform_0, window_bounds = array<i64: 120, 6>}, {pipeline_mode = #tpu.pipeline_mode<synchronous>, transform_indices = @transform_1, window_bounds = array<i64: 240, 48>}, {pipeline_mode = #tpu.pipeline_mode<synchronous>, transform_indices = @transform_2, window_bounds = array<i64: 2304, 256>}, {pipeline_mode = #tpu.pipeline_mode<synchronous>, transform_indices = @transform_3, window_bounds = array<i64: 1, 256>}, {pipeline_mode = #tpu.pipeline_mode<synchronous>, transform_indices = @transform_4, window_bounds = array<i64: 336, 64>}, {transform_indices = @transform_5, window_bounds = array<i64: 2, 4>}]} {
    %c0 = arith.constant 0 : index
    %c0_0 = arith.constant 0 : index
    %0 = vector.load %arg2[%c0, %c0_0] : memref<240x48xf32, #tpu.memory_space<vmem>>, vector<30x12xf32>
    %c32 = arith.constant 32 : index
    %c0_1 = arith.constant 0 : index
    %1 = vector.load %arg2[%c32, %c0_1] : memref<240x48xf32, #tpu.memory_space<vmem>>, vector<1x12xf32>
    %c40 = arith.constant 40 : index
    %c0_2 = arith.constant 0 : index
    %2 = vector.load %arg2[%c40, %c0_2] : memref<240x48xf32, #tpu.memory_space<vmem>>, vector<60x24xf32>
    %c104 = arith.constant 104 : index
    %c0_3 = arith.constant 0 : index
    %3 = vector.load %arg2[%c104, %c0_3] : memref<240x48xf32, #tpu.memory_space<vmem>>, vector<1x24xf32>
    %c112 = arith.constant 112 : index
    %c0_4 = arith.constant 0 : index
    %4 = vector.load %arg2[%c112, %c0_4] : memref<240x48xf32, #tpu.memory_space<vmem>>, vector<120x48xf32>
    %c232 = arith.constant 232 : index
    %c0_5 = arith.constant 0 : index
    %5 = vector.load %arg2[%c232, %c0_5] : memref<240x48xf32, #tpu.memory_space<vmem>>, vector<1x48xf32>
    %c0_6 = arith.constant 0 : index
    %c0_7 = arith.constant 0 : index
    %6 = vector.load %arg5[%c0_6, %c0_7] : memref<336x64xf32, #tpu.memory_space<vmem>>, vector<256x64xf32>
    %c256 = arith.constant 256 : index
    %c0_8 = arith.constant 0 : index
    %7 = vector.load %arg5[%c256, %c0_8] : memref<336x64xf32, #tpu.memory_space<vmem>>, vector<1x64xf32>
    %c264 = arith.constant 264 : index
    %c0_9 = arith.constant 0 : index
    %8 = vector.load %arg5[%c264, %c0_9] : memref<336x64xf32, #tpu.memory_space<vmem>>, vector<64x4xf32>
    %c328 = arith.constant 328 : index
    %c0_10 = arith.constant 0 : index
    %9 = vector.load %arg5[%c328, %c0_10] : memref<336x64xf32, #tpu.memory_space<vmem>>, vector<1x4xf32>
    %c0_11 = arith.constant 0 : index
    %c0_12 = arith.constant 0 : index
    %10 = vector.load %arg1[%c0_11, %c0_12] : memref<120x6xf32, #tpu.memory_space<vmem>>, vector<56x6xf32>
    %c0_13 = arith.constant 0 : index
    %c0_14 = arith.constant 0 : index
    %11 = vector.load %arg7[%c0_13, %c0_14] : memref<112x30xf32, #tpu.memory_space<vmem>>, vector<56x6xf32>
    tpu.vector_store %arg7[%c0_13, %c0_14], %10 {strides = array<i32>} : memref<112x30xf32, #tpu.memory_space<vmem>>, vector<56x6xf32>,
    %c1 = arith.constant 1 : index
    %c0_15 = arith.constant 0 : index
    %12 = vector.load %arg1[%c1, %c0_15] : memref<120x6xf32, #tpu.memory_space<vmem>>, vector<56x6xf32>
    %c0_16 = arith.constant 0 : index
    %c6 = arith.constant 6 : index
    %13 = vector.load %arg7[%c0_16, %c6] : memref<112x30xf32, #tpu.memory_space<vmem>>, vector<56x6xf32>
    tpu.vector_store %arg7[%c0_16, %c6], %12 {strides = array<i32>} : memref<112x30xf32, #tpu.memory_space<vmem>>, vector<56x6xf32>,
    %c2 = arith.constant 2 : index
    %c0_17 = arith.constant 0 : index
    %14 = vector.load %arg1[%c2, %c0_17] : memref<120x6xf32, #tpu.memory_space<vmem>>, vector<56x6xf32>
    %c0_18 = arith.constant 0 : index
    %c12 = arith.constant 12 : index
    %15 = vector.load %arg7[%c0_18, %c12] : memref<112x30xf32, #tpu.memory_space<vmem>>, vector<56x6xf32>
    tpu.vector_store %arg7[%c0_18, %c12], %14 {strides = array<i32>} : memref<112x30xf32, #tpu.memory_space<vmem>>, vector<56x6xf32>,
    %c3 = arith.constant 3 : index
    %c0_19 = arith.constant 0 : index
    %16 = vector.load %arg1[%c3, %c0_19] : memref<120x6xf32, #tpu.memory_space<vmem>>, vector<56x6xf32>
    %c0_20 = arith.constant 0 : index
    %c18 = arith.constant 18 : index
    %17 = vector.load %arg7[%c0_20, %c18] : memref<112x30xf32, #tpu.memory_space<vmem>>, vector<56x6xf32>
    tpu.vector_store %arg7[%c0_20, %c18], %16 {strides = array<i32>} : memref<112x30xf32, #tpu.memory_space<vmem>>, vector<56x6xf32>,
    %c4 = arith.constant 4 : index
    %c0_21 = arith.constant 0 : index
    %18 = vector.load %arg1[%c4, %c0_21] : memref<120x6xf32, #tpu.memory_space<vmem>>, vector<56x6xf32>
    %c0_22 = arith.constant 0 : index
    %c24 = arith.constant 24 : index
    %19 = vector.load %arg7[%c0_22, %c24] : memref<112x30xf32, #tpu.memory_space<vmem>>, vector<56x6xf32>
    tpu.vector_store %arg7[%c0_22, %c24], %18 {strides = array<i32>} : memref<112x30xf32, #tpu.memory_space<vmem>>, vector<56x6xf32>,
    %c60 = arith.constant 60 : index
    %c0_23 = arith.constant 0 : index
    %20 = vector.load %arg1[%c60, %c0_23] : memref<120x6xf32, #tpu.memory_space<vmem>>, vector<56x6xf32>
    %c56 = arith.constant 56 : index
    %c0_24 = arith.constant 0 : index
    %21 = vector.load %arg7[%c56, %c0_24] : memref<112x30xf32, #tpu.memory_space<vmem>>, vector<56x6xf32>
    tpu.vector_store %arg7[%c56, %c0_24], %20 {strides = array<i32>} : memref<112x30xf32, #tpu.memory_space<vmem>>, vector<56x6xf32>,
    %c61 = arith.constant 61 : index
    %c0_25 = arith.constant 0 : index
    %22 = vector.load %arg1[%c61, %c0_25] : memref<120x6xf32, #tpu.memory_space<vmem>>, vector<56x6xf32>
    %c56_26 = arith.constant 56 : index
    %c6_27 = arith.constant 6 : index
    %23 = vector.load %arg7[%c56_26, %c6_27] : memref<112x30xf32, #tpu.memory_space<vmem>>, vector<56x6xf32>
    tpu.vector_store %arg7[%c56_26, %c6_27], %22 {strides = array<i32>} : memref<112x30xf32, #tpu.memory_space<vmem>>, vector<56x6xf32>,
    %c62 = arith.constant 62 : index
    %c0_28 = arith.constant 0 : index
    %24 = vector.load %arg1[%c62, %c0_28] : memref<120x6xf32, #tpu.memory_space<vmem>>, vector<56x6xf32>
    %c56_29 = arith.constant 56 : index
    %c12_30 = arith.constant 12 : index
    %25 = vector.load %arg7[%c56_29, %c12_30] : memref<112x30xf32, #tpu.memory_space<vmem>>, vector<56x6xf32>
    tpu.vector_store %arg7[%c56_29, %c12_30], %24 {strides = array<i32>} : memref<112x30xf32, #tpu.memory_space<vmem>>, vector<56x6xf32>,
    %c63 = arith.constant 63 : index
    %c0_31 = arith.constant 0 : index
    %26 = vector.load %arg1[%c63, %c0_31] : memref<120x6xf32, #tpu.memory_space<vmem>>, vector<56x6xf32>
    %c56_32 = arith.constant 56 : index
    %c18_33 = arith.constant 18 : index
    %27 = vector.load %arg7[%c56_32, %c18_33] : memref<112x30xf32, #tpu.memory_space<vmem>>, vector<56x6xf32>
    tpu.vector_store %arg7[%c56_32, %c18_33], %26 {strides = array<i32>} : memref<112x30xf32, #tpu.memory_space<vmem>>, vector<56x6xf32>,
    %c64 = arith.constant 64 : index
    %c0_34 = arith.constant 0 : index
    %28 = vector.load %arg1[%c64, %c0_34] : memref<120x6xf32, #tpu.memory_space<vmem>>, vector<56x6xf32>
    %c56_35 = arith.constant 56 : index
    %c24_36 = arith.constant 24 : index
    %29 = vector.load %arg7[%c56_35, %c24_36] : memref<112x30xf32, #tpu.memory_space<vmem>>, vector<56x6xf32>
    tpu.vector_store %arg7[%c56_35, %c24_36], %28 {strides = array<i32>} : memref<112x30xf32, #tpu.memory_space<vmem>>, vector<56x6xf32>,
    %c0_37 = arith.constant 0 : index
    %c0_38 = arith.constant 0 : index
    %30 = vector.load %arg7[%c0_37, %c0_38] : memref<112x30xf32, #tpu.memory_space<vmem>>, vector<112x30xf32>
    %cst = arith.constant dense<0.000000e+00> : vector<112x12xf32>
    %31 = tpu.matmul %30, %0, %cst {dimension_numbers = #tpu.dot_dimension_numbers<[1], [0], [0], [1], [0, 0, 1, 1], [], []>} : vector<112x30xf32>, vector<30x12xf32>, vector<112x12xf32> -> vector<112x12xf32>
    %32 = vector.broadcast %1 : vector<1x12xf32> to vector<112x12xf32>
    %33 = arith.addf %31, %32 : vector<112x12xf32>
    %cst_39 = arith.constant 0.000000e+00 : f32
    %34 = vector.broadcast %cst_39 : f32 to vector<112x12xf32>
    %35 = arith.maximumf %33, %34 : vector<112x12xf32>
    %c0_40 = arith.constant 0 : index
    %c0_41 = arith.constant 0 : index
    %36 = vector.load %arg10[%c0_40, %c0_41] : memref<112x12xf32, #tpu.memory_space<vmem>>, vector<112x12xf32>
    tpu.vector_store %arg10[%c0_40, %c0_41], %35 {strides = array<i32>} : memref<112x12xf32, #tpu.memory_space<vmem>>, vector<112x12xf32>,
    %c0_42 = arith.constant 0 : index
    %c0_43 = arith.constant 0 : index
    %37 = vector.load %arg10[%c0_42, %c0_43] : memref<112x12xf32, #tpu.memory_space<vmem>>, vector<52x12xf32>
    %c0_44 = arith.constant 0 : index
    %c0_45 = arith.constant 0 : index
    %38 = vector.load %arg8[%c0_44, %c0_45] : memref<104x60xf32, #tpu.memory_space<vmem>>, vector<52x12xf32>
    tpu.vector_store %arg8[%c0_44, %c0_45], %37 {strides = array<i32>} : memref<104x60xf32, #tpu.memory_space<vmem>>, vector<52x12xf32>,
    %c1_46 = arith.constant 1 : index
    %c0_47 = arith.constant 0 : index
    %39 = vector.load %arg10[%c1_46, %c0_47] : memref<112x12xf32, #tpu.memory_space<vmem>>, vector<52x12xf32>
    %c0_48 = arith.constant 0 : index
    %c12_49 = arith.constant 12 : index
    %40 = vector.load %arg8[%c0_48, %c12_49] : memref<104x60xf32, #tpu.memory_space<vmem>>, vector<52x12xf32>
    tpu.vector_store %arg8[%c0_48, %c12_49], %39 {strides = array<i32>} : memref<104x60xf32, #tpu.memory_space<vmem>>, vector<52x12xf32>,
    %c2_50 = arith.constant 2 : index
    %c0_51 = arith.constant 0 : index
    %41 = vector.load %arg10[%c2_50, %c0_51] : memref<112x12xf32, #tpu.memory_space<vmem>>, vector<52x12xf32>
    %c0_52 = arith.constant 0 : index
    %c24_53 = arith.constant 24 : index
    %42 = vector.load %arg8[%c0_52, %c24_53] : memref<104x60xf32, #tpu.memory_space<vmem>>, vector<52x12xf32>
    tpu.vector_store %arg8[%c0_52, %c24_53], %41 {strides = array<i32>} : memref<104x60xf32, #tpu.memory_space<vmem>>, vector<52x12xf32>,
    %c3_54 = arith.constant 3 : index
    %c0_55 = arith.constant 0 : index
    %43 = vector.load %arg10[%c3_54, %c0_55] : memref<112x12xf32, #tpu.memory_space<vmem>>, vector<52x12xf32>
    %c0_56 = arith.constant 0 : index
    %c36 = arith.constant 36 : index
    %44 = vector.load %arg8[%c0_56, %c36] : memref<104x60xf32, #tpu.memory_space<vmem>>, vector<52x12xf32>
    tpu.vector_store %arg8[%c0_56, %c36], %43 {strides = array<i32>} : memref<104x60xf32, #tpu.memory_space<vmem>>, vector<52x12xf32>,
    %c4_57 = arith.constant 4 : index
    %c0_58 = arith.constant 0 : index
    %45 = vector.load %arg10[%c4_57, %c0_58] : memref<112x12xf32, #tpu.memory_space<vmem>>, vector<52x12xf32>
    %c0_59 = arith.constant 0 : index
    %c48 = arith.constant 48 : index
    %46 = vector.load %arg8[%c0_59, %c48] : memref<104x60xf32, #tpu.memory_space<vmem>>, vector<52x12xf32>
    tpu.vector_store %arg8[%c0_59, %c48], %45 {strides = array<i32>} : memref<104x60xf32, #tpu.memory_space<vmem>>, vector<52x12xf32>,
    %c56_60 = arith.constant 56 : index
    %c0_61 = arith.constant 0 : index
    %47 = vector.load %arg10[%c56_60, %c0_61] : memref<112x12xf32, #tpu.memory_space<vmem>>, vector<52x12xf32>
    %c52 = arith.constant 52 : index
    %c0_62 = arith.constant 0 : index
    %48 = vector.load %arg8[%c52, %c0_62] : memref<104x60xf32, #tpu.memory_space<vmem>>, vector<52x12xf32>
    tpu.vector_store %arg8[%c52, %c0_62], %47 {strides = array<i32>} : memref<104x60xf32, #tpu.memory_space<vmem>>, vector<52x12xf32>,
    %c57 = arith.constant 57 : index
    %c0_63 = arith.constant 0 : index
    %49 = vector.load %arg10[%c57, %c0_63] : memref<112x12xf32, #tpu.memory_space<vmem>>, vector<52x12xf32>
    %c52_64 = arith.constant 52 : index
    %c12_65 = arith.constant 12 : index
    %50 = vector.load %arg8[%c52_64, %c12_65] : memref<104x60xf32, #tpu.memory_space<vmem>>, vector<52x12xf32>
    tpu.vector_store %arg8[%c52_64, %c12_65], %49 {strides = array<i32>} : memref<104x60xf32, #tpu.memory_space<vmem>>, vector<52x12xf32>,
    %c58 = arith.constant 58 : index
    %c0_66 = arith.constant 0 : index
    %51 = vector.load %arg10[%c58, %c0_66] : memref<112x12xf32, #tpu.memory_space<vmem>>, vector<52x12xf32>
    %c52_67 = arith.constant 52 : index
    %c24_68 = arith.constant 24 : index
    %52 = vector.load %arg8[%c52_67, %c24_68] : memref<104x60xf32, #tpu.memory_space<vmem>>, vector<52x12xf32>
    tpu.vector_store %arg8[%c52_67, %c24_68], %51 {strides = array<i32>} : memref<104x60xf32, #tpu.memory_space<vmem>>, vector<52x12xf32>,
    %c59 = arith.constant 59 : index
    %c0_69 = arith.constant 0 : index
    %53 = vector.load %arg10[%c59, %c0_69] : memref<112x12xf32, #tpu.memory_space<vmem>>, vector<52x12xf32>
    %c52_70 = arith.constant 52 : index
    %c36_71 = arith.constant 36 : index
    %54 = vector.load %arg8[%c52_70, %c36_71] : memref<104x60xf32, #tpu.memory_space<vmem>>, vector<52x12xf32>
    tpu.vector_store %arg8[%c52_70, %c36_71], %53 {strides = array<i32>} : memref<104x60xf32, #tpu.memory_space<vmem>>, vector<52x12xf32>,
    %c60_72 = arith.constant 60 : index
    %c0_73 = arith.constant 0 : index
    %55 = vector.load %arg10[%c60_72, %c0_73] : memref<112x12xf32, #tpu.memory_space<vmem>>, vector<52x12xf32>
    %c52_74 = arith.constant 52 : index
    %c48_75 = arith.constant 48 : index
    %56 = vector.load %arg8[%c52_74, %c48_75] : memref<104x60xf32, #tpu.memory_space<vmem>>, vector<52x12xf32>
    tpu.vector_store %arg8[%c52_74, %c48_75], %55 {strides = array<i32>} : memref<104x60xf32, #tpu.memory_space<vmem>>, vector<52x12xf32>,
    %c0_76 = arith.constant 0 : index
    %c0_77 = arith.constant 0 : index
    %57 = vector.load %arg8[%c0_76, %c0_77] : memref<104x60xf32, #tpu.memory_space<vmem>>, vector<104x60xf32>
    %cst_78 = arith.constant dense<0.000000e+00> : vector<104x24xf32>
    %58 = tpu.matmul %57, %2, %cst_78 {dimension_numbers = #tpu.dot_dimension_numbers<[1], [0], [0], [1], [0, 0, 1, 1], [], []>} : vector<104x60xf32>, vector<60x24xf32>, vector<104x24xf32> -> vector<104x24xf32>
    %59 = vector.broadcast %3 : vector<1x24xf32> to vector<104x24xf32>
    %60 = arith.addf %58, %59 : vector<104x24xf32>
    %cst_79 = arith.constant 0.000000e+00 : f32
    %61 = vector.broadcast %cst_79 : f32 to vector<104x24xf32>
    %62 = arith.maximumf %60, %61 : vector<104x24xf32>
    %c0_80 = arith.constant 0 : index
    %c0_81 = arith.constant 0 : index
    %63 = vector.load %arg11[%c0_80, %c0_81] : memref<104x24xf32, #tpu.memory_space<vmem>>, vector<104x24xf32>
    tpu.vector_store %arg11[%c0_80, %c0_81], %62 {strides = array<i32>} : memref<104x24xf32, #tpu.memory_space<vmem>>, vector<104x24xf32>,
    %c0_82 = arith.constant 0 : index
    %c0_83 = arith.constant 0 : index
    %64 = vector.load %arg11[%c0_82, %c0_83] : memref<104x24xf32, #tpu.memory_space<vmem>>, vector<48x24xf32>
    %c0_84 = arith.constant 0 : index
    %c0_85 = arith.constant 0 : index
    %65 = vector.load %arg9[%c0_84, %c0_85] : memref<96x120xf32, #tpu.memory_space<vmem>>, vector<48x24xf32>
    tpu.vector_store %arg9[%c0_84, %c0_85], %64 {strides = array<i32>} : memref<96x120xf32, #tpu.memory_space<vmem>>, vector<48x24xf32>,
    %c1_86 = arith.constant 1 : index
    %c0_87 = arith.constant 0 : index
    %66 = vector.load %arg11[%c1_86, %c0_87] : memref<104x24xf32, #tpu.memory_space<vmem>>, vector<48x24xf32>
    %c0_88 = arith.constant 0 : index
    %c24_89 = arith.constant 24 : index
    %67 = vector.load %arg9[%c0_88, %c24_89] : memref<96x120xf32, #tpu.memory_space<vmem>>, vector<48x24xf32>
    tpu.vector_store %arg9[%c0_88, %c24_89], %66 {strides = array<i32>} : memref<96x120xf32, #tpu.memory_space<vmem>>, vector<48x24xf32>,
    %c2_90 = arith.constant 2 : index
    %c0_91 = arith.constant 0 : index
    %68 = vector.load %arg11[%c2_90, %c0_91] : memref<104x24xf32, #tpu.memory_space<vmem>>, vector<48x24xf32>
    %c0_92 = arith.constant 0 : index
    %c48_93 = arith.constant 48 : index
    %69 = vector.load %arg9[%c0_92, %c48_93] : memref<96x120xf32, #tpu.memory_space<vmem>>, vector<48x24xf32>
    tpu.vector_store %arg9[%c0_92, %c48_93], %68 {strides = array<i32>} : memref<96x120xf32, #tpu.memory_space<vmem>>, vector<48x24xf32>,
    %c3_94 = arith.constant 3 : index
    %c0_95 = arith.constant 0 : index
    %70 = vector.load %arg11[%c3_94, %c0_95] : memref<104x24xf32, #tpu.memory_space<vmem>>, vector<48x24xf32>
    %c0_96 = arith.constant 0 : index
    %c72 = arith.constant 72 : index
    %71 = vector.load %arg9[%c0_96, %c72] : memref<96x120xf32, #tpu.memory_space<vmem>>, vector<48x24xf32>
    tpu.vector_store %arg9[%c0_96, %c72], %70 {strides = array<i32>} : memref<96x120xf32, #tpu.memory_space<vmem>>, vector<48x24xf32>,
    %c4_97 = arith.constant 4 : index
    %c0_98 = arith.constant 0 : index
    %72 = vector.load %arg11[%c4_97, %c0_98] : memref<104x24xf32, #tpu.memory_space<vmem>>, vector<48x24xf32>
    %c0_99 = arith.constant 0 : index
    %c96 = arith.constant 96 : index
    %73 = vector.load %arg9[%c0_99, %c96] : memref<96x120xf32, #tpu.memory_space<vmem>>, vector<48x24xf32>
    tpu.vector_store %arg9[%c0_99, %c96], %72 {strides = array<i32>} : memref<96x120xf32, #tpu.memory_space<vmem>>, vector<48x24xf32>,
    %c52_100 = arith.constant 52 : index
    %c0_101 = arith.constant 0 : index
    %74 = vector.load %arg11[%c52_100, %c0_101] : memref<104x24xf32, #tpu.memory_space<vmem>>, vector<48x24xf32>
    %c48_102 = arith.constant 48 : index
    %c0_103 = arith.constant 0 : index
    %75 = vector.load %arg9[%c48_102, %c0_103] : memref<96x120xf32, #tpu.memory_space<vmem>>, vector<48x24xf32>
    tpu.vector_store %arg9[%c48_102, %c0_103], %74 {strides = array<i32>} : memref<96x120xf32, #tpu.memory_space<vmem>>, vector<48x24xf32>,
    %c53 = arith.constant 53 : index
    %c0_104 = arith.constant 0 : index
    %76 = vector.load %arg11[%c53, %c0_104] : memref<104x24xf32, #tpu.memory_space<vmem>>, vector<48x24xf32>
    %c48_105 = arith.constant 48 : index
    %c24_106 = arith.constant 24 : index
    %77 = vector.load %arg9[%c48_105, %c24_106] : memref<96x120xf32, #tpu.memory_space<vmem>>, vector<48x24xf32>
    tpu.vector_store %arg9[%c48_105, %c24_106], %76 {strides = array<i32>} : memref<96x120xf32, #tpu.memory_space<vmem>>, vector<48x24xf32>,
    %c54 = arith.constant 54 : index
    %c0_107 = arith.constant 0 : index
    %78 = vector.load %arg11[%c54, %c0_107] : memref<104x24xf32, #tpu.memory_space<vmem>>, vector<48x24xf32>
    %c48_108 = arith.constant 48 : index
    %c48_109 = arith.constant 48 : index
    %79 = vector.load %arg9[%c48_108, %c48_109] : memref<96x120xf32, #tpu.memory_space<vmem>>, vector<48x24xf32>
    tpu.vector_store %arg9[%c48_108, %c48_109], %78 {strides = array<i32>} : memref<96x120xf32, #tpu.memory_space<vmem>>, vector<48x24xf32>,
    %c55 = arith.constant 55 : index
    %c0_110 = arith.constant 0 : index
    %80 = vector.load %arg11[%c55, %c0_110] : memref<104x24xf32, #tpu.memory_space<vmem>>, vector<48x24xf32>
    %c48_111 = arith.constant 48 : index
    %c72_112 = arith.constant 72 : index
    %81 = vector.load %arg9[%c48_111, %c72_112] : memref<96x120xf32, #tpu.memory_space<vmem>>, vector<48x24xf32>
    tpu.vector_store %arg9[%c48_111, %c72_112], %80 {strides = array<i32>} : memref<96x120xf32, #tpu.memory_space<vmem>>, vector<48x24xf32>,
    %c56_113 = arith.constant 56 : index
    %c0_114 = arith.constant 0 : index
    %82 = vector.load %arg11[%c56_113, %c0_114] : memref<104x24xf32, #tpu.memory_space<vmem>>, vector<48x24xf32>
    %c48_115 = arith.constant 48 : index
    %c96_116 = arith.constant 96 : index
    %83 = vector.load %arg9[%c48_115, %c96_116] : memref<96x120xf32, #tpu.memory_space<vmem>>, vector<48x24xf32>
    tpu.vector_store %arg9[%c48_115, %c96_116], %82 {strides = array<i32>} : memref<96x120xf32, #tpu.memory_space<vmem>>, vector<48x24xf32>,
    %c0_117 = arith.constant 0 : index
    %c0_118 = arith.constant 0 : index
    %84 = vector.load %arg9[%c0_117, %c0_118] : memref<96x120xf32, #tpu.memory_space<vmem>>, vector<96x120xf32>
    %cst_119 = arith.constant dense<0.000000e+00> : vector<96x48xf32>
    %85 = tpu.matmul %84, %4, %cst_119 {dimension_numbers = #tpu.dot_dimension_numbers<[1], [0], [0], [1], [0, 0, 1, 1], [], []>} : vector<96x120xf32>, vector<120x48xf32>, vector<96x48xf32> -> vector<96x48xf32>
    %86 = vector.broadcast %5 : vector<1x48xf32> to vector<96x48xf32>
    %87 = arith.addf %85, %86 : vector<96x48xf32>
    %cst_120 = arith.constant 0.000000e+00 : f32
    %88 = vector.broadcast %cst_120 : f32 to vector<96x48xf32>
    %89 = arith.maximumf %87, %88 : vector<96x48xf32>
    %c0_121 = arith.constant 0 : index
    %c0_122 = arith.constant 0 : index
    %90 = vector.load %arg12[%c0_121, %c0_122] : memref<96x48xf32, #tpu.memory_space<vmem>>, vector<96x48xf32>
    tpu.vector_store %arg12[%c0_121, %c0_122], %89 {strides = array<i32>} : memref<96x48xf32, #tpu.memory_space<vmem>>, vector<96x48xf32>,
    %c0_123 = arith.constant 0 : index
    %c0_124 = arith.constant 0 : index
    %91 = vector.load %arg12[%c0_123, %c0_124] : memref<96x48xf32, #tpu.memory_space<vmem>>, vector<1x48xf32>
    %c0_125 = arith.constant 0 : index
    %c0_126 = arith.constant 0 : index
    %92 = vector.load %arg13[%c0_125, %c0_126] : memref<2x2304xf32, #tpu.memory_space<vmem>>, vector<1x48xf32>
    tpu.vector_store %arg13[%c0_125, %c0_126], %91 {strides = array<i32>} : memref<2x2304xf32, #tpu.memory_space<vmem>>, vector<1x48xf32>,
    %c1_127 = arith.constant 1 : index
    %c0_128 = arith.constant 0 : index
    %93 = vector.load %arg12[%c1_127, %c0_128] : memref<96x48xf32, #tpu.memory_space<vmem>>, vector<1x48xf32>
    %c0_129 = arith.constant 0 : index
    %c48_130 = arith.constant 48 : index
    %94 = vector.load %arg13[%c0_129, %c48_130] : memref<2x2304xf32, #tpu.memory_space<vmem>>, vector<1x48xf32>
    tpu.vector_store %arg13[%c0_129, %c48_130], %93 {strides = array<i32>} : memref<2x2304xf32, #tpu.memory_space<vmem>>, vector<1x48xf32>,
    %c2_131 = arith.constant 2 : index
    %c0_132 = arith.constant 0 : index
    %95 = vector.load %arg12[%c2_131, %c0_132] : memref<96x48xf32, #tpu.memory_space<vmem>>, vector<1x48xf32>
    %c0_133 = arith.constant 0 : index
    %c96_134 = arith.constant 96 : index
    %96 = vector.load %arg13[%c0_133, %c96_134] : memref<2x2304xf32, #tpu.memory_space<vmem>>, vector<1x48xf32>
    tpu.vector_store %arg13[%c0_133, %c96_134], %95 {strides = array<i32>} : memref<2x2304xf32, #tpu.memory_space<vmem>>, vector<1x48xf32>,
    %c3_135 = arith.constant 3 : index
    %c0_136 = arith.constant 0 : index
    %97 = vector.load %arg12[%c3_135, %c0_136] : memref<96x48xf32, #tpu.memory_space<vmem>>, vector<1x48xf32>
    %c0_137 = arith.constant 0 : index
    %c144 = arith.constant 144 : index
    %98 = vector.load %arg13[%c0_137, %c144] : memref<2x2304xf32, #tpu.memory_space<vmem>>, vector<1x48xf32>
    tpu.vector_store %arg13[%c0_137, %c144], %97 {strides = array<i32>} : memref<2x2304xf32, #tpu.memory_space<vmem>>, vector<1x48xf32>,
    %c4_138 = arith.constant 4 : index
    %c0_139 = arith.constant 0 : index
    %99 = vector.load %arg12[%c4_138, %c0_139] : memref<96x48xf32, #tpu.memory_space<vmem>>, vector<1x48xf32>
    %c0_140 = arith.constant 0 : index
    %c192 = arith.constant 192 : index
    %100 = vector.load %arg13[%c0_140, %c192] : memref<2x2304xf32, #tpu.memory_space<vmem>>, vector<1x48xf32>
    tpu.vector_store %arg13[%c0_140, %c192], %99 {strides = array<i32>} : memref<2x2304xf32, #tpu.memory_space<vmem>>, vector<1x48xf32>,
    %c5 = arith.constant 5 : index
    %c0_141 = arith.constant 0 : index
    %101 = vector.load %arg12[%c5, %c0_141] : memref<96x48xf32, #tpu.memory_space<vmem>>, vector<1x48xf32>
    %c0_142 = arith.constant 0 : index
    %c240 = arith.constant 240 : index
    %102 = vector.load %arg13[%c0_142, %c240] : memref<2x2304xf32, #tpu.memory_space<vmem>>, vector<1x48xf32>
    tpu.vector_store %arg13[%c0_142, %c240], %101 {strides = array<i32>} : memref<2x2304xf32, #tpu.memory_space<vmem>>, vector<1x48xf32>,
    %c6_143 = arith.constant 6 : index
    %c0_144 = arith.constant 0 : index
    %103 = vector.load %arg12[%c6_143, %c0_144] : memref<96x48xf32, #tpu.memory_space<vmem>>, vector<1x48xf32>
    %c0_145 = arith.constant 0 : index
    %c288 = arith.constant 288 : index
    %104 = vector.load %arg13[%c0_145, %c288] : memref<2x2304xf32, #tpu.memory_space<vmem>>, vector<1x48xf32>
    tpu.vector_store %arg13[%c0_145, %c288], %103 {strides = array<i32>} : memref<2x2304xf32, #tpu.memory_space<vmem>>, vector<1x48xf32>,
    %c7 = arith.constant 7 : index
    %c0_146 = arith.constant 0 : index
    %105 = vector.load %arg12[%c7, %c0_146] : memref<96x48xf32, #tpu.memory_space<vmem>>, vector<1x48xf32>
    %c0_147 = arith.constant 0 : index
    %c336 = arith.constant 336 : index
    %106 = vector.load %arg13[%c0_147, %c336] : memref<2x2304xf32, #tpu.memory_space<vmem>>, vector<1x48xf32>
    tpu.vector_store %arg13[%c0_147, %c336], %105 {strides = array<i32>} : memref<2x2304xf32, #tpu.memory_space<vmem>>, vector<1x48xf32>,
    %c8 = arith.constant 8 : index
    %c0_148 = arith.constant 0 : index
    %107 = vector.load %arg12[%c8, %c0_148] : memref<96x48xf32, #tpu.memory_space<vmem>>, vector<1x48xf32>
    %c0_149 = arith.constant 0 : index
    %c384 = arith.constant 384 : index
    %108 = vector.load %arg13[%c0_149, %c384] : memref<2x2304xf32, #tpu.memory_space<vmem>>, vector<1x48xf32>
    tpu.vector_store %arg13[%c0_149, %c384], %107 {strides = array<i32>} : memref<2x2304xf32, #tpu.memory_space<vmem>>, vector<1x48xf32>,
    %c9 = arith.constant 9 : index
    %c0_150 = arith.constant 0 : index
    %109 = vector.load %arg12[%c9, %c0_150] : memref<96x48xf32, #tpu.memory_space<vmem>>, vector<1x48xf32>
    %c0_151 = arith.constant 0 : index
    %c432 = arith.constant 432 : index
    %110 = vector.load %arg13[%c0_151, %c432] : memref<2x2304xf32, #tpu.memory_space<vmem>>, vector<1x48xf32>
    tpu.vector_store %arg13[%c0_151, %c432], %109 {strides = array<i32>} : memref<2x2304xf32, #tpu.memory_space<vmem>>, vector<1x48xf32>,
    %c10 = arith.constant 10 : index
    %c0_152 = arith.constant 0 : index
    %111 = vector.load %arg12[%c10, %c0_152] : memref<96x48xf32, #tpu.memory_space<vmem>>, vector<1x48xf32>
    %c0_153 = arith.constant 0 : index
    %c480 = arith.constant 480 : index
    %112 = vector.load %arg13[%c0_153, %c480] : memref<2x2304xf32, #tpu.memory_space<vmem>>, vector<1x48xf32>
    tpu.vector_store %arg13[%c0_153, %c480], %111 {strides = array<i32>} : memref<2x2304xf32, #tpu.memory_space<vmem>>, vector<1x48xf32>,
    %c11 = arith.constant 11 : index
    %c0_154 = arith.constant 0 : index
    %113 = vector.load %arg12[%c11, %c0_154] : memref<96x48xf32, #tpu.memory_space<vmem>>, vector<1x48xf32>
    %c0_155 = arith.constant 0 : index
    %c528 = arith.constant 528 : index
    %114 = vector.load %arg13[%c0_155, %c528] : memref<2x2304xf32, #tpu.memory_space<vmem>>, vector<1x48xf32>
    tpu.vector_store %arg13[%c0_155, %c528], %113 {strides = array<i32>} : memref<2x2304xf32, #tpu.memory_space<vmem>>, vector<1x48xf32>,
    %c12_156 = arith.constant 12 : index
    %c0_157 = arith.constant 0 : index
    %115 = vector.load %arg12[%c12_156, %c0_157] : memref<96x48xf32, #tpu.memory_space<vmem>>, vector<1x48xf32>
    %c0_158 = arith.constant 0 : index
    %c576 = arith.constant 576 : index
    %116 = vector.load %arg13[%c0_158, %c576] : memref<2x2304xf32, #tpu.memory_space<vmem>>, vector<1x48xf32>
    tpu.vector_store %arg13[%c0_158, %c576], %115 {strides = array<i32>} : memref<2x2304xf32, #tpu.memory_space<vmem>>, vector<1x48xf32>,
    %c13 = arith.constant 13 : index
    %c0_159 = arith.constant 0 : index
    %117 = vector.load %arg12[%c13, %c0_159] : memref<96x48xf32, #tpu.memory_space<vmem>>, vector<1x48xf32>
    %c0_160 = arith.constant 0 : index
    %c624 = arith.constant 624 : index
    %118 = vector.load %arg13[%c0_160, %c624] : memref<2x2304xf32, #tpu.memory_space<vmem>>, vector<1x48xf32>
    tpu.vector_store %arg13[%c0_160, %c624], %117 {strides = array<i32>} : memref<2x2304xf32, #tpu.memory_space<vmem>>, vector<1x48xf32>,
    %c14 = arith.constant 14 : index
    %c0_161 = arith.constant 0 : index
    %119 = vector.load %arg12[%c14, %c0_161] : memref<96x48xf32, #tpu.memory_space<vmem>>, vector<1x48xf32>
    %c0_162 = arith.constant 0 : index
    %c672 = arith.constant 672 : index
    %120 = vector.load %arg13[%c0_162, %c672] : memref<2x2304xf32, #tpu.memory_space<vmem>>, vector<1x48xf32>
    tpu.vector_store %arg13[%c0_162, %c672], %119 {strides = array<i32>} : memref<2x2304xf32, #tpu.memory_space<vmem>>, vector<1x48xf32>,
    %c15 = arith.constant 15 : index
    %c0_163 = arith.constant 0 : index
    %121 = vector.load %arg12[%c15, %c0_163] : memref<96x48xf32, #tpu.memory_space<vmem>>, vector<1x48xf32>
    %c0_164 = arith.constant 0 : index
    %c720 = arith.constant 720 : index
    %122 = vector.load %arg13[%c0_164, %c720] : memref<2x2304xf32, #tpu.memory_space<vmem>>, vector<1x48xf32>
    tpu.vector_store %arg13[%c0_164, %c720], %121 {strides = array<i32>} : memref<2x2304xf32, #tpu.memory_space<vmem>>, vector<1x48xf32>,
    %c16 = arith.constant 16 : index
    %c0_165 = arith.constant 0 : index
    %123 = vector.load %arg12[%c16, %c0_165] : memref<96x48xf32, #tpu.memory_space<vmem>>, vector<1x48xf32>
    %c0_166 = arith.constant 0 : index
    %c768 = arith.constant 768 : index
    %124 = vector.load %arg13[%c0_166, %c768] : memref<2x2304xf32, #tpu.memory_space<vmem>>, vector<1x48xf32>
    tpu.vector_store %arg13[%c0_166, %c768], %123 {strides = array<i32>} : memref<2x2304xf32, #tpu.memory_space<vmem>>, vector<1x48xf32>,
    %c17 = arith.constant 17 : index
    %c0_167 = arith.constant 0 : index
    %125 = vector.load %arg12[%c17, %c0_167] : memref<96x48xf32, #tpu.memory_space<vmem>>, vector<1x48xf32>
    %c0_168 = arith.constant 0 : index
    %c816 = arith.constant 816 : index
    %126 = vector.load %arg13[%c0_168, %c816] : memref<2x2304xf32, #tpu.memory_space<vmem>>, vector<1x48xf32>
    tpu.vector_store %arg13[%c0_168, %c816], %125 {strides = array<i32>} : memref<2x2304xf32, #tpu.memory_space<vmem>>, vector<1x48xf32>,
    %c18_169 = arith.constant 18 : index
    %c0_170 = arith.constant 0 : index
    %127 = vector.load %arg12[%c18_169, %c0_170] : memref<96x48xf32, #tpu.memory_space<vmem>>, vector<1x48xf32>
    %c0_171 = arith.constant 0 : index
    %c864 = arith.constant 864 : index
    %128 = vector.load %arg13[%c0_171, %c864] : memref<2x2304xf32, #tpu.memory_space<vmem>>, vector<1x48xf32>
    tpu.vector_store %arg13[%c0_171, %c864], %127 {strides = array<i32>} : memref<2x2304xf32, #tpu.memory_space<vmem>>, vector<1x48xf32>,
    %c19 = arith.constant 19 : index
    %c0_172 = arith.constant 0 : index
    %129 = vector.load %arg12[%c19, %c0_172] : memref<96x48xf32, #tpu.memory_space<vmem>>, vector<1x48xf32>
    %c0_173 = arith.constant 0 : index
    %c912 = arith.constant 912 : index
    %130 = vector.load %arg13[%c0_173, %c912] : memref<2x2304xf32, #tpu.memory_space<vmem>>, vector<1x48xf32>
    tpu.vector_store %arg13[%c0_173, %c912], %129 {strides = array<i32>} : memref<2x2304xf32, #tpu.memory_space<vmem>>, vector<1x48xf32>,
    %c20 = arith.constant 20 : index
    %c0_174 = arith.constant 0 : index
    %131 = vector.load %arg12[%c20, %c0_174] : memref<96x48xf32, #tpu.memory_space<vmem>>, vector<1x48xf32>
    %c0_175 = arith.constant 0 : index
    %c960 = arith.constant 960 : index
    %132 = vector.load %arg13[%c0_175, %c960] : memref<2x2304xf32, #tpu.memory_space<vmem>>, vector<1x48xf32>
    tpu.vector_store %arg13[%c0_175, %c960], %131 {strides = array<i32>} : memref<2x2304xf32, #tpu.memory_space<vmem>>, vector<1x48xf32>,
    %c21 = arith.constant 21 : index
    %c0_176 = arith.constant 0 : index
    %133 = vector.load %arg12[%c21, %c0_176] : memref<96x48xf32, #tpu.memory_space<vmem>>, vector<1x48xf32>
    %c0_177 = arith.constant 0 : index
    %c1008 = arith.constant 1008 : index
    %134 = vector.load %arg13[%c0_177, %c1008] : memref<2x2304xf32, #tpu.memory_space<vmem>>, vector<1x48xf32>
    tpu.vector_store %arg13[%c0_177, %c1008], %133 {strides = array<i32>} : memref<2x2304xf32, #tpu.memory_space<vmem>>, vector<1x48xf32>,
    %c22 = arith.constant 22 : index
    %c0_178 = arith.constant 0 : index
    %135 = vector.load %arg12[%c22, %c0_178] : memref<96x48xf32, #tpu.memory_space<vmem>>, vector<1x48xf32>
    %c0_179 = arith.constant 0 : index
    %c1056 = arith.constant 1056 : index
    %136 = vector.load %arg13[%c0_179, %c1056] : memref<2x2304xf32, #tpu.memory_space<vmem>>, vector<1x48xf32>
    tpu.vector_store %arg13[%c0_179, %c1056], %135 {strides = array<i32>} : memref<2x2304xf32, #tpu.memory_space<vmem>>, vector<1x48xf32>,
    %c23 = arith.constant 23 : index
    %c0_180 = arith.constant 0 : index
    %137 = vector.load %arg12[%c23, %c0_180] : memref<96x48xf32, #tpu.memory_space<vmem>>, vector<1x48xf32>
    %c0_181 = arith.constant 0 : index
    %c1104 = arith.constant 1104 : index
    %138 = vector.load %arg13[%c0_181, %c1104] : memref<2x2304xf32, #tpu.memory_space<vmem>>, vector<1x48xf32>
    tpu.vector_store %arg13[%c0_181, %c1104], %137 {strides = array<i32>} : memref<2x2304xf32, #tpu.memory_space<vmem>>, vector<1x48xf32>,
    %c24_182 = arith.constant 24 : index
    %c0_183 = arith.constant 0 : index
    %139 = vector.load %arg12[%c24_182, %c0_183] : memref<96x48xf32, #tpu.memory_space<vmem>>, vector<1x48xf32>
    %c0_184 = arith.constant 0 : index
    %c1152 = arith.constant 1152 : index
    %140 = vector.load %arg13[%c0_184, %c1152] : memref<2x2304xf32, #tpu.memory_space<vmem>>, vector<1x48xf32>
    tpu.vector_store %arg13[%c0_184, %c1152], %139 {strides = array<i32>} : memref<2x2304xf32, #tpu.memory_space<vmem>>, vector<1x48xf32>,
    %c25 = arith.constant 25 : index
    %c0_185 = arith.constant 0 : index
    %141 = vector.load %arg12[%c25, %c0_185] : memref<96x48xf32, #tpu.memory_space<vmem>>, vector<1x48xf32>
    %c0_186 = arith.constant 0 : index
    %c1200 = arith.constant 1200 : index
    %142 = vector.load %arg13[%c0_186, %c1200] : memref<2x2304xf32, #tpu.memory_space<vmem>>, vector<1x48xf32>
    tpu.vector_store %arg13[%c0_186, %c1200], %141 {strides = array<i32>} : memref<2x2304xf32, #tpu.memory_space<vmem>>, vector<1x48xf32>,
    %c26 = arith.constant 26 : index
    %c0_187 = arith.constant 0 : index
    %143 = vector.load %arg12[%c26, %c0_187] : memref<96x48xf32, #tpu.memory_space<vmem>>, vector<1x48xf32>
    %c0_188 = arith.constant 0 : index
    %c1248 = arith.constant 1248 : index
    %144 = vector.load %arg13[%c0_188, %c1248] : memref<2x2304xf32, #tpu.memory_space<vmem>>, vector<1x48xf32>
    tpu.vector_store %arg13[%c0_188, %c1248], %143 {strides = array<i32>} : memref<2x2304xf32, #tpu.memory_space<vmem>>, vector<1x48xf32>,
    %c27 = arith.constant 27 : index
    %c0_189 = arith.constant 0 : index
    %145 = vector.load %arg12[%c27, %c0_189] : memref<96x48xf32, #tpu.memory_space<vmem>>, vector<1x48xf32>
    %c0_190 = arith.constant 0 : index
    %c1296 = arith.constant 1296 : index
    %146 = vector.load %arg13[%c0_190, %c1296] : memref<2x2304xf32, #tpu.memory_space<vmem>>, vector<1x48xf32>
    tpu.vector_store %arg13[%c0_190, %c1296], %145 {strides = array<i32>} : memref<2x2304xf32, #tpu.memory_space<vmem>>, vector<1x48xf32>,
    %c28 = arith.constant 28 : index
    %c0_191 = arith.constant 0 : index
    %147 = vector.load %arg12[%c28, %c0_191] : memref<96x48xf32, #tpu.memory_space<vmem>>, vector<1x48xf32>
    %c0_192 = arith.constant 0 : index
    %c1344 = arith.constant 1344 : index
    %148 = vector.load %arg13[%c0_192, %c1344] : memref<2x2304xf32, #tpu.memory_space<vmem>>, vector<1x48xf32>
    tpu.vector_store %arg13[%c0_192, %c1344], %147 {strides = array<i32>} : memref<2x2304xf32, #tpu.memory_space<vmem>>, vector<1x48xf32>,
    %c29 = arith.constant 29 : index
    %c0_193 = arith.constant 0 : index
    %149 = vector.load %arg12[%c29, %c0_193] : memref<96x48xf32, #tpu.memory_space<vmem>>, vector<1x48xf32>
    %c0_194 = arith.constant 0 : index
    %c1392 = arith.constant 1392 : index
    %150 = vector.load %arg13[%c0_194, %c1392] : memref<2x2304xf32, #tpu.memory_space<vmem>>, vector<1x48xf32>
    tpu.vector_store %arg13[%c0_194, %c1392], %149 {strides = array<i32>} : memref<2x2304xf32, #tpu.memory_space<vmem>>, vector<1x48xf32>,
    %c30 = arith.constant 30 : index
    %c0_195 = arith.constant 0 : index
    %151 = vector.load %arg12[%c30, %c0_195] : memref<96x48xf32, #tpu.memory_space<vmem>>, vector<1x48xf32>
    %c0_196 = arith.constant 0 : index
    %c1440 = arith.constant 1440 : index
    %152 = vector.load %arg13[%c0_196, %c1440] : memref<2x2304xf32, #tpu.memory_space<vmem>>, vector<1x48xf32>
    tpu.vector_store %arg13[%c0_196, %c1440], %151 {strides = array<i32>} : memref<2x2304xf32, #tpu.memory_space<vmem>>, vector<1x48xf32>,
    %c31 = arith.constant 31 : index
    %c0_197 = arith.constant 0 : index
    %153 = vector.load %arg12[%c31, %c0_197] : memref<96x48xf32, #tpu.memory_space<vmem>>, vector<1x48xf32>
    %c0_198 = arith.constant 0 : index
    %c1488 = arith.constant 1488 : index
    %154 = vector.load %arg13[%c0_198, %c1488] : memref<2x2304xf32, #tpu.memory_space<vmem>>, vector<1x48xf32>
    tpu.vector_store %arg13[%c0_198, %c1488], %153 {strides = array<i32>} : memref<2x2304xf32, #tpu.memory_space<vmem>>, vector<1x48xf32>,
    %c32_199 = arith.constant 32 : index
    %c0_200 = arith.constant 0 : index
    %155 = vector.load %arg12[%c32_199, %c0_200] : memref<96x48xf32, #tpu.memory_space<vmem>>, vector<1x48xf32>
    %c0_201 = arith.constant 0 : index
    %c1536 = arith.constant 1536 : index
    %156 = vector.load %arg13[%c0_201, %c1536] : memref<2x2304xf32, #tpu.memory_space<vmem>>, vector<1x48xf32>
    tpu.vector_store %arg13[%c0_201, %c1536], %155 {strides = array<i32>} : memref<2x2304xf32, #tpu.memory_space<vmem>>, vector<1x48xf32>,
    %c33 = arith.constant 33 : index
    %c0_202 = arith.constant 0 : index
    %157 = vector.load %arg12[%c33, %c0_202] : memref<96x48xf32, #tpu.memory_space<vmem>>, vector<1x48xf32>
    %c0_203 = arith.constant 0 : index
    %c1584 = arith.constant 1584 : index
    %158 = vector.load %arg13[%c0_203, %c1584] : memref<2x2304xf32, #tpu.memory_space<vmem>>, vector<1x48xf32>
    tpu.vector_store %arg13[%c0_203, %c1584], %157 {strides = array<i32>} : memref<2x2304xf32, #tpu.memory_space<vmem>>, vector<1x48xf32>,
    %c34 = arith.constant 34 : index
    %c0_204 = arith.constant 0 : index
    %159 = vector.load %arg12[%c34, %c0_204] : memref<96x48xf32, #tpu.memory_space<vmem>>, vector<1x48xf32>
    %c0_205 = arith.constant 0 : index
    %c1632 = arith.constant 1632 : index
    %160 = vector.load %arg13[%c0_205, %c1632] : memref<2x2304xf32, #tpu.memory_space<vmem>>, vector<1x48xf32>
    tpu.vector_store %arg13[%c0_205, %c1632], %159 {strides = array<i32>} : memref<2x2304xf32, #tpu.memory_space<vmem>>, vector<1x48xf32>,
    %c35 = arith.constant 35 : index
    %c0_206 = arith.constant 0 : index
    %161 = vector.load %arg12[%c35, %c0_206] : memref<96x48xf32, #tpu.memory_space<vmem>>, vector<1x48xf32>
    %c0_207 = arith.constant 0 : index
    %c1680 = arith.constant 1680 : index
    %162 = vector.load %arg13[%c0_207, %c1680] : memref<2x2304xf32, #tpu.memory_space<vmem>>, vector<1x48xf32>
    tpu.vector_store %arg13[%c0_207, %c1680], %161 {strides = array<i32>} : memref<2x2304xf32, #tpu.memory_space<vmem>>, vector<1x48xf32>,
    %c36_208 = arith.constant 36 : index
    %c0_209 = arith.constant 0 : index
    %163 = vector.load %arg12[%c36_208, %c0_209] : memref<96x48xf32, #tpu.memory_space<vmem>>, vector<1x48xf32>
    %c0_210 = arith.constant 0 : index
    %c1728 = arith.constant 1728 : index
    %164 = vector.load %arg13[%c0_210, %c1728] : memref<2x2304xf32, #tpu.memory_space<vmem>>, vector<1x48xf32>
    tpu.vector_store %arg13[%c0_210, %c1728], %163 {strides = array<i32>} : memref<2x2304xf32, #tpu.memory_space<vmem>>, vector<1x48xf32>,
    %c37 = arith.constant 37 : index
    %c0_211 = arith.constant 0 : index
    %165 = vector.load %arg12[%c37, %c0_211] : memref<96x48xf32, #tpu.memory_space<vmem>>, vector<1x48xf32>
    %c0_212 = arith.constant 0 : index
    %c1776 = arith.constant 1776 : index
    %166 = vector.load %arg13[%c0_212, %c1776] : memref<2x2304xf32, #tpu.memory_space<vmem>>, vector<1x48xf32>
    tpu.vector_store %arg13[%c0_212, %c1776], %165 {strides = array<i32>} : memref<2x2304xf32, #tpu.memory_space<vmem>>, vector<1x48xf32>,
    %c38 = arith.constant 38 : index
    %c0_213 = arith.constant 0 : index
    %167 = vector.load %arg12[%c38, %c0_213] : memref<96x48xf32, #tpu.memory_space<vmem>>, vector<1x48xf32>
    %c0_214 = arith.constant 0 : index
    %c1824 = arith.constant 1824 : index
    %168 = vector.load %arg13[%c0_214, %c1824] : memref<2x2304xf32, #tpu.memory_space<vmem>>, vector<1x48xf32>
    tpu.vector_store %arg13[%c0_214, %c1824], %167 {strides = array<i32>} : memref<2x2304xf32, #tpu.memory_space<vmem>>, vector<1x48xf32>,
    %c39 = arith.constant 39 : index
    %c0_215 = arith.constant 0 : index
    %169 = vector.load %arg12[%c39, %c0_215] : memref<96x48xf32, #tpu.memory_space<vmem>>, vector<1x48xf32>
    %c0_216 = arith.constant 0 : index
    %c1872 = arith.constant 1872 : index
    %170 = vector.load %arg13[%c0_216, %c1872] : memref<2x2304xf32, #tpu.memory_space<vmem>>, vector<1x48xf32>
    tpu.vector_store %arg13[%c0_216, %c1872], %169 {strides = array<i32>} : memref<2x2304xf32, #tpu.memory_space<vmem>>, vector<1x48xf32>,
    %c40_217 = arith.constant 40 : index
    %c0_218 = arith.constant 0 : index
    %171 = vector.load %arg12[%c40_217, %c0_218] : memref<96x48xf32, #tpu.memory_space<vmem>>, vector<1x48xf32>
    %c0_219 = arith.constant 0 : index
    %c1920 = arith.constant 1920 : index
    %172 = vector.load %arg13[%c0_219, %c1920] : memref<2x2304xf32, #tpu.memory_space<vmem>>, vector<1x48xf32>
    tpu.vector_store %arg13[%c0_219, %c1920], %171 {strides = array<i32>} : memref<2x2304xf32, #tpu.memory_space<vmem>>, vector<1x48xf32>,
    %c41 = arith.constant 41 : index
    %c0_220 = arith.constant 0 : index
    %173 = vector.load %arg12[%c41, %c0_220] : memref<96x48xf32, #tpu.memory_space<vmem>>, vector<1x48xf32>
    %c0_221 = arith.constant 0 : index
    %c1968 = arith.constant 1968 : index
    %174 = vector.load %arg13[%c0_221, %c1968] : memref<2x2304xf32, #tpu.memory_space<vmem>>, vector<1x48xf32>
    tpu.vector_store %arg13[%c0_221, %c1968], %173 {strides = array<i32>} : memref<2x2304xf32, #tpu.memory_space<vmem>>, vector<1x48xf32>,
    %c42 = arith.constant 42 : index
    %c0_222 = arith.constant 0 : index
    %175 = vector.load %arg12[%c42, %c0_222] : memref<96x48xf32, #tpu.memory_space<vmem>>, vector<1x48xf32>
    %c0_223 = arith.constant 0 : index
    %c2016 = arith.constant 2016 : index
    %176 = vector.load %arg13[%c0_223, %c2016] : memref<2x2304xf32, #tpu.memory_space<vmem>>, vector<1x48xf32>
    tpu.vector_store %arg13[%c0_223, %c2016], %175 {strides = array<i32>} : memref<2x2304xf32, #tpu.memory_space<vmem>>, vector<1x48xf32>,
    %c43 = arith.constant 43 : index
    %c0_224 = arith.constant 0 : index
    %177 = vector.load %arg12[%c43, %c0_224] : memref<96x48xf32, #tpu.memory_space<vmem>>, vector<1x48xf32>
    %c0_225 = arith.constant 0 : index
    %c2064 = arith.constant 2064 : index
    %178 = vector.load %arg13[%c0_225, %c2064] : memref<2x2304xf32, #tpu.memory_space<vmem>>, vector<1x48xf32>
    tpu.vector_store %arg13[%c0_225, %c2064], %177 {strides = array<i32>} : memref<2x2304xf32, #tpu.memory_space<vmem>>, vector<1x48xf32>,
    %c44 = arith.constant 44 : index
    %c0_226 = arith.constant 0 : index
    %179 = vector.load %arg12[%c44, %c0_226] : memref<96x48xf32, #tpu.memory_space<vmem>>, vector<1x48xf32>
    %c0_227 = arith.constant 0 : index
    %c2112 = arith.constant 2112 : index
    %180 = vector.load %arg13[%c0_227, %c2112] : memref<2x2304xf32, #tpu.memory_space<vmem>>, vector<1x48xf32>
    tpu.vector_store %arg13[%c0_227, %c2112], %179 {strides = array<i32>} : memref<2x2304xf32, #tpu.memory_space<vmem>>, vector<1x48xf32>,
    %c45 = arith.constant 45 : index
    %c0_228 = arith.constant 0 : index
    %181 = vector.load %arg12[%c45, %c0_228] : memref<96x48xf32, #tpu.memory_space<vmem>>, vector<1x48xf32>
    %c0_229 = arith.constant 0 : index
    %c2160 = arith.constant 2160 : index
    %182 = vector.load %arg13[%c0_229, %c2160] : memref<2x2304xf32, #tpu.memory_space<vmem>>, vector<1x48xf32>
    tpu.vector_store %arg13[%c0_229, %c2160], %181 {strides = array<i32>} : memref<2x2304xf32, #tpu.memory_space<vmem>>, vector<1x48xf32>,
    %c46 = arith.constant 46 : index
    %c0_230 = arith.constant 0 : index
    %183 = vector.load %arg12[%c46, %c0_230] : memref<96x48xf32, #tpu.memory_space<vmem>>, vector<1x48xf32>
    %c0_231 = arith.constant 0 : index
    %c2208 = arith.constant 2208 : index
    %184 = vector.load %arg13[%c0_231, %c2208] : memref<2x2304xf32, #tpu.memory_space<vmem>>, vector<1x48xf32>
    tpu.vector_store %arg13[%c0_231, %c2208], %183 {strides = array<i32>} : memref<2x2304xf32, #tpu.memory_space<vmem>>, vector<1x48xf32>,
    %c47 = arith.constant 47 : index
    %c0_232 = arith.constant 0 : index
    %185 = vector.load %arg12[%c47, %c0_232] : memref<96x48xf32, #tpu.memory_space<vmem>>, vector<1x48xf32>
    %c0_233 = arith.constant 0 : index
    %c2256 = arith.constant 2256 : index
    %186 = vector.load %arg13[%c0_233, %c2256] : memref<2x2304xf32, #tpu.memory_space<vmem>>, vector<1x48xf32>
    tpu.vector_store %arg13[%c0_233, %c2256], %185 {strides = array<i32>} : memref<2x2304xf32, #tpu.memory_space<vmem>>, vector<1x48xf32>,
    %c48_234 = arith.constant 48 : index
    %c0_235 = arith.constant 0 : index
    %187 = vector.load %arg12[%c48_234, %c0_235] : memref<96x48xf32, #tpu.memory_space<vmem>>, vector<1x48xf32>
    %c1_236 = arith.constant 1 : index
    %c0_237 = arith.constant 0 : index
    %188 = vector.load %arg13[%c1_236, %c0_237] : memref<2x2304xf32, #tpu.memory_space<vmem>>, vector<1x48xf32>
    tpu.vector_store %arg13[%c1_236, %c0_237], %187 {strides = array<i32>} : memref<2x2304xf32, #tpu.memory_space<vmem>>, vector<1x48xf32>,
    %c49 = arith.constant 49 : index
    %c0_238 = arith.constant 0 : index
    %189 = vector.load %arg12[%c49, %c0_238] : memref<96x48xf32, #tpu.memory_space<vmem>>, vector<1x48xf32>
    %c1_239 = arith.constant 1 : index
    %c48_240 = arith.constant 48 : index
    %190 = vector.load %arg13[%c1_239, %c48_240] : memref<2x2304xf32, #tpu.memory_space<vmem>>, vector<1x48xf32>
    tpu.vector_store %arg13[%c1_239, %c48_240], %189 {strides = array<i32>} : memref<2x2304xf32, #tpu.memory_space<vmem>>, vector<1x48xf32>,
    %c50 = arith.constant 50 : index
    %c0_241 = arith.constant 0 : index
    %191 = vector.load %arg12[%c50, %c0_241] : memref<96x48xf32, #tpu.memory_space<vmem>>, vector<1x48xf32>
    %c1_242 = arith.constant 1 : index
    %c96_243 = arith.constant 96 : index
    %192 = vector.load %arg13[%c1_242, %c96_243] : memref<2x2304xf32, #tpu.memory_space<vmem>>, vector<1x48xf32>
    tpu.vector_store %arg13[%c1_242, %c96_243], %191 {strides = array<i32>} : memref<2x2304xf32, #tpu.memory_space<vmem>>, vector<1x48xf32>,
    %c51 = arith.constant 51 : index
    %c0_244 = arith.constant 0 : index
    %193 = vector.load %arg12[%c51, %c0_244] : memref<96x48xf32, #tpu.memory_space<vmem>>, vector<1x48xf32>
    %c1_245 = arith.constant 1 : index
    %c144_246 = arith.constant 144 : index
    %194 = vector.load %arg13[%c1_245, %c144_246] : memref<2x2304xf32, #tpu.memory_space<vmem>>, vector<1x48xf32>
    tpu.vector_store %arg13[%c1_245, %c144_246], %193 {strides = array<i32>} : memref<2x2304xf32, #tpu.memory_space<vmem>>, vector<1x48xf32>,
    %c52_247 = arith.constant 52 : index
    %c0_248 = arith.constant 0 : index
    %195 = vector.load %arg12[%c52_247, %c0_248] : memref<96x48xf32, #tpu.memory_space<vmem>>, vector<1x48xf32>
    %c1_249 = arith.constant 1 : index
    %c192_250 = arith.constant 192 : index
    %196 = vector.load %arg13[%c1_249, %c192_250] : memref<2x2304xf32, #tpu.memory_space<vmem>>, vector<1x48xf32>
    tpu.vector_store %arg13[%c1_249, %c192_250], %195 {strides = array<i32>} : memref<2x2304xf32, #tpu.memory_space<vmem>>, vector<1x48xf32>,
    %c53_251 = arith.constant 53 : index
    %c0_252 = arith.constant 0 : index
    %197 = vector.load %arg12[%c53_251, %c0_252] : memref<96x48xf32, #tpu.memory_space<vmem>>, vector<1x48xf32>
    %c1_253 = arith.constant 1 : index
    %c240_254 = arith.constant 240 : index
    %198 = vector.load %arg13[%c1_253, %c240_254] : memref<2x2304xf32, #tpu.memory_space<vmem>>, vector<1x48xf32>
    tpu.vector_store %arg13[%c1_253, %c240_254], %197 {strides = array<i32>} : memref<2x2304xf32, #tpu.memory_space<vmem>>, vector<1x48xf32>,
    %c54_255 = arith.constant 54 : index
    %c0_256 = arith.constant 0 : index
    %199 = vector.load %arg12[%c54_255, %c0_256] : memref<96x48xf32, #tpu.memory_space<vmem>>, vector<1x48xf32>
    %c1_257 = arith.constant 1 : index
    %c288_258 = arith.constant 288 : index
    %200 = vector.load %arg13[%c1_257, %c288_258] : memref<2x2304xf32, #tpu.memory_space<vmem>>, vector<1x48xf32>
    tpu.vector_store %arg13[%c1_257, %c288_258], %199 {strides = array<i32>} : memref<2x2304xf32, #tpu.memory_space<vmem>>, vector<1x48xf32>,
    %c55_259 = arith.constant 55 : index
    %c0_260 = arith.constant 0 : index
    %201 = vector.load %arg12[%c55_259, %c0_260] : memref<96x48xf32, #tpu.memory_space<vmem>>, vector<1x48xf32>
    %c1_261 = arith.constant 1 : index
    %c336_262 = arith.constant 336 : index
    %202 = vector.load %arg13[%c1_261, %c336_262] : memref<2x2304xf32, #tpu.memory_space<vmem>>, vector<1x48xf32>
    tpu.vector_store %arg13[%c1_261, %c336_262], %201 {strides = array<i32>} : memref<2x2304xf32, #tpu.memory_space<vmem>>, vector<1x48xf32>,
    %c56_263 = arith.constant 56 : index
    %c0_264 = arith.constant 0 : index
    %203 = vector.load %arg12[%c56_263, %c0_264] : memref<96x48xf32, #tpu.memory_space<vmem>>, vector<1x48xf32>
    %c1_265 = arith.constant 1 : index
    %c384_266 = arith.constant 384 : index
    %204 = vector.load %arg13[%c1_265, %c384_266] : memref<2x2304xf32, #tpu.memory_space<vmem>>, vector<1x48xf32>
    tpu.vector_store %arg13[%c1_265, %c384_266], %203 {strides = array<i32>} : memref<2x2304xf32, #tpu.memory_space<vmem>>, vector<1x48xf32>,
    %c57_267 = arith.constant 57 : index
    %c0_268 = arith.constant 0 : index
    %205 = vector.load %arg12[%c57_267, %c0_268] : memref<96x48xf32, #tpu.memory_space<vmem>>, vector<1x48xf32>
    %c1_269 = arith.constant 1 : index
    %c432_270 = arith.constant 432 : index
    %206 = vector.load %arg13[%c1_269, %c432_270] : memref<2x2304xf32, #tpu.memory_space<vmem>>, vector<1x48xf32>
    tpu.vector_store %arg13[%c1_269, %c432_270], %205 {strides = array<i32>} : memref<2x2304xf32, #tpu.memory_space<vmem>>, vector<1x48xf32>,
    %c58_271 = arith.constant 58 : index
    %c0_272 = arith.constant 0 : index
    %207 = vector.load %arg12[%c58_271, %c0_272] : memref<96x48xf32, #tpu.memory_space<vmem>>, vector<1x48xf32>
    %c1_273 = arith.constant 1 : index
    %c480_274 = arith.constant 480 : index
    %208 = vector.load %arg13[%c1_273, %c480_274] : memref<2x2304xf32, #tpu.memory_space<vmem>>, vector<1x48xf32>
    tpu.vector_store %arg13[%c1_273, %c480_274], %207 {strides = array<i32>} : memref<2x2304xf32, #tpu.memory_space<vmem>>, vector<1x48xf32>,
    %c59_275 = arith.constant 59 : index
    %c0_276 = arith.constant 0 : index
    %209 = vector.load %arg12[%c59_275, %c0_276] : memref<96x48xf32, #tpu.memory_space<vmem>>, vector<1x48xf32>
    %c1_277 = arith.constant 1 : index
    %c528_278 = arith.constant 528 : index
    %210 = vector.load %arg13[%c1_277, %c528_278] : memref<2x2304xf32, #tpu.memory_space<vmem>>, vector<1x48xf32>
    tpu.vector_store %arg13[%c1_277, %c528_278], %209 {strides = array<i32>} : memref<2x2304xf32, #tpu.memory_space<vmem>>, vector<1x48xf32>,
    %c60_279 = arith.constant 60 : index
    %c0_280 = arith.constant 0 : index
    %211 = vector.load %arg12[%c60_279, %c0_280] : memref<96x48xf32, #tpu.memory_space<vmem>>, vector<1x48xf32>
    %c1_281 = arith.constant 1 : index
    %c576_282 = arith.constant 576 : index
    %212 = vector.load %arg13[%c1_281, %c576_282] : memref<2x2304xf32, #tpu.memory_space<vmem>>, vector<1x48xf32>
    tpu.vector_store %arg13[%c1_281, %c576_282], %211 {strides = array<i32>} : memref<2x2304xf32, #tpu.memory_space<vmem>>, vector<1x48xf32>,
    %c61_283 = arith.constant 61 : index
    %c0_284 = arith.constant 0 : index
    %213 = vector.load %arg12[%c61_283, %c0_284] : memref<96x48xf32, #tpu.memory_space<vmem>>, vector<1x48xf32>
    %c1_285 = arith.constant 1 : index
    %c624_286 = arith.constant 624 : index
    %214 = vector.load %arg13[%c1_285, %c624_286] : memref<2x2304xf32, #tpu.memory_space<vmem>>, vector<1x48xf32>
    tpu.vector_store %arg13[%c1_285, %c624_286], %213 {strides = array<i32>} : memref<2x2304xf32, #tpu.memory_space<vmem>>, vector<1x48xf32>,
    %c62_287 = arith.constant 62 : index
    %c0_288 = arith.constant 0 : index
    %215 = vector.load %arg12[%c62_287, %c0_288] : memref<96x48xf32, #tpu.memory_space<vmem>>, vector<1x48xf32>
    %c1_289 = arith.constant 1 : index
    %c672_290 = arith.constant 672 : index
    %216 = vector.load %arg13[%c1_289, %c672_290] : memref<2x2304xf32, #tpu.memory_space<vmem>>, vector<1x48xf32>
    tpu.vector_store %arg13[%c1_289, %c672_290], %215 {strides = array<i32>} : memref<2x2304xf32, #tpu.memory_space<vmem>>, vector<1x48xf32>,
    %c63_291 = arith.constant 63 : index
    %c0_292 = arith.constant 0 : index
    %217 = vector.load %arg12[%c63_291, %c0_292] : memref<96x48xf32, #tpu.memory_space<vmem>>, vector<1x48xf32>
    %c1_293 = arith.constant 1 : index
    %c720_294 = arith.constant 720 : index
    %218 = vector.load %arg13[%c1_293, %c720_294] : memref<2x2304xf32, #tpu.memory_space<vmem>>, vector<1x48xf32>
    tpu.vector_store %arg13[%c1_293, %c720_294], %217 {strides = array<i32>} : memref<2x2304xf32, #tpu.memory_space<vmem>>, vector<1x48xf32>,
    %c64_295 = arith.constant 64 : index
    %c0_296 = arith.constant 0 : index
    %219 = vector.load %arg12[%c64_295, %c0_296] : memref<96x48xf32, #tpu.memory_space<vmem>>, vector<1x48xf32>
    %c1_297 = arith.constant 1 : index
    %c768_298 = arith.constant 768 : index
    %220 = vector.load %arg13[%c1_297, %c768_298] : memref<2x2304xf32, #tpu.memory_space<vmem>>, vector<1x48xf32>
    tpu.vector_store %arg13[%c1_297, %c768_298], %219 {strides = array<i32>} : memref<2x2304xf32, #tpu.memory_space<vmem>>, vector<1x48xf32>,
    %c65 = arith.constant 65 : index
    %c0_299 = arith.constant 0 : index
    %221 = vector.load %arg12[%c65, %c0_299] : memref<96x48xf32, #tpu.memory_space<vmem>>, vector<1x48xf32>
    %c1_300 = arith.constant 1 : index
    %c816_301 = arith.constant 816 : index
    %222 = vector.load %arg13[%c1_300, %c816_301] : memref<2x2304xf32, #tpu.memory_space<vmem>>, vector<1x48xf32>
    tpu.vector_store %arg13[%c1_300, %c816_301], %221 {strides = array<i32>} : memref<2x2304xf32, #tpu.memory_space<vmem>>, vector<1x48xf32>,
    %c66 = arith.constant 66 : index
    %c0_302 = arith.constant 0 : index
    %223 = vector.load %arg12[%c66, %c0_302] : memref<96x48xf32, #tpu.memory_space<vmem>>, vector<1x48xf32>
    %c1_303 = arith.constant 1 : index
    %c864_304 = arith.constant 864 : index
    %224 = vector.load %arg13[%c1_303, %c864_304] : memref<2x2304xf32, #tpu.memory_space<vmem>>, vector<1x48xf32>
    tpu.vector_store %arg13[%c1_303, %c864_304], %223 {strides = array<i32>} : memref<2x2304xf32, #tpu.memory_space<vmem>>, vector<1x48xf32>,
    %c67 = arith.constant 67 : index
    %c0_305 = arith.constant 0 : index
    %225 = vector.load %arg12[%c67, %c0_305] : memref<96x48xf32, #tpu.memory_space<vmem>>, vector<1x48xf32>
    %c1_306 = arith.constant 1 : index
    %c912_307 = arith.constant 912 : index
    %226 = vector.load %arg13[%c1_306, %c912_307] : memref<2x2304xf32, #tpu.memory_space<vmem>>, vector<1x48xf32>
    tpu.vector_store %arg13[%c1_306, %c912_307], %225 {strides = array<i32>} : memref<2x2304xf32, #tpu.memory_space<vmem>>, vector<1x48xf32>,
    %c68 = arith.constant 68 : index
    %c0_308 = arith.constant 0 : index
    %227 = vector.load %arg12[%c68, %c0_308] : memref<96x48xf32, #tpu.memory_space<vmem>>, vector<1x48xf32>
    %c1_309 = arith.constant 1 : index
    %c960_310 = arith.constant 960 : index
    %228 = vector.load %arg13[%c1_309, %c960_310] : memref<2x2304xf32, #tpu.memory_space<vmem>>, vector<1x48xf32>
    tpu.vector_store %arg13[%c1_309, %c960_310], %227 {strides = array<i32>} : memref<2x2304xf32, #tpu.memory_space<vmem>>, vector<1x48xf32>,
    %c69 = arith.constant 69 : index
    %c0_311 = arith.constant 0 : index
    %229 = vector.load %arg12[%c69, %c0_311] : memref<96x48xf32, #tpu.memory_space<vmem>>, vector<1x48xf32>
    %c1_312 = arith.constant 1 : index
    %c1008_313 = arith.constant 1008 : index
    %230 = vector.load %arg13[%c1_312, %c1008_313] : memref<2x2304xf32, #tpu.memory_space<vmem>>, vector<1x48xf32>
    tpu.vector_store %arg13[%c1_312, %c1008_313], %229 {strides = array<i32>} : memref<2x2304xf32, #tpu.memory_space<vmem>>, vector<1x48xf32>,
    %c70 = arith.constant 70 : index
    %c0_314 = arith.constant 0 : index
    %231 = vector.load %arg12[%c70, %c0_314] : memref<96x48xf32, #tpu.memory_space<vmem>>, vector<1x48xf32>
    %c1_315 = arith.constant 1 : index
    %c1056_316 = arith.constant 1056 : index
    %232 = vector.load %arg13[%c1_315, %c1056_316] : memref<2x2304xf32, #tpu.memory_space<vmem>>, vector<1x48xf32>
    tpu.vector_store %arg13[%c1_315, %c1056_316], %231 {strides = array<i32>} : memref<2x2304xf32, #tpu.memory_space<vmem>>, vector<1x48xf32>,
    %c71 = arith.constant 71 : index
    %c0_317 = arith.constant 0 : index
    %233 = vector.load %arg12[%c71, %c0_317] : memref<96x48xf32, #tpu.memory_space<vmem>>, vector<1x48xf32>
    %c1_318 = arith.constant 1 : index
    %c1104_319 = arith.constant 1104 : index
    %234 = vector.load %arg13[%c1_318, %c1104_319] : memref<2x2304xf32, #tpu.memory_space<vmem>>, vector<1x48xf32>
    tpu.vector_store %arg13[%c1_318, %c1104_319], %233 {strides = array<i32>} : memref<2x2304xf32, #tpu.memory_space<vmem>>, vector<1x48xf32>,
    %c72_320 = arith.constant 72 : index
    %c0_321 = arith.constant 0 : index
    %235 = vector.load %arg12[%c72_320, %c0_321] : memref<96x48xf32, #tpu.memory_space<vmem>>, vector<1x48xf32>
    %c1_322 = arith.constant 1 : index
    %c1152_323 = arith.constant 1152 : index
    %236 = vector.load %arg13[%c1_322, %c1152_323] : memref<2x2304xf32, #tpu.memory_space<vmem>>, vector<1x48xf32>
    tpu.vector_store %arg13[%c1_322, %c1152_323], %235 {strides = array<i32>} : memref<2x2304xf32, #tpu.memory_space<vmem>>, vector<1x48xf32>,
    %c73 = arith.constant 73 : index
    %c0_324 = arith.constant 0 : index
    %237 = vector.load %arg12[%c73, %c0_324] : memref<96x48xf32, #tpu.memory_space<vmem>>, vector<1x48xf32>
    %c1_325 = arith.constant 1 : index
    %c1200_326 = arith.constant 1200 : index
    %238 = vector.load %arg13[%c1_325, %c1200_326] : memref<2x2304xf32, #tpu.memory_space<vmem>>, vector<1x48xf32>
    tpu.vector_store %arg13[%c1_325, %c1200_326], %237 {strides = array<i32>} : memref<2x2304xf32, #tpu.memory_space<vmem>>, vector<1x48xf32>,
    %c74 = arith.constant 74 : index
    %c0_327 = arith.constant 0 : index
    %239 = vector.load %arg12[%c74, %c0_327] : memref<96x48xf32, #tpu.memory_space<vmem>>, vector<1x48xf32>
    %c1_328 = arith.constant 1 : index
    %c1248_329 = arith.constant 1248 : index
    %240 = vector.load %arg13[%c1_328, %c1248_329] : memref<2x2304xf32, #tpu.memory_space<vmem>>, vector<1x48xf32>
    tpu.vector_store %arg13[%c1_328, %c1248_329], %239 {strides = array<i32>} : memref<2x2304xf32, #tpu.memory_space<vmem>>, vector<1x48xf32>,
    %c75 = arith.constant 75 : index
    %c0_330 = arith.constant 0 : index
    %241 = vector.load %arg12[%c75, %c0_330] : memref<96x48xf32, #tpu.memory_space<vmem>>, vector<1x48xf32>
    %c1_331 = arith.constant 1 : index
    %c1296_332 = arith.constant 1296 : index
    %242 = vector.load %arg13[%c1_331, %c1296_332] : memref<2x2304xf32, #tpu.memory_space<vmem>>, vector<1x48xf32>
    tpu.vector_store %arg13[%c1_331, %c1296_332], %241 {strides = array<i32>} : memref<2x2304xf32, #tpu.memory_space<vmem>>, vector<1x48xf32>,
    %c76 = arith.constant 76 : index
    %c0_333 = arith.constant 0 : index
    %243 = vector.load %arg12[%c76, %c0_333] : memref<96x48xf32, #tpu.memory_space<vmem>>, vector<1x48xf32>
    %c1_334 = arith.constant 1 : index
    %c1344_335 = arith.constant 1344 : index
    %244 = vector.load %arg13[%c1_334, %c1344_335] : memref<2x2304xf32, #tpu.memory_space<vmem>>, vector<1x48xf32>
    tpu.vector_store %arg13[%c1_334, %c1344_335], %243 {strides = array<i32>} : memref<2x2304xf32, #tpu.memory_space<vmem>>, vector<1x48xf32>,
    %c77 = arith.constant 77 : index
    %c0_336 = arith.constant 0 : index
    %245 = vector.load %arg12[%c77, %c0_336] : memref<96x48xf32, #tpu.memory_space<vmem>>, vector<1x48xf32>
    %c1_337 = arith.constant 1 : index
    %c1392_338 = arith.constant 1392 : index
    %246 = vector.load %arg13[%c1_337, %c1392_338] : memref<2x2304xf32, #tpu.memory_space<vmem>>, vector<1x48xf32>
    tpu.vector_store %arg13[%c1_337, %c1392_338], %245 {strides = array<i32>} : memref<2x2304xf32, #tpu.memory_space<vmem>>, vector<1x48xf32>,
    %c78 = arith.constant 78 : index
    %c0_339 = arith.constant 0 : index
    %247 = vector.load %arg12[%c78, %c0_339] : memref<96x48xf32, #tpu.memory_space<vmem>>, vector<1x48xf32>
    %c1_340 = arith.constant 1 : index
    %c1440_341 = arith.constant 1440 : index
    %248 = vector.load %arg13[%c1_340, %c1440_341] : memref<2x2304xf32, #tpu.memory_space<vmem>>, vector<1x48xf32>
    tpu.vector_store %arg13[%c1_340, %c1440_341], %247 {strides = array<i32>} : memref<2x2304xf32, #tpu.memory_space<vmem>>, vector<1x48xf32>,
    %c79 = arith.constant 79 : index
    %c0_342 = arith.constant 0 : index
    %249 = vector.load %arg12[%c79, %c0_342] : memref<96x48xf32, #tpu.memory_space<vmem>>, vector<1x48xf32>
    %c1_343 = arith.constant 1 : index
    %c1488_344 = arith.constant 1488 : index
    %250 = vector.load %arg13[%c1_343, %c1488_344] : memref<2x2304xf32, #tpu.memory_space<vmem>>, vector<1x48xf32>
    tpu.vector_store %arg13[%c1_343, %c1488_344], %249 {strides = array<i32>} : memref<2x2304xf32, #tpu.memory_space<vmem>>, vector<1x48xf32>,
    %c80 = arith.constant 80 : index
    %c0_345 = arith.constant 0 : index
    %251 = vector.load %arg12[%c80, %c0_345] : memref<96x48xf32, #tpu.memory_space<vmem>>, vector<1x48xf32>
    %c1_346 = arith.constant 1 : index
    %c1536_347 = arith.constant 1536 : index
    %252 = vector.load %arg13[%c1_346, %c1536_347] : memref<2x2304xf32, #tpu.memory_space<vmem>>, vector<1x48xf32>
    tpu.vector_store %arg13[%c1_346, %c1536_347], %251 {strides = array<i32>} : memref<2x2304xf32, #tpu.memory_space<vmem>>, vector<1x48xf32>,
    %c81 = arith.constant 81 : index
    %c0_348 = arith.constant 0 : index
    %253 = vector.load %arg12[%c81, %c0_348] : memref<96x48xf32, #tpu.memory_space<vmem>>, vector<1x48xf32>
    %c1_349 = arith.constant 1 : index
    %c1584_350 = arith.constant 1584 : index
    %254 = vector.load %arg13[%c1_349, %c1584_350] : memref<2x2304xf32, #tpu.memory_space<vmem>>, vector<1x48xf32>
    tpu.vector_store %arg13[%c1_349, %c1584_350], %253 {strides = array<i32>} : memref<2x2304xf32, #tpu.memory_space<vmem>>, vector<1x48xf32>,
    %c82 = arith.constant 82 : index
    %c0_351 = arith.constant 0 : index
    %255 = vector.load %arg12[%c82, %c0_351] : memref<96x48xf32, #tpu.memory_space<vmem>>, vector<1x48xf32>
    %c1_352 = arith.constant 1 : index
    %c1632_353 = arith.constant 1632 : index
    %256 = vector.load %arg13[%c1_352, %c1632_353] : memref<2x2304xf32, #tpu.memory_space<vmem>>, vector<1x48xf32>
    tpu.vector_store %arg13[%c1_352, %c1632_353], %255 {strides = array<i32>} : memref<2x2304xf32, #tpu.memory_space<vmem>>, vector<1x48xf32>,
    %c83 = arith.constant 83 : index
    %c0_354 = arith.constant 0 : index
    %257 = vector.load %arg12[%c83, %c0_354] : memref<96x48xf32, #tpu.memory_space<vmem>>, vector<1x48xf32>
    %c1_355 = arith.constant 1 : index
    %c1680_356 = arith.constant 1680 : index
    %258 = vector.load %arg13[%c1_355, %c1680_356] : memref<2x2304xf32, #tpu.memory_space<vmem>>, vector<1x48xf32>
    tpu.vector_store %arg13[%c1_355, %c1680_356], %257 {strides = array<i32>} : memref<2x2304xf32, #tpu.memory_space<vmem>>, vector<1x48xf32>,
    %c84 = arith.constant 84 : index
    %c0_357 = arith.constant 0 : index
    %259 = vector.load %arg12[%c84, %c0_357] : memref<96x48xf32, #tpu.memory_space<vmem>>, vector<1x48xf32>
    %c1_358 = arith.constant 1 : index
    %c1728_359 = arith.constant 1728 : index
    %260 = vector.load %arg13[%c1_358, %c1728_359] : memref<2x2304xf32, #tpu.memory_space<vmem>>, vector<1x48xf32>
    tpu.vector_store %arg13[%c1_358, %c1728_359], %259 {strides = array<i32>} : memref<2x2304xf32, #tpu.memory_space<vmem>>, vector<1x48xf32>,
    %c85 = arith.constant 85 : index
    %c0_360 = arith.constant 0 : index
    %261 = vector.load %arg12[%c85, %c0_360] : memref<96x48xf32, #tpu.memory_space<vmem>>, vector<1x48xf32>
    %c1_361 = arith.constant 1 : index
    %c1776_362 = arith.constant 1776 : index
    %262 = vector.load %arg13[%c1_361, %c1776_362] : memref<2x2304xf32, #tpu.memory_space<vmem>>, vector<1x48xf32>
    tpu.vector_store %arg13[%c1_361, %c1776_362], %261 {strides = array<i32>} : memref<2x2304xf32, #tpu.memory_space<vmem>>, vector<1x48xf32>,
    %c86 = arith.constant 86 : index
    %c0_363 = arith.constant 0 : index
    %263 = vector.load %arg12[%c86, %c0_363] : memref<96x48xf32, #tpu.memory_space<vmem>>, vector<1x48xf32>
    %c1_364 = arith.constant 1 : index
    %c1824_365 = arith.constant 1824 : index
    %264 = vector.load %arg13[%c1_364, %c1824_365] : memref<2x2304xf32, #tpu.memory_space<vmem>>, vector<1x48xf32>
    tpu.vector_store %arg13[%c1_364, %c1824_365], %263 {strides = array<i32>} : memref<2x2304xf32, #tpu.memory_space<vmem>>, vector<1x48xf32>,
    %c87 = arith.constant 87 : index
    %c0_366 = arith.constant 0 : index
    %265 = vector.load %arg12[%c87, %c0_366] : memref<96x48xf32, #tpu.memory_space<vmem>>, vector<1x48xf32>
    %c1_367 = arith.constant 1 : index
    %c1872_368 = arith.constant 1872 : index
    %266 = vector.load %arg13[%c1_367, %c1872_368] : memref<2x2304xf32, #tpu.memory_space<vmem>>, vector<1x48xf32>
    tpu.vector_store %arg13[%c1_367, %c1872_368], %265 {strides = array<i32>} : memref<2x2304xf32, #tpu.memory_space<vmem>>, vector<1x48xf32>,
    %c88 = arith.constant 88 : index
    %c0_369 = arith.constant 0 : index
    %267 = vector.load %arg12[%c88, %c0_369] : memref<96x48xf32, #tpu.memory_space<vmem>>, vector<1x48xf32>
    %c1_370 = arith.constant 1 : index
    %c1920_371 = arith.constant 1920 : index
    %268 = vector.load %arg13[%c1_370, %c1920_371] : memref<2x2304xf32, #tpu.memory_space<vmem>>, vector<1x48xf32>
    tpu.vector_store %arg13[%c1_370, %c1920_371], %267 {strides = array<i32>} : memref<2x2304xf32, #tpu.memory_space<vmem>>, vector<1x48xf32>,
    %c89 = arith.constant 89 : index
    %c0_372 = arith.constant 0 : index
    %269 = vector.load %arg12[%c89, %c0_372] : memref<96x48xf32, #tpu.memory_space<vmem>>, vector<1x48xf32>
    %c1_373 = arith.constant 1 : index
    %c1968_374 = arith.constant 1968 : index
    %270 = vector.load %arg13[%c1_373, %c1968_374] : memref<2x2304xf32, #tpu.memory_space<vmem>>, vector<1x48xf32>
    tpu.vector_store %arg13[%c1_373, %c1968_374], %269 {strides = array<i32>} : memref<2x2304xf32, #tpu.memory_space<vmem>>, vector<1x48xf32>,
    %c90 = arith.constant 90 : index
    %c0_375 = arith.constant 0 : index
    %271 = vector.load %arg12[%c90, %c0_375] : memref<96x48xf32, #tpu.memory_space<vmem>>, vector<1x48xf32>
    %c1_376 = arith.constant 1 : index
    %c2016_377 = arith.constant 2016 : index
    %272 = vector.load %arg13[%c1_376, %c2016_377] : memref<2x2304xf32, #tpu.memory_space<vmem>>, vector<1x48xf32>
    tpu.vector_store %arg13[%c1_376, %c2016_377], %271 {strides = array<i32>} : memref<2x2304xf32, #tpu.memory_space<vmem>>, vector<1x48xf32>,
    %c91 = arith.constant 91 : index
    %c0_378 = arith.constant 0 : index
    %273 = vector.load %arg12[%c91, %c0_378] : memref<96x48xf32, #tpu.memory_space<vmem>>, vector<1x48xf32>
    %c1_379 = arith.constant 1 : index
    %c2064_380 = arith.constant 2064 : index
    %274 = vector.load %arg13[%c1_379, %c2064_380] : memref<2x2304xf32, #tpu.memory_space<vmem>>, vector<1x48xf32>
    tpu.vector_store %arg13[%c1_379, %c2064_380], %273 {strides = array<i32>} : memref<2x2304xf32, #tpu.memory_space<vmem>>, vector<1x48xf32>,
    %c92 = arith.constant 92 : index
    %c0_381 = arith.constant 0 : index
    %275 = vector.load %arg12[%c92, %c0_381] : memref<96x48xf32, #tpu.memory_space<vmem>>, vector<1x48xf32>
    %c1_382 = arith.constant 1 : index
    %c2112_383 = arith.constant 2112 : index
    %276 = vector.load %arg13[%c1_382, %c2112_383] : memref<2x2304xf32, #tpu.memory_space<vmem>>, vector<1x48xf32>
    tpu.vector_store %arg13[%c1_382, %c2112_383], %275 {strides = array<i32>} : memref<2x2304xf32, #tpu.memory_space<vmem>>, vector<1x48xf32>,
    %c93 = arith.constant 93 : index
    %c0_384 = arith.constant 0 : index
    %277 = vector.load %arg12[%c93, %c0_384] : memref<96x48xf32, #tpu.memory_space<vmem>>, vector<1x48xf32>
    %c1_385 = arith.constant 1 : index
    %c2160_386 = arith.constant 2160 : index
    %278 = vector.load %arg13[%c1_385, %c2160_386] : memref<2x2304xf32, #tpu.memory_space<vmem>>, vector<1x48xf32>
    tpu.vector_store %arg13[%c1_385, %c2160_386], %277 {strides = array<i32>} : memref<2x2304xf32, #tpu.memory_space<vmem>>, vector<1x48xf32>,
    %c94 = arith.constant 94 : index
    %c0_387 = arith.constant 0 : index
    %279 = vector.load %arg12[%c94, %c0_387] : memref<96x48xf32, #tpu.memory_space<vmem>>, vector<1x48xf32>
    %c1_388 = arith.constant 1 : index
    %c2208_389 = arith.constant 2208 : index
    %280 = vector.load %arg13[%c1_388, %c2208_389] : memref<2x2304xf32, #tpu.memory_space<vmem>>, vector<1x48xf32>
    tpu.vector_store %arg13[%c1_388, %c2208_389], %279 {strides = array<i32>} : memref<2x2304xf32, #tpu.memory_space<vmem>>, vector<1x48xf32>,
    %c95 = arith.constant 95 : index
    %c0_390 = arith.constant 0 : index
    %281 = vector.load %arg12[%c95, %c0_390] : memref<96x48xf32, #tpu.memory_space<vmem>>, vector<1x48xf32>
    %c1_391 = arith.constant 1 : index
    %c2256_392 = arith.constant 2256 : index
    %282 = vector.load %arg13[%c1_391, %c2256_392] : memref<2x2304xf32, #tpu.memory_space<vmem>>, vector<1x48xf32>
    tpu.vector_store %arg13[%c1_391, %c2256_392], %281 {strides = array<i32>} : memref<2x2304xf32, #tpu.memory_space<vmem>>, vector<1x48xf32>,
    %c0_393 = arith.constant 0 : index
    %c0_394 = arith.constant 0 : index
    %283 = vector.load %arg13[%c0_393, %c0_394] : memref<2x2304xf32, #tpu.memory_space<vmem>>, vector<2x2304xf32>
    %284 = arith.truncf %283 : vector<2x2304xf32> to vector<2x2304xbf16>
    %c0_395 = arith.constant 0 : index
    %c0_396 = arith.constant 0 : index
    %285 = vector.load %arg3[%c0_395, %c0_396] : memref<2304x256xbf16, #tpu.memory_space<vmem>>, vector<2304x256xbf16>
    %cst_397 = arith.constant dense<0.000000e+00> : vector<2x256xf32>
    %286 = tpu.matmul %284, %285, %cst_397 {dimension_numbers = #tpu.dot_dimension_numbers<[1], [0], [0], [1], [0, 0, 1, 1], [], []>} : vector<2x2304xbf16>, vector<2304x256xbf16>, vector<2x256xf32> -> vector<2x256xf32>
    %c0_398 = arith.constant 0 : index
    %c0_399 = arith.constant 0 : index
    %287 = vector.load %arg4[%c0_398, %c0_399] : memref<1x256xf32, #tpu.memory_space<vmem>>, vector<1x256xf32>
    %288 = vector.broadcast %287 : vector<1x256xf32> to vector<2x256xf32>
    %289 = arith.addf %286, %288 : vector<2x256xf32>
    %cst_400 = arith.constant 0.000000e+00 : f32
    %290 = vector.broadcast %cst_400 : f32 to vector<2x256xf32>
    %291 = arith.maximumf %289, %290 : vector<2x256xf32>
    %cst_401 = arith.constant dense<0.000000e+00> : vector<2x64xf32>
    %292 = tpu.matmul %291, %6, %cst_401 {dimension_numbers = #tpu.dot_dimension_numbers<[1], [0], [0], [1], [0, 0, 1, 1], [], []>} : vector<2x256xf32>, vector<256x64xf32>, vector<2x64xf32> -> vector<2x64xf32>
    %293 = vector.broadcast %7 : vector<1x64xf32> to vector<2x64xf32>
    %294 = arith.addf %292, %293 : vector<2x64xf32>
    %cst_402 = arith.constant 0.000000e+00 : f32
    %295 = vector.broadcast %cst_402 : f32 to vector<2x64xf32>
    %296 = arith.maximumf %294, %295 : vector<2x64xf32>
    %cst_403 = arith.constant dense<0.000000e+00> : vector<2x4xf32>
    %297 = tpu.matmul %296, %8, %cst_403 {dimension_numbers = #tpu.dot_dimension_numbers<[1], [0], [0], [1], [0, 0, 1, 1], [], []>} : vector<2x64xf32>, vector<64x4xf32>, vector<2x4xf32> -> vector<2x4xf32>
    %298 = vector.broadcast %9 : vector<1x4xf32> to vector<2x4xf32>
    %299 = arith.addf %297, %298 : vector<2x4xf32>
    %c0_404 = arith.constant 0 : index
    %c0_405 = arith.constant 0 : index
    %300 = vector.load %arg6[%c0_404, %c0_405] : memref<2x4xf32, #tpu.memory_space<vmem>>, vector<2x4xf32>
    tpu.vector_store %arg6[%c0_404, %c0_405], %299 {strides = array<i32>} : memref<2x4xf32, #tpu.memory_space<vmem>>, vector<2x4xf32>,
    return
  }
  func.func @transform_0(%arg0: i32) -> (i32, i32) {
    %c0_i32 = arith.constant 0 : i32
    %c0_i32_0 = arith.constant 0 : i32
    return %arg0, %c0_i32 : i32, i32
  }
  func.func @transform_1(%arg0: i32) -> (i32, i32) {
    %c0_i32 = arith.constant 0 : i32
    %c0_i32_0 = arith.constant 0 : i32
    %c0_i32_1 = arith.constant 0 : i32
    return %c0_i32, %c0_i32_0 : i32, i32
  }
  func.func @transform_2(%arg0: i32) -> (i32, i32) {
    %c0_i32 = arith.constant 0 : i32
    %c0_i32_0 = arith.constant 0 : i32
    %c0_i32_1 = arith.constant 0 : i32
    return %c0_i32, %c0_i32_0 : i32, i32
  }
  func.func @transform_3(%arg0: i32) -> (i32, i32) {
    %c0_i32 = arith.constant 0 : i32
    %c0_i32_0 = arith.constant 0 : i32
    %c0_i32_1 = arith.constant 0 : i32
    return %c0_i32, %c0_i32_0 : i32, i32
  }
  func.func @transform_4(%arg0: i32) -> (i32, i32) {
    %c0_i32 = arith.constant 0 : i32
    %c0_i32_0 = arith.constant 0 : i32
    %c0_i32_1 = arith.constant 0 : i32
    return %c0_i32, %c0_i32_0 : i32, i32
  }
  func.func @transform_5(%arg0: i32) -> (i32, i32) {
    %c0_i32 = arith.constant 0 : i32
    %c0_i32_0 = arith.constant 0 : i32
    return %arg0, %c0_i32 : i32, i32
  }
}

</mosaic_0001>

<bundles_post_ra>
// kernel: fwd.1
= control target key start
LH: loop header
LB: loop body
LE: loop exit
PB: predicated region body
PF: predicated region fallthrough
CT: control target
= control target key end

     0   :  { %10 = vsyncpa [#allocation10], 0  ;;  %s8092_s0 = inlined_call_operand.vmem [shape: f32[120,6], index: 0, kind: input, shape index: {}]   ;;  %s8093_s1 = inlined_call_operand.vmem [shape: f32[240,48], index: 1, kind: input, shape index: {}]   ;;  %s8094_s2 = inlined_call_operand.hbm [shape: bf16[2304,256], index: 2, kind: input, shape index: {}]   ;;  %s8095_s3 = inlined_call_operand.hbm [shape: f32[1,256], index: 3, kind: input, shape index: {}]   ;;  %s8096_s4 = inlined_call_operand.vmem [shape: f32[336,64], index: 4, kind: input, shape index: {}]   ;;  %s8097_s5 = inlined_call_operand.hbm [shape: f32[2,4], index: 5, kind: output, shape index: {}]  }
   0x1   :  { %11 = vsyncpa [#allocation13], 0 }
   0x2   :  { %12 = vsyncpa [#allocation11], 0  ;;  %s6745_s18 = smov [#allocation9]   ;;  %s6673_s22 = scalar_lea.hbm %s8094_s2, 36864 }
   0x3   :  { %s22_s19 = sshll.u32 %s6745_s18, 4  ;;  %p6674_p0 = scmp.ne.s32.totalorder %s8094_s2, %s6673_s22  ;;  %s23_s19 = int_to_ptr.vmem [resolvable:$true] %s22_s19 }
   0x4   :  { %p6677_p1 = scmp.lt.u32.totalorder %s6673_s22, %s8094_s2 }
   0x6   :  { %p6679_p2 = pnand %p6677_p1, %p6674_p0 }
   0x8   :  { %6682 = shalt.err (!%p6679_p2)
}
   0x9   :  { %s6683_s27 = scalar_lea.vmem %s23_s19, 36864  ;;  %p6688_p4 = scmp.lt.s32.totalorder %s23_s19, %s23_s19 }
   0xa   :  { %p6684_p3 = scmp.ne.s32.totalorder %s23_s19, %s6683_s27  ;;  %p6689_p5 = scmp.lt.s32.totalorder %s6683_s27, %s6683_s27 }
   0xc   :  { %p6690_p6 = por %p6689_p5, %p6688_p4 }
   0xe   :  { %p6691_p7 = pnand %p6690_p6, %p6684_p3 }
  0x10   :  { %6694 = shalt.err (!%p6691_p7)
}
  0x11   :  { %s6746_s28 = smov 128   ;;  %s6747_s29 = smov 8  }
  0x12   :  { %28 = dma.hbm_to_vmem [thread:$0]  %s8094_s2, 36864, %s23_s19, [#allocation10], %s6746_s28, %s6746_s28, %s6747_s29  }
  0x13   :  { %s6748_s7 = smov [#allocation12]   ;;  %s6695_s11 = scalar_lea.hbm %s8095_s3, 32 }
  0x14   :  { %s35_s8 = sshll.u32 %s6748_s7, 4  ;;  %p6696_p8 = scmp.ne.s32.totalorder %s8095_s3, %s6695_s11  ;;  %s36_s8 = int_to_ptr.vmem [resolvable:$true] %s35_s8 }
  0x15   :  { %p6699_p9 = scmp.lt.u32.totalorder %s6695_s11, %s8095_s3 }
  0x17   :  { %p6701_p10 = pnand %p6699_p9, %p6696_p8 }
  0x19   :  { %6704 = shalt.err (!%p6701_p10)
}
  0x1a   :  { %s6705_s16 = scalar_lea.vmem %s36_s8, 32  ;;  %p6710_p12 = scmp.lt.s32.totalorder %s36_s8, %s36_s8 }
  0x1b   :  { %p6706_p11 = scmp.ne.s32.totalorder %s36_s8, %s6705_s16  ;;  %p6711_p13 = scmp.lt.s32.totalorder %s6705_s16, %s6705_s16 }
  0x1d   :  { %p6712_p0 = por %p6711_p13, %p6710_p12 }
  0x1f   :  { %p6713_p1 = pnand %p6712_p0, %p6706_p11 }
  0x21   :  { %6716 = shalt.err (!%p6713_p1)
}
  0x22   :  { %38 = dma.hbm_to_vmem [thread:$0]  %s8095_s3, 32, %s36_s8, [#allocation13]  }
  0x23   :  { %6739 = dma.done.wait [#allocation10], 36864  }
  0x24   :  { %6740 = vsyncadd [#allocation10], 4294930432 }
  0x25   :  { %6741 = dma.done.wait [#allocation13], 32  }
  0x26   :  { %6742 = vsyncadd [#allocation13], 4294967264  ;;  %v134_v0 = vld [vmem:[%s8092_s0 + $0x1] sm:$0xff]  ;;  %s6749_s22 = smov 6   ;;  %s6750_s23 = smov 12   ;;  %v135_v2 = vld [vmem:[%s8092_s0 + $0x9] sm:$0xff] }
  0x27   :  { %v177_v1 = vld [vmem:[%s8092_s0 + $0x2] sm:$0xff]  ;;  %148 = vrot.lane.b32.xlu0 %v134_v0, %s6749_s22  ;;  %v178_v3 = vld [vmem:[%s8092_s0 + $0xa] sm:$0xff]  ;;  %s6751_s6 = smov 18   ;;  %s6752_s11 = smov 24   ;;  %v137_v9 = vld [vmem:[%s8092_s0 + $0x19] sm:$0xff]  ;;  %vm549_vm0 = vcmask 1045504  }
  0x28   :  { %191 = vrot.lane.b32.xlu1 %v177_v1, %s6750_s23  ;;  %v220_v4 = vld [vmem:[%s8092_s0 + $0x3] sm:$0xff]  ;;  %v221_v5 = vld [vmem:[%s8092_s0 + $0xb] sm:$0xff]  ;;  %v180_v11 = vld [vmem:[%s8092_s0 + $0x1a] sm:$0xff]  ;;  %vm126_vm1 = vcmask 48128   ;;  %vm6753_vm2 = vmmov 1   ;;  %vm169_vm4 = vcmask 97328  }
  0x29   :  { %v263_v6 = vld [vmem:[%s8092_s0 + $0x4] sm:$0xff]  ;;  %v136_v7 = vld [vmem:[%s8092_s0 + $0x11] sm:$0xff]  ;;  %v223_v13 = vld [vmem:[%s8092_s0 + $0x1b] sm:$0xff]  ;;  %vm212_vm5 = vcmask 146528   ;;  %vm255_vm6 = vcmask 195728   ;;  %vm298_vm7 = vcmask 244928  }
  0x2a   :  { %v264_v8 = vld [vmem:[%s8092_s0 + $0xc] sm:$0xff]  ;;  %v119_v14 = vld [vmem:[%s8092_s0] sm:$0xff]  ;;  %vm6881_vm3 = vmpackc.low %vm549_vm0, %vm6753_vm2  ;;  %vm506_vm8 = vcmask 244736   ;;  %vm702_vm9 = vcmask 97280   ;;  %vm1147_vm10 = vcmask 1043456   ;;  %vm6755_vm11 = vmmov 0  }
  0x2b   :  { %150 = vrot.lane.b32.xlu0 %v135_v2, %s6749_s22  ;;  %v179_v10 = vld [vmem:[%s8092_s0 + $0x12] sm:$0xff]  ;;  %v120_v15 = vld [vmem:[%s8092_s0 + $0x8] sm:$0xff]  ;;  %127 = vst.msk [vmem:[#allocation2] sm:$0xff] %vm126_vm1, %v119_v14  ;;  %v47_v19 = vld [vmem:[%s8093_s1] sm:$0xff]  ;;  %s6757_s20 = smov 48   ;;  %s6758_s21 = smov 36  }
  0x2c   :  { %193 = vrot.lane.b32.xlu1 %v178_v3, %s6750_s23  ;;  %v222_v12 = vld [vmem:[%s8092_s0 + $0x13] sm:$0xff]  ;;  %128 = vst.msk [vmem:[#allocation2 + $0x8] sm:$0xff] %vm126_vm1, %v120_v15  ;;  %v48_v20 = vld [vmem:[%s8093_s1 + $0x8] sm:$0xff]  ;;  %v123_v24 = vld [vmem:[%s8092_s0 + $0x20] sm:$0xff]  ;;  %vm730_vm13 = vcmask 93184   ;;  %vm767_vm14 = vcmask 195680  }
  0x2d   :  { %v121_v17 = vld [vmem:[%s8092_s0 + $0x10] sm:$0xff]  ;;  %v122_v18 = vld [vmem:[%s8092_s0 + $0x18] sm:$0xff]  ;;  %v6090_v22 = vpack.c.bf16 %v48_v20, %v47_v19  ;;  %v124_v25 = vld [vmem:[%s8092_s0 + $0x28] sm:$0xff]  ;;  %131 = vst.msk [vmem:[#allocation2 + $0x20] sm:$0xff] %vm126_vm1, %v123_v24  ;;  %vm811_vm15 = vcmask 294080   ;;  %vm855_vm0 = vcmask 392480  }
  0x2e   :  { %129 = vst.msk [vmem:[#allocation2 + $0x10] sm:$0xff] %vm126_vm1, %v121_v17  ;;  %130 = vst.msk [vmem:[#allocation2 + $0x18] sm:$0xff] %vm126_vm1, %v122_v18  ;;  %v49_v21 = vld [vmem:[%s8093_s1 + $0x10] sm:$0xff]  ;;  %v50_v23 = vld [vmem:[%s8093_s1 + $0x18] sm:$0x3f]  ;;  %s6759_s26 = smov 72  }
  0x2f   :  { %234 = vrot.lane.b32.xlu0 %v220_v4, %s6751_s6  ;;  %v265_v26 = vld [vmem:[%s8092_s0 + $0x14] sm:$0xff]  ;;  %v266_v27 = vld [vmem:[%s8092_s0 + $0x1c] sm:$0xff]  ;;  %v6094_v28 = vpack.c.bf16 %v50_v23, %v49_v21  ;;  %132 = vst.msk [vmem:[#allocation2 + $0x28] sm:$0xff] %vm126_vm1, %v124_v25  ;;  %6091 = vmatprep.subr.bf16.mxu0 %v6090_v22  ;;  %v139_v30 = vld [vmem:[%s8092_s0 + $0x29] sm:$0xff]  ;;  %s6763_s29 = smov 64   ;;  %s6764_s30 = smov 32  }
  0x30   :  { %236 = vrot.lane.b32.xlu1 %v221_v5, %s6751_s6  ;;  %6093 = vmatpush3.bf16.msra.mxu0 %v6090_v22  ;;  %v138_v29 = vld [vmem:[%s8092_s0 + $0x21] sm:$0xff]  ;;  %v182_v32 = vld [vmem:[%s8092_s0 + $0x2a] sm:$0xff]  ;;  %v183_v40 = vld [vmem:[%s8092_s0 + $0x32] sm:$0xff]  ;;  %s6765_s7 = smov 80  }
  0x31   :  { %6096 = vmatprep.subr.msk.bf16.mxu0 %vm6881_vm3, %v6094_v28  ;;  %v181_v31 = vld [vmem:[%s8092_s0 + $0x22] sm:$0xff]  ;;  %v125_v33 = vld [vmem:[%s8092_s0 + $0x30] sm:$0xff]  ;;  %v449_v3 = vld [vmem:[%s8092_s0 + $0x58] sm:$0xff] }
  0x32   :  { %133 = vst.msk [vmem:[#allocation2 + $0x30] sm:$0xff] %vm126_vm1, %v125_v33  ;;  %v224_v34 = vld [vmem:[%s8092_s0 + $0x23] sm:$0xff]  ;;  %v225_v35 = vld [vmem:[%s8092_s0 + $0x2b] sm:$0xff]  ;;  %v226_v43 = vld [vmem:[%s8092_s0 + $0x33] sm:$0xff] }
  0x33   :  { %277 = vrot.lane.b32.xlu0 %v263_v6, %s6752_s11  ;;  %v306_v36 = vld [vmem:[%s8092_s0 + $0x3c] sm:$0xff]  ;;  %v267_v37 = vld [vmem:[%s8092_s0 + $0x24] sm:$0xff]  ;;  %v268_v38 = vld [vmem:[%s8092_s0 + $0x2c] sm:$0xff] }
  0x34   :  { %152 = vrot.lane.b32.xlu1 %v136_v7, %s6749_s22  ;;  %6099 = vmatpush3.bf16.msk.msra.mxu0 %vm6881_vm3, %v6094_v28  ;;  %313 = vst.msk [vmem:[#allocation2 + $0x38] sm:$0xff] %vm126_vm1, %v306_v36  ;;  %v140_v39 = vld [vmem:[%s8092_s0 + $0x31] sm:$0xff]  ;;  %v307_v41 = vld [vmem:[%s8092_s0 + $0x44] sm:$0xff]  ;;  %v310_v56 = vld [vmem:[%s8092_s0 + $0x5c] sm:$0xff]  ;;  %vm774_vm3 = vcmask 191584  }
  0x35   :  { %v320_v42 = vld [vmem:[%s8092_s0 + $0x3d] sm:$0xff]  ;;  %314 = vst.msk [vmem:[#allocation2 + $0x40] sm:$0xff] %vm126_vm1, %v307_v41  ;;  %v308_v44 = vld [vmem:[%s8092_s0 + $0x4c] sm:$0xff]  ;;  %v269_v46 = vld [vmem:[%s8092_s0 + $0x34] sm:$0xff] }
  0x36   :  { %v362_v45 = vld [vmem:[%s8092_s0 + $0x3e] sm:$0xff]  ;;  %315 = vst.msk [vmem:[#allocation2 + $0x48] sm:$0xff] %vm126_vm1, %v308_v44  ;;  %v322_v50 = vld [vmem:[%s8092_s0 + $0x4d] sm:$0xff]  ;;  %317 = vst.msk [vmem:[#allocation2 + $0x58] sm:$0xff] %vm126_vm1, %v310_v56 }
  0x37   :  { %279 = vrot.lane.b32.xlu0 %v264_v8, %s6752_s11  ;;  %v404_v47 = vld [vmem:[%s8092_s0 + $0x3f] sm:$0xff]  ;;  %v364_v52 = vld [vmem:[%s8092_s0 + $0x4e] sm:$0xff]  ;;  %v365_v61 = vld [vmem:[%s8092_s0 + $0x56] sm:$0xff] }
  0x38   :  { %154 = vrot.lane.b32.xlu1 %v137_v9, %s6749_s22  ;;  %v321_v48 = vld [vmem:[%s8092_s0 + $0x45] sm:$0xff]  ;;  %v309_v53 = vld [vmem:[%s8092_s0 + $0x54] sm:$0xff]  ;;  %v324_v60 = vld [vmem:[%s8092_s0 + $0x5d] sm:$0xff] }
  0x39   :  { %v446_v49 = vld [vmem:[%s8092_s0 + $0x40] sm:$0xff]  ;;  %316 = vst.msk [vmem:[#allocation2 + $0x50] sm:$0xff] %vm126_vm1, %v309_v53  ;;  %v406_v55 = vld [vmem:[%s8092_s0 + $0x4f] sm:$0xff]  ;;  %v407_v0 = vld [vmem:[%s8092_s0 + $0x57] sm:$0xff] }
  0x3a   :  { %v363_v51 = vld [vmem:[%s8092_s0 + $0x46] sm:$0xff]  ;;  %v448_v58 = vld [vmem:[%s8092_s0 + $0x50] sm:$0xff]  ;;  %v366_v62 = vld [vmem:[%s8092_s0 + $0x5e] sm:$0xff] }
  0x3b   :  { %195 = vrot.lane.b32.xlu0 %v179_v10, %s6750_s23  ;;  %v405_v54 = vld [vmem:[%s8092_s0 + $0x47] sm:$0xff]  ;;  %v323_v59 = vld [vmem:[%s8092_s0 + $0x55] sm:$0xff]  ;;  %v408_v1 = vld [vmem:[%s8092_s0 + $0x5f] sm:$0xff] }
  0x3c   :  { %197 = vrot.lane.b32.xlu1 %v180_v11, %s6750_s23  ;;  %v447_v57 = vld [vmem:[%s8092_s0 + $0x48] sm:$0xff]  ;;  %v450_v4 = vld [vmem:[%s8092_s0 + $0x60] sm:$0xff]  ;;  %vm6111_vm12 = vmpackc.low %vm1147_vm10, %vm6753_vm2  ;;  %vm1107_vm2 = vcmask 490496   ;;  %vm1424_vm10 = vcmask 785984  }
  0x3d   :  { %v311_v63 = vld [vmem:[%s8092_s0 + $0x64] sm:$0xff]  ;;  %v312_v2 = vld [vmem:[%s8092_s0 + $0x6c] sm:$0xff] }
  0x3e   :  { %318 = vst.msk [vmem:[#allocation2 + $0x60] sm:$0xff] %vm126_vm1, %v311_v63  ;;  %319 = vst.msk [vmem:[#allocation2 + $0x68] sm:$0xff] %vm126_vm1, %v312_v2  ;;  %v325_v5 = vld [vmem:[%s8092_s0 + $0x65] sm:$0xff]  ;;  %v326_v6 = vld [vmem:[%s8092_s0 + $0x6d] sm:$0xff]  ;;  %vm899_vm1 = vcmask 490880  }
  0x3f   :  { %238 = vrot.lane.b32.xlu0 %v222_v12, %s6751_s6  ;;  %v367_v7 = vld [vmem:[%s8092_s0 + $0x66] sm:$0xff]  ;;  %v368_v8 = vld [vmem:[%s8092_s0 + $0x6e] sm:$0xff] }
  0x40   :  { %240 = vrot.lane.b32.xlu1 %v223_v13, %s6751_s6  ;;  %v409_v9 = vld [vmem:[%s8092_s0 + $0x67] sm:$0xff]  ;;  %v410_v10 = vld [vmem:[%s8092_s0 + $0x6f] sm:$0xff] }
  0x41   :  { %v451_v11 = vld [vmem:[%s8092_s0 + $0x68] sm:$0xff]  ;;  %v452_v12 = vld [vmem:[%s8092_s0 + $0x70] sm:$0xff]  ;;  %s6760_s0 = smov 96  }
  0x43   :  { %281 = vrot.lane.b32.xlu0 %v265_v26, %s6752_s11 }
  0x44   :  { %283 = vrot.lane.b32.xlu1 %v266_v27, %s6752_s11 }
  0x47   :  { %156 = vrot.lane.b32.xlu0 %v138_v29, %s6749_s22 }
  0x48   :  { %158 = vrot.lane.b32.xlu1 %v139_v30, %s6749_s22 }
  0x4b   :  { %199 = vrot.lane.b32.xlu0 %v181_v31, %s6750_s23 }
  0x4c   :  { %201 = vrot.lane.b32.xlu1 %v182_v32, %s6750_s23 }
  0x4f   :  { %242 = vrot.lane.b32.xlu0 %v224_v34, %s6751_s6 }
  0x50   :  { %244 = vrot.lane.b32.xlu1 %v225_v35, %s6751_s6 }
  0x53   :  { %285 = vrot.lane.b32.xlu0 %v267_v37, %s6752_s11 }
  0x54   :  { %287 = vrot.lane.b32.xlu1 %v268_v38, %s6752_s11 }
  0x57   :  { %160 = vrot.lane.b32.xlu0 %v140_v39, %s6749_s22 }
  0x58   :  { %203 = vrot.lane.b32.xlu1 %v183_v40, %s6750_s23 }
  0x5b   :  { %334 = vrot.lane.b32.xlu0 %v320_v42, %s6749_s22 }
  0x5c   :  { %246 = vrot.lane.b32.xlu1 %v226_v43, %s6751_s6 }
  0x5f   :  { %376 = vrot.lane.b32.xlu0 %v362_v45, %s6750_s23 }
  0x60   :  { %289 = vrot.lane.b32.xlu1 %v269_v46, %s6752_s11 }
  0x63   :  { %418 = vrot.lane.b32.xlu0 %v404_v47, %s6751_s6 }
  0x64   :  { %336 = vrot.lane.b32.xlu1 %v321_v48, %s6749_s22 }
  0x67   :  { %460 = vrot.lane.b32.xlu0 %v446_v49, %s6752_s11 }
  0x68   :  { %338 = vrot.lane.b32.xlu1 %v322_v50, %s6749_s22 }
  0x6b   :  { %378 = vrot.lane.b32.xlu0 %v363_v51, %s6750_s23 }
  0x6c   :  { %380 = vrot.lane.b32.xlu1 %v364_v52, %s6750_s23 }
  0x6f   :  { %420 = vrot.lane.b32.xlu0 %v405_v54, %s6751_s6 }
  0x70   :  { %422 = vrot.lane.b32.xlu1 %v406_v55, %s6751_s6 }
  0x73   :  { %462 = vrot.lane.b32.xlu0 %v447_v57, %s6752_s11 }
  0x74   :  { %464 = vrot.lane.b32.xlu1 %v448_v58, %s6752_s11 }
  0x77   :  { %340 = vrot.lane.b32.xlu0 %v323_v59, %s6749_s22 }
  0x78   :  { %342 = vrot.lane.b32.xlu1 %v324_v60, %s6749_s22 }
  0x7b   :  { %382 = vrot.lane.b32.xlu0 %v365_v61, %s6750_s23 }
  0x7c   :  { %384 = vrot.lane.b32.xlu1 %v366_v62, %s6750_s23 }
  0x7f   :  { %424 = vrot.lane.b32.xlu0 %v407_v0, %s6751_s6 }
  0x80   :  { %426 = vrot.lane.b32.xlu1 %v408_v1, %s6751_s6 }
  0x83   :  { %466 = vrot.lane.b32.xlu0 %v449_v3, %s6752_s11 }
  0x84   :  { %468 = vrot.lane.b32.xlu1 %v450_v4, %s6752_s11 }
  0x87   :  { %344 = vrot.lane.b32.xlu0 %v325_v5, %s6749_s22 }
  0x88   :  { %346 = vrot.lane.b32.xlu1 %v326_v6, %s6749_s22 }
  0x8b   :  { %386 = vrot.lane.b32.xlu0 %v367_v7, %s6750_s23 }
  0x8c   :  { %388 = vrot.lane.b32.xlu1 %v368_v8, %s6750_s23 }
  0x8f   :  { %428 = vrot.lane.b32.xlu0 %v409_v9, %s6751_s6 }
  0x90   :  { %430 = vrot.lane.b32.xlu1 %v410_v10, %s6751_s6  ;;  %s6762_s6 = smov 16  }
  0x93   :  { %470 = vrot.lane.b32.xlu0 %v451_v11, %s6752_s11 }
  0x94   :  { %472 = vrot.lane.b32.xlu1 %v452_v12, %s6752_s11 }
  0x99   :  { %v149_v13 = vpop.permute.xlu0 %148 }
  0x9a   :  { %v192_v14 = vpop.permute.xlu1 %191  ;;  %170 = vst.msk [vmem:[#allocation2] sm:$0xff] %vm169_vm4, %v149_v13 }
  0x9b   :  { %213 = vst.msk [vmem:[#allocation2] sm:$0xff] %vm212_vm5, %v192_v14 }
  0x9d   :  { %v151_v15 = vpop.permute.xlu0 %150 }
  0x9e   :  { %v194_v16 = vpop.permute.xlu1 %193  ;;  %171 = vst.msk [vmem:[#allocation2 + $0x8] sm:$0xff] %vm169_vm4, %v151_v15 }
  0x9f   :  { %214 = vst.msk [vmem:[#allocation2 + $0x8] sm:$0xff] %vm212_vm5, %v194_v16 }
  0xa1   :  { %v235_v17 = vpop.permute.xlu0 %234 }
  0xa2   :  { %v237_v18 = vpop.permute.xlu1 %236  ;;  %256 = vst.msk [vmem:[#allocation2] sm:$0xff] %vm255_vm6, %v235_v17 }
  0xa3   :  { %257 = vst.msk [vmem:[#allocation2 + $0x8] sm:$0xff] %vm255_vm6, %v237_v18 }
  0xa5   :  { %v278_v19 = vpop.permute.xlu0 %277 }
  0xa6   :  { %v153_v20 = vpop.permute.xlu1 %152  ;;  %299 = vst.msk [vmem:[#allocation2] sm:$0xff] %vm298_vm7, %v278_v19  ;;  %v6754_v19 = vmov 0.0|0.0  }
  0xa7   :  { %172 = vst.msk [vmem:[#allocation2 + $0x10] sm:$0xff] %vm169_vm4, %v153_v20  ;;  %6100 = vmatprep.subr.bf16.mxu1 %v6754_v19  ;;  %v7197_v20 = vld [vmem:[%s8093_s1 + $0x20] ss:$0 sm:$0xff] }
  0xa9   :  { %v280_v21 = vpop.permute.xlu0 %279 }
  0xaa   :  { %v155_v22 = vpop.permute.xlu1 %154  ;;  %300 = vst.msk [vmem:[#allocation2 + $0x8] sm:$0xff] %vm298_vm7, %v280_v21  ;;  %v52_v21 = vld [vmem:[%s8093_s1 + $0x28] sm:$0xff] }
  0xab   :  { %173 = vst.msk [vmem:[#allocation2 + $0x18] sm:$0xff] %vm169_vm4, %v155_v22  ;;  %v53_v22 = vld [vmem:[%s8093_s1 + $0x30] sm:$0xff] }
  0xad   :  { %v196_v23 = vpop.permute.xlu0 %195  ;;  %v488_v25 = vld [vmem:[#allocation2] sm:$0xff] }
  0xae   :  { %v198_v24 = vpop.permute.xlu1 %197  ;;  %215 = vst.msk [vmem:[#allocation2 + $0x10] sm:$0xff] %vm212_vm5, %v196_v23  ;;  %5947 = vmatprep.mubr.msk.f32.mxu0 %vm506_vm8, %v488_v25  ;;  %v6101_v23 = vpack.c.bf16 %v53_v22, %v52_v21 }
  0xaf   :  { %216 = vst.msk [vmem:[#allocation2 + $0x18] sm:$0xff] %vm212_vm5, %v198_v24 }
  0xb0   :  { %6102 = vmatpush3.bf16.msra.mxu1 %v6101_v23 }
  0xb1   :  { %v239_v26 = vpop.permute.xlu0 %238  ;;  %v489_v28 = vld [vmem:[#allocation2 + $0x8] sm:$0xff]  ;;  %6103 = vmatprep.subr.bf16.mxu1 %v6754_v19 }
  0xb2   :  { %v241_v27 = vpop.permute.xlu1 %240  ;;  %258 = vst.msk [vmem:[#allocation2 + $0x10] sm:$0xff] %vm255_vm6, %v239_v26  ;;  %5948 = vmatmul.mubr.msk.f32.vlgmr.msra.gmra.mrb[0].mxu0 %vm506_vm8, %v489_v28  ;;  %v54_v28 = vld [vmem:[%s8093_s1 + $0x38] sm:$0xff] }
  0xb3   :  { %259 = vst.msk [vmem:[#allocation2 + $0x18] sm:$0xff] %vm255_vm6, %v241_v27 }
  0xb5   :  { %v282_v29 = vpop.permute.xlu0 %281 }
  0xb6   :  { %v284_v30 = vpop.permute.xlu1 %283  ;;  %301 = vst.msk [vmem:[#allocation2 + $0x10] sm:$0xff] %vm298_vm7, %v282_v29  ;;  %v55_v29 = vld [vmem:[%s8093_s1 + $0x40] sm:$0xff] }
  0xb7   :  { %302 = vst.msk [vmem:[#allocation2 + $0x18] sm:$0xff] %vm298_vm7, %v284_v30 }
  0xb9   :  { %v157_v31 = vpop.permute.xlu0 %156 }
  0xba   :  { %v159_v32 = vpop.permute.xlu1 %158  ;;  %174 = vst.msk [vmem:[#allocation2 + $0x20] sm:$0xff] %vm169_vm4, %v157_v31  ;;  %v6104_v31 = vpack.c.bf16 %v55_v29, %v54_v28 }
  0xbb   :  { %175 = vst.msk [vmem:[#allocation2 + $0x28] sm:$0xff] %vm169_vm4, %v159_v32 }
  0xbc   :  { %6105 = vmatpush3.bf16.msra.mxu1 %v6104_v31 }
  0xbd   :  { %v200_v33 = vpop.permute.xlu0 %199  ;;  %v490_v35 = vld [vmem:[#allocation2 + $0x10] sm:$0xff]  ;;  %6106 = vmatprep.subr.bf16.mxu1 %v6754_v19 }
  0xbe   :  { %v202_v34 = vpop.permute.xlu1 %201  ;;  %v491_v36 = vld [vmem:[#allocation2 + $0x18] sm:$0xff]  ;;  %217 = vst.msk [vmem:[#allocation2 + $0x20] sm:$0xff] %vm212_vm5, %v200_v33  ;;  %5950 = vmatprep.mubr.msk.f32.mxu0 %vm506_vm8, %v490_v35  ;;  %v56_v33 = vld [vmem:[%s8093_s1 + $0x48] sm:$0xff] }
  0xbf   :  { %218 = vst.msk [vmem:[#allocation2 + $0x28] sm:$0xff] %vm212_vm5, %v202_v34  ;;  %5951 = vmatmul.mubr.msk.f32.gmra.mrb[2].mxu0 %vm506_vm8, %v491_v36  ;;  %v57_v34 = vld [vmem:[%s8093_s1 + $0x50] sm:$0xff]  ;;  %v58_v36 = vld [vmem:[%s8093_s1 + $0x58] sm:$0xff] }
  0xc0   :  { %v6107_v35 = vpack.c.bf16 %v57_v34, %v56_v33 }
  0xc1   :  { %v243_v37 = vpop.permute.xlu0 %242 }
  0xc2   :  { %v245_v38 = vpop.permute.xlu1 %244  ;;  %260 = vst.msk [vmem:[#allocation2 + $0x20] sm:$0xff] %vm255_vm6, %v243_v37  ;;  %v59_v37 = vld [vmem:[%s8093_s1 + $0x60] sm:$0xf]  ;;  %6108 = vmatpush3.bf16.msra.mxu1 %v6107_v35 }
  0xc3   :  { %261 = vst.msk [vmem:[#allocation2 + $0x28] sm:$0xff] %vm255_vm6, %v245_v38  ;;  %v6756_v38 = vmov 0.0   ;;  %6109 = vmatprep.subr.bf16.mxu1 %v6754_v19 }
  0xc4   :  { %5984 = vmatprep.mubr.msk.f32.mxu1 %vm6755_vm11, %v6756_v38 }
  0xc5   :  { %v286_v39 = vpop.permute.xlu0 %285 }
  0xc6   :  { %v288_v40 = vpop.permute.xlu1 %287  ;;  %303 = vst.msk [vmem:[#allocation2 + $0x20] sm:$0xff] %vm298_vm7, %v286_v39  ;;  %v6110_v39 = vpack.c.bf16 %v59_v37, %v58_v36 }
  0xc7   :  { %304 = vst.msk [vmem:[#allocation2 + $0x28] sm:$0xff] %vm298_vm7, %v288_v40 }
  0xc8   :  { %6112 = vmatpush3.bf16.msk.msra.mxu1 %vm6111_vm12, %v6110_v39  ;;  %vm1461_vm12 = vcmask 982784  }
  0xc9   :  { %v161_v41 = vpop.permute.xlu0 %160 }
  0xca   :  { %v204_v42 = vpop.permute.xlu1 %203  ;;  %176 = vst.msk [vmem:[#allocation2 + $0x30] sm:$0xff] %vm169_vm4, %v161_v41 }
  0xcb   :  { %219 = vst.msk [vmem:[#allocation2 + $0x30] sm:$0xff] %vm212_vm5, %v204_v42 }
  0xcd   :  { %v335_v43 = vpop.permute.xlu0 %334  ;;  %v492_v45 = vld [vmem:[#allocation2 + $0x20] sm:$0xff] }
  0xce   :  { %v247_v44 = vpop.permute.xlu1 %246  ;;  %v493_v46 = vld [vmem:[#allocation2 + $0x28] sm:$0xff]  ;;  %355 = vst.msk [vmem:[#allocation2 + $0x38] sm:$0xff] %vm169_vm4, %v335_v43  ;;  %5953 = vmatprep.mubr.msk.f32.mxu0 %vm506_vm8, %v492_v45 }
  0xcf   :  { %262 = vst.msk [vmem:[#allocation2 + $0x30] sm:$0xff] %vm255_vm6, %v247_v44  ;;  %5954 = vmatmul.mubr.msk.f32.gmra.mrb[4].mxu0 %vm506_vm8, %v493_v46 }
  0xd1   :  { %v377_v47 = vpop.permute.xlu0 %376 }
  0xd2   :  { %v290_v48 = vpop.permute.xlu1 %289  ;;  %397 = vst.msk [vmem:[#allocation2 + $0x38] sm:$0xff] %vm212_vm5, %v377_v47 }
  0xd3   :  { %305 = vst.msk [vmem:[#allocation2 + $0x30] sm:$0xff] %vm298_vm7, %v290_v48 }
  0xd5   :  { %v419_v49 = vpop.permute.xlu0 %418 }
  0xd6   :  { %v337_v50 = vpop.permute.xlu1 %336  ;;  %439 = vst.msk [vmem:[#allocation2 + $0x38] sm:$0xff] %vm255_vm6, %v419_v49 }
  0xd7   :  { %356 = vst.msk [vmem:[#allocation2 + $0x40] sm:$0xff] %vm169_vm4, %v337_v50 }
  0xd9   :  { %v461_v51 = vpop.permute.xlu0 %460 }
  0xda   :  { %v339_v52 = vpop.permute.xlu1 %338  ;;  %v494_v53 = vld [vmem:[#allocation2 + $0x30] sm:$0xff]  ;;  %481 = vst.msk [vmem:[#allocation2 + $0x38] sm:$0xff] %vm298_vm7, %v461_v51 }
  0xdb   :  { %357 = vst.msk [vmem:[#allocation2 + $0x48] sm:$0xff] %vm169_vm4, %v339_v52  ;;  %5956 = vmatprep.mubr.msk.f32.mxu0 %vm506_vm8, %v494_v53 }
  0xdd   :  { %v379_v54 = vpop.permute.xlu0 %378 }
  0xde   :  { %v381_v55 = vpop.permute.xlu1 %380  ;;  %398 = vst.msk [vmem:[#allocation2 + $0x40] sm:$0xff] %vm212_vm5, %v379_v54 }
  0xdf   :  { %399 = vst.msk [vmem:[#allocation2 + $0x48] sm:$0xff] %vm212_vm5, %v381_v55 }
  0xe1   :  { %v421_v56 = vpop.permute.xlu0 %420  ;;  %v495_v58 = vld [vmem:[#allocation2 + $0x38] sm:$0xff] }
  0xe2   :  { %v423_v57 = vpop.permute.xlu1 %422  ;;  %440 = vst.msk [vmem:[#allocation2 + $0x40] sm:$0xff] %vm255_vm6, %v421_v56  ;;  %5957 = vmatmul.mubr.msk.f32.gmra.mrb[6].mxu0 %vm506_vm8, %v495_v58 }
  0xe3   :  { %441 = vst.msk [vmem:[#allocation2 + $0x48] sm:$0xff] %vm255_vm6, %v423_v57 }
  0xe5   :  { %v463_v59 = vpop.permute.xlu0 %462 }
  0xe6   :  { %v465_v60 = vpop.permute.xlu1 %464  ;;  %482 = vst.msk [vmem:[#allocation2 + $0x40] sm:$0xff] %vm298_vm7, %v463_v59 }
  0xe7   :  { %483 = vst.msk [vmem:[#allocation2 + $0x48] sm:$0xff] %vm298_vm7, %v465_v60 }
  0xe9   :  { %v341_v61 = vpop.permute.xlu0 %340 }
  0xea   :  { %v343_v62 = vpop.permute.xlu1 %342  ;;  %358 = vst.msk [vmem:[#allocation2 + $0x50] sm:$0xff] %vm169_vm4, %v341_v61 }
  0xeb   :  { %359 = vst.msk [vmem:[#allocation2 + $0x58] sm:$0xff] %vm169_vm4, %v343_v62 }
  0xed   :  { %v383_v63 = vpop.permute.xlu0 %382  ;;  %v496_v1 = vld [vmem:[#allocation2 + $0x40] sm:$0xff] }
  0xee   :  { %v385_v0 = vpop.permute.xlu1 %384  ;;  %v497_v2 = vld [vmem:[#allocation2 + $0x48] sm:$0xff]  ;;  %400 = vst.msk [vmem:[#allocation2 + $0x50] sm:$0xff] %vm212_vm5, %v383_v63  ;;  %5959 = vmatprep.mubr.msk.f32.mxu0 %vm506_vm8, %v496_v1 }
  0xef   :  { %401 = vst.msk [vmem:[#allocation2 + $0x58] sm:$0xff] %vm212_vm5, %v385_v0  ;;  %5960 = vmatmul.mubr.msk.f32.gmra.mrb[8].mxu0 %vm506_vm8, %v497_v2 }
  0xf1   :  { %v425_v3 = vpop.permute.xlu0 %424 }
  0xf2   :  { %v427_v4 = vpop.permute.xlu1 %426  ;;  %442 = vst.msk [vmem:[#allocation2 + $0x50] sm:$0xff] %vm255_vm6, %v425_v3 }
  0xf3   :  { %443 = vst.msk [vmem:[#allocation2 + $0x58] sm:$0xff] %vm255_vm6, %v427_v4 }
  0xf5   :  { %v467_v5 = vpop.permute.xlu0 %466 }
  0xf6   :  { %v469_v6 = vpop.permute.xlu1 %468  ;;  %484 = vst.msk [vmem:[#allocation2 + $0x50] sm:$0xff] %vm298_vm7, %v467_v5 }
  0xf7   :  { %485 = vst.msk [vmem:[#allocation2 + $0x58] sm:$0xff] %vm298_vm7, %v469_v6 }
  0xf9   :  { %v345_v7 = vpop.permute.xlu0 %344 }
  0xfa   :  { %v347_v8 = vpop.permute.xlu1 %346  ;;  %360 = vst.msk [vmem:[#allocation2 + $0x60] sm:$0xff] %vm169_vm4, %v345_v7 }
  0xfb   :  { %361 = vst.msk [vmem:[#allocation2 + $0x68] sm:$0xff] %vm169_vm4, %v347_v8  ;;  %vm818_vm4 = vcmask 289984  }
  0xfd   :  { %v387_v9 = vpop.permute.xlu0 %386  ;;  %v498_v11 = vld [vmem:[#allocation2 + $0x50] sm:$0xff] }
  0xfe   :  { %v389_v10 = vpop.permute.xlu1 %388  ;;  %v499_v12 = vld [vmem:[#allocation2 + $0x58] sm:$0xff]  ;;  %402 = vst.msk [vmem:[#allocation2 + $0x60] sm:$0xff] %vm212_vm5, %v387_v9  ;;  %5962 = vmatprep.mubr.msk.f32.mxu0 %vm506_vm8, %v498_v11 }
  0xff   :  { %403 = vst.msk [vmem:[#allocation2 + $0x68] sm:$0xff] %vm212_vm5, %v389_v10  ;;  %5963 = vmatmul.mubr.msk.f32.gmra.mrb[10].mxu0 %vm506_vm8, %v499_v12  ;;  %vm862_vm5 = vcmask 388384  }
 0x101   :  { %v429_v13 = vpop.permute.xlu0 %428 }
 0x102   :  { %v431_v14 = vpop.permute.xlu1 %430  ;;  %444 = vst.msk [vmem:[#allocation2 + $0x60] sm:$0xff] %vm255_vm6, %v429_v13 }
 0x103   :  { %445 = vst.msk [vmem:[#allocation2 + $0x68] sm:$0xff] %vm255_vm6, %v431_v14  ;;  %vm906_vm6 = vcmask 486784  }
 0x105   :  { %v471_v15 = vpop.permute.xlu0 %470 }
 0x106   :  { %v473_v16 = vpop.permute.xlu1 %472  ;;  %486 = vst.msk [vmem:[#allocation2 + $0x60] sm:$0xff] %vm298_vm7, %v471_v15 }
 0x107   :  { %487 = vst.msk [vmem:[#allocation2 + $0x68] sm:$0xff] %vm298_vm7, %v473_v16  ;;  %vm1294_vm7 = vcmask 195584  }
 0x10d   :  { %v500_v17 = vld [vmem:[#allocation2 + $0x60] sm:$0xff] }
 0x10e   :  { %v501_v18 = vld [vmem:[#allocation2 + $0x68] sm:$0xff]  ;;  %5965 = vmatprep.mubr.msk.f32.mxu0 %vm506_vm8, %v500_v17 }
 0x10f   :  { %5966 = vmatmul.mubr.msk.f32.gmra.mrb[12].mxu0 %vm506_vm8, %v501_v18  ;;  %vm1350_vm8 = vcmask 392384  }
 0x185   :  { %v5949_v24 = vpop.f32.mrb[0].mxu0 }
 0x186   :  { %v625_v25 = vadd.f32 %v5949_v24, %v7197_v20  ;;  %v619_v26 = vpop.f32.mrb[1].mxu0 }
 0x187   :  { %v620_v27 = vadd.f32 %v7197_v20, %v619_v26 }
 0x188   :  { %v689_v30 = vmax.f32 %v625_v25, 0.0 }
 0x189   :  { %v688_v32 = vmax.f32 %v620_v27, 0.0 }
 0x18a   :  { %704 = vst.msk [vmem:[#allocation5 + $0x8] sm:$0xff] %vm702_vm9, %v689_v30 }
 0x18b   :  { %703 = vst.msk [vmem:[#allocation5] sm:$0xff] %vm702_vm9, %v688_v32 }
 0x191   :  { %v718_v40 = vld [vmem:[#allocation5 + $0x8] sm:$0xff] }
 0x192   :  { %v5952_v41 = vpop.f32.mrb[2].mxu0  ;;  %v776_v42 = vld [vmem:[#allocation5 + $0x2] sm:$0xff]  ;;  %725 = vst.msk [vmem:[#allocation3 + $0x8] sm:$0xff] %vm702_vm9, %v718_v40 }
 0x193   :  { %v732_v43 = vld [vmem:[#allocation5 + $0x1] sm:$0xff]  ;;  %v635_v44 = vadd.f32 %v5952_v41, %v7197_v20  ;;  %v629_v45 = vpop.f32.mrb[3].mxu0  ;;  %790 = vrot.lane.b32.xlu1 %v776_v42, %s6752_s11 }
 0x194   :  { %746 = vrot.lane.b32.xlu0 %v732_v43, %s6750_s23  ;;  %v717_v46 = vld [vmem:[#allocation5] sm:$0xff]  ;;  %v630_v47 = vadd.f32 %v7197_v20, %v629_v45 }
 0x195   :  { %724 = vst.msk [vmem:[#allocation3] sm:$0xff] %vm702_vm9, %v717_v46  ;;  %v691_v48 = vmax.f32 %v635_v44, 0.0  ;;  %v864_v50 = vld [vmem:[#allocation5 + $0x4] sm:$0xff] }
 0x196   :  { %v690_v49 = vmax.f32 %v630_v47, 0.0  ;;  %v820_v51 = vld [vmem:[#allocation5 + $0x3] sm:$0xff] }
 0x197   :  { %706 = vst.msk [vmem:[#allocation5 + $0x18] sm:$0xff] %vm702_vm9, %v691_v48  ;;  %878 = vrot.lane.b32.xlu1 %v864_v50, %s6757_s20 }
 0x198   :  { %834 = vrot.lane.b32.xlu0 %v820_v51, %s6758_s21  ;;  %705 = vst.msk [vmem:[#allocation5 + $0x10] sm:$0xff] %vm702_vm9, %v690_v49 }
 0x19e   :  { %v720_v52 = vld [vmem:[#allocation5 + $0x18] sm:$0xff] }
 0x19f   :  { %v777_v53 = vld [vmem:[#allocation5 + $0xa] sm:$0xff]  ;;  %727 = vst.msk [vmem:[#allocation3 + $0x18] sm:$0xff] %vm702_vm9, %v720_v52  ;;  %v778_v0 = vld [vmem:[#allocation5 + $0x12] sm:$0xff] }
 0x1a0   :  { %v733_v54 = vld [vmem:[#allocation5 + $0x9] sm:$0xff]  ;;  %792 = vrot.lane.b32.xlu1 %v777_v53, %s6752_s11  ;;  %v734_v1 = vld [vmem:[#allocation5 + $0x11] sm:$0xff] }
 0x1a1   :  { %748 = vrot.lane.b32.xlu0 %v733_v54, %s6750_s23  ;;  %v719_v55 = vld [vmem:[#allocation5 + $0x10] sm:$0xff] }
 0x1a2   :  { %v5955_v56 = vpop.f32.mrb[4].mxu0  ;;  %726 = vst.msk [vmem:[#allocation3 + $0x10] sm:$0xff] %vm702_vm9, %v719_v55  ;;  %v865_v59 = vld [vmem:[#allocation5 + $0xc] sm:$0xff]  ;;  %v866_v2 = vld [vmem:[#allocation5 + $0x14] sm:$0xff] }
 0x1a3   :  { %v645_v57 = vadd.f32 %v5955_v56, %v7197_v20  ;;  %v639_v58 = vpop.f32.mrb[5].mxu0  ;;  %v821_v60 = vld [vmem:[#allocation5 + $0xb] sm:$0xff]  ;;  %v822_v3 = vld [vmem:[#allocation5 + $0x13] sm:$0xff] }
 0x1a4   :  { %v640_v61 = vadd.f32 %v7197_v20, %v639_v58  ;;  %880 = vrot.lane.b32.xlu1 %v865_v59, %s6757_s20 }
 0x1a5   :  { %836 = vrot.lane.b32.xlu0 %v821_v60, %s6758_s21  ;;  %v693_v62 = vmax.f32 %v645_v57, 0.0 }
 0x1a6   :  { %v692_v63 = vmax.f32 %v640_v61, 0.0 }
 0x1a7   :  { %708 = vst.msk [vmem:[#allocation5 + $0x28] sm:$0xff] %vm702_vm9, %v693_v62 }
 0x1a8   :  { %707 = vst.msk [vmem:[#allocation5 + $0x20] sm:$0xff] %vm702_vm9, %v692_v63  ;;  %794 = vrot.lane.b32.xlu1 %v778_v0, %s6752_s11 }
 0x1a9   :  { %750 = vrot.lane.b32.xlu0 %v734_v1, %s6750_s23 }
 0x1ac   :  { %882 = vrot.lane.b32.xlu1 %v866_v2, %s6757_s20 }
 0x1ad   :  { %838 = vrot.lane.b32.xlu0 %v822_v3, %s6758_s21 }
 0x1ae   :  { %v722_v4 = vld [vmem:[#allocation5 + $0x28] sm:$0xff] }
 0x1af   :  { %v779_v5 = vld [vmem:[#allocation5 + $0x1a] sm:$0xff]  ;;  %729 = vst.msk [vmem:[#allocation3 + $0x28] sm:$0xff] %vm702_vm9, %v722_v4  ;;  %v780_v14 = vld [vmem:[#allocation5 + $0x22] sm:$0xff] }
 0x1b0   :  { %v735_v6 = vld [vmem:[#allocation5 + $0x19] sm:$0xff]  ;;  %796 = vrot.lane.b32.xlu1 %v779_v5, %s6752_s11  ;;  %v736_v15 = vld [vmem:[#allocation5 + $0x21] sm:$0xff] }
 0x1b1   :  { %752 = vrot.lane.b32.xlu0 %v735_v6, %s6750_s23  ;;  %v721_v7 = vld [vmem:[#allocation5 + $0x20] sm:$0xff] }
 0x1b2   :  { %728 = vst.msk [vmem:[#allocation3 + $0x20] sm:$0xff] %vm702_vm9, %v721_v7  ;;  %v867_v8 = vld [vmem:[#allocation5 + $0x1c] sm:$0xff]  ;;  %v868_v18 = vld [vmem:[#allocation5 + $0x24] sm:$0xff] }
 0x1b3   :  { %v823_v9 = vld [vmem:[#allocation5 + $0x1b] sm:$0xff]  ;;  %v824_v21 = vld [vmem:[#allocation5 + $0x23] sm:$0xff] }
 0x1b4   :  { %884 = vrot.lane.b32.xlu1 %v867_v8, %s6757_s20 }
 0x1b5   :  { %840 = vrot.lane.b32.xlu0 %v823_v9, %s6758_s21  ;;  %v5958_v10 = vpop.f32.mrb[6].mxu0 }
 0x1b6   :  { %v655_v11 = vadd.f32 %v5958_v10, %v7197_v20  ;;  %v649_v12 = vpop.f32.mrb[7].mxu0 }
 0x1b7   :  { %v650_v13 = vadd.f32 %v7197_v20, %v649_v12 }
 0x1b8   :  { %v695_v16 = vmax.f32 %v655_v11, 0.0  ;;  %798 = vrot.lane.b32.xlu1 %v780_v14, %s6752_s11 }
 0x1b9   :  { %754 = vrot.lane.b32.xlu0 %v736_v15, %s6750_s23  ;;  %v694_v17 = vmax.f32 %v650_v13, 0.0 }
 0x1ba   :  { %710 = vst.msk [vmem:[#allocation5 + $0x38] sm:$0xff] %vm702_vm9, %v695_v16 }
 0x1bb   :  { %709 = vst.msk [vmem:[#allocation5 + $0x30] sm:$0xff] %vm702_vm9, %v694_v17 }
 0x1bc   :  { %886 = vrot.lane.b32.xlu1 %v868_v18, %s6757_s20 }
 0x1bd   :  { %842 = vrot.lane.b32.xlu0 %v824_v21, %s6758_s21 }
 0x1c1   :  { %v908_v22 = vld [vmem:[#allocation5 + $0x38] sm:$0xff] }
 0x1c2   :  { %v5961_v23 = vpop.f32.mrb[8].mxu0  ;;  %v781_v24 = vld [vmem:[#allocation5 + $0x2a] sm:$0xff]  ;;  %915 = vst.msk [vmem:[#allocation3 + $0x34] sm:$0xff] %vm702_vm9, %v908_v22  ;;  %v782_v35 = vld [vmem:[#allocation5 + $0x32] sm:$0xf] }
 0x1c3   :  { %v737_v25 = vld [vmem:[#allocation5 + $0x29] sm:$0xff]  ;;  %v665_v26 = vadd.f32 %v5961_v23, %v7197_v20  ;;  %v659_v27 = vpop.f32.mrb[9].mxu0  ;;  %800 = vrot.lane.b32.xlu1 %v781_v24, %s6752_s11  ;;  %v738_v34 = vld [vmem:[#allocation5 + $0x31] sm:$0xf] }
 0x1c4   :  { %756 = vrot.lane.b32.xlu0 %v737_v25, %s6750_s23  ;;  %v660_v28 = vadd.f32 %v7197_v20, %v659_v27  ;;  %v723_v29 = vld [vmem:[#allocation5 + $0x30] sm:$0xf]  ;;  %v870_v48 = vld [vmem:[#allocation5 + $0x34] sm:$0xf] }
 0x1c5   :  { %v697_v30 = vmax.f32 %v665_v26, 0.0  ;;  %731 = vst.msk [vmem:[#allocation3 + $0x30] sm:$0xf] %vm730_vm13, %v723_v29  ;;  %v869_v32 = vld [vmem:[#allocation5 + $0x2c] sm:$0xff] }
 0x1c6   :  { %v696_v31 = vmax.f32 %v660_v28, 0.0  ;;  %v825_v33 = vld [vmem:[#allocation5 + $0x2b] sm:$0xff]  ;;  %v826_v41 = vld [vmem:[#allocation5 + $0x33] sm:$0xf] }
 0x1c7   :  { %712 = vst.msk [vmem:[#allocation5 + $0x48] sm:$0xff] %vm702_vm9, %v697_v30  ;;  %888 = vrot.lane.b32.xlu1 %v869_v32, %s6757_s20 }
 0x1c8   :  { %844 = vrot.lane.b32.xlu0 %v825_v33, %s6758_s21  ;;  %711 = vst.msk [vmem:[#allocation5 + $0x40] sm:$0xff] %vm702_vm9, %v696_v31 }
 0x1cc   :  { %758 = vrot.lane.b32.xlu0 %v738_v34, %s6750_s23 }
 0x1ce   :  { %v910_v36 = vld [vmem:[#allocation5 + $0x48] sm:$0xff] }
 0x1cf   :  { %v922_v37 = vld [vmem:[#allocation5 + $0x39] sm:$0xff]  ;;  %917 = vst.msk [vmem:[#allocation3 + $0x44] sm:$0xff] %vm702_vm9, %v910_v36  ;;  %v923_v50 = vld [vmem:[#allocation5 + $0x41] sm:$0xff] }
 0x1d0   :  { %802 = vrot.lane.b32.xlu0 %v782_v35, %s6752_s11  ;;  %936 = vrot.lane.b32.xlu1 %v922_v37, %s6750_s23  ;;  %v909_v39 = vld [vmem:[#allocation5 + $0x40] sm:$0xff] }
 0x1d1   :  { %916 = vst.msk [vmem:[#allocation3 + $0x3c] sm:$0xff] %vm702_vm9, %v909_v39  ;;  %v964_v44 = vld [vmem:[#allocation5 + $0x3a] sm:$0xff]  ;;  %v1007_v52 = vld [vmem:[#allocation5 + $0x43] sm:$0xff] }
 0x1d2   :  { %v5964_v40 = vpop.f32.mrb[10].mxu0  ;;  %v1006_v49 = vld [vmem:[#allocation5 + $0x3b] sm:$0xff]  ;;  %v1049_v60 = vld [vmem:[#allocation5 + $0x44] sm:$0xff] }
 0x1d3   :  { %v675_v42 = vadd.f32 %v5964_v40, %v7197_v20  ;;  %v669_v43 = vpop.f32.mrb[11].mxu0  ;;  %v1048_v51 = vld [vmem:[#allocation5 + $0x3c] sm:$0xff] }
 0x1d4   :  { %846 = vrot.lane.b32.xlu0 %v826_v41, %s6758_s21  ;;  %v670_v45 = vadd.f32 %v7197_v20, %v669_v43  ;;  %978 = vrot.lane.b32.xlu1 %v964_v44, %s6752_s11  ;;  %v965_v54 = vld [vmem:[#allocation5 + $0x42] sm:$0xff] }
 0x1d5   :  { %v699_v46 = vmax.f32 %v675_v42, 0.0 }
 0x1d6   :  { %v698_v47 = vmax.f32 %v670_v45, 0.0 }
 0x1d7   :  { %714 = vst.msk [vmem:[#allocation5 + $0x58] sm:$0xff] %vm702_vm9, %v699_v46 }
 0x1d8   :  { %890 = vrot.lane.b32.xlu0 %v870_v48, %s6757_s20  ;;  %713 = vst.msk [vmem:[#allocation5 + $0x50] sm:$0xff] %vm702_vm9, %v698_v47  ;;  %1020 = vrot.lane.b32.xlu1 %v1006_v49, %s6758_s21 }
 0x1dc   :  { %938 = vrot.lane.b32.xlu0 %v923_v50, %s6750_s23  ;;  %1062 = vrot.lane.b32.xlu1 %v1048_v51, %s6757_s20 }
 0x1de   :  { %v912_v53 = vld [vmem:[#allocation5 + $0x58] sm:$0xff] }
 0x1df   :  { %919 = vst.msk [vmem:[#allocation3 + $0x54] sm:$0xff] %vm702_vm9, %v912_v53  ;;  %v911_v55 = vld [vmem:[#allocation5 + $0x50] sm:$0xff] }
 0x1e0   :  { %1022 = vrot.lane.b32.xlu0 %v1007_v52, %s6758_s21  ;;  %980 = vrot.lane.b32.xlu1 %v965_v54, %s6752_s11  ;;  %v924_v57 = vld [vmem:[#allocation5 + $0x49] sm:$0xff]  ;;  %918 = vst.msk [vmem:[#allocation3 + $0x4c] sm:$0xff] %vm702_vm9, %v911_v55  ;;  %v925_v2 = vld [vmem:[#allocation5 + $0x51] sm:$0xff] }
 0x1e1   :  { %v1008_v0 = vld [vmem:[#allocation5 + $0x4b] sm:$0xff]  ;;  %v1051_v8 = vld [vmem:[#allocation5 + $0x54] sm:$0xff] }
 0x1e2   :  { %v5967_v56 = vpop.f32.mrb[12].mxu0  ;;  %v966_v1 = vld [vmem:[#allocation5 + $0x4a] sm:$0xff]  ;;  %v967_v4 = vld [vmem:[#allocation5 + $0x52] sm:$0xff] }
 0x1e3   :  { %v685_v58 = vadd.f32 %v5967_v56, %v7197_v20  ;;  %v679_v59 = vpop.f32.mrb[13].mxu0  ;;  %v1050_v3 = vld [vmem:[#allocation5 + $0x4c] sm:$0xff] }
 0x1e4   :  { %940 = vrot.lane.b32.xlu0 %v924_v57, %s6750_s23  ;;  %v680_v61 = vadd.f32 %v7197_v20, %v679_v59  ;;  %1064 = vrot.lane.b32.xlu1 %v1049_v60, %s6757_s20  ;;  %v1009_v20 = vld [vmem:[#allocation5 + $0x53] sm:$0xff] }
 0x1e5   :  { %v701_v62 = vmax.f32 %v685_v58, 0.0 }
 0x1e6   :  { %v700_v63 = vmax.f32 %v680_v61, 0.0 }
 0x1e7   :  { %716 = vst.msk [vmem:[#allocation5 + $0x68] sm:$0xff] %vm702_vm9, %v701_v62 }
 0x1e8   :  { %1024 = vrot.lane.b32.xlu0 %v1008_v0, %s6758_s21  ;;  %715 = vst.msk [vmem:[#allocation5 + $0x60] sm:$0xff] %vm702_vm9, %v700_v63  ;;  %982 = vrot.lane.b32.xlu1 %v966_v1, %s6752_s11 }
 0x1ec   :  { %942 = vrot.lane.b32.xlu0 %v925_v2, %s6750_s23  ;;  %1066 = vrot.lane.b32.xlu1 %v1050_v3, %s6757_s20 }
 0x1ee   :  { %v914_v6 = vld [vmem:[#allocation5 + $0x68] sm:$0xf]  ;;  %v1054_v25 = vld [vmem:[#allocation5 + $0x6c] sm:$0xf] }
 0x1ef   :  { %v926_v5 = vld [vmem:[#allocation5 + $0x59] sm:$0xff]  ;;  %921 = vst.msk [vmem:[#allocation3 + $0x64] sm:$0xf] %vm730_vm13, %v914_v6  ;;  %v928_v11 = vld [vmem:[#allocation5 + $0x69] sm:$0xf]  ;;  %v927_v13 = vld [vmem:[#allocation5 + $0x61] sm:$0xff] }
 0x1f0   :  { %1026 = vrot.lane.b32.xlu0 %v1009_v20, %s6758_s21  ;;  %984 = vrot.lane.b32.xlu1 %v967_v4, %s6752_s11  ;;  %v913_v7 = vld [vmem:[#allocation5 + $0x60] sm:$0xff]  ;;  %v970_v14 = vld [vmem:[#allocation5 + $0x6a] sm:$0xf]  ;;  %vm1640_vm13 = vcmask 982016  }
 0x1f1   :  { %920 = vst.msk [vmem:[#allocation3 + $0x5c] sm:$0xff] %vm702_vm9, %v913_v7  ;;  %v1010_v9 = vld [vmem:[#allocation5 + $0x5b] sm:$0xff]  ;;  %v1011_v15 = vld [vmem:[#allocation5 + $0x63] sm:$0xff]  ;;  %v1012_v21 = vld [vmem:[#allocation5 + $0x6b] sm:$0xf]  ;;  %vm1387_vm9 = vcmask 589184  }
 0x1f2   :  { %v968_v10 = vld [vmem:[#allocation5 + $0x5a] sm:$0xff]  ;;  %v969_v16 = vld [vmem:[#allocation5 + $0x62] sm:$0xff] }
 0x1f3   :  { %v1052_v12 = vld [vmem:[#allocation5 + $0x5c] sm:$0xff]  ;;  %v1053_v22 = vld [vmem:[#allocation5 + $0x64] sm:$0xff] }
 0x1f4   :  { %944 = vrot.lane.b32.xlu0 %v926_v5, %s6750_s23  ;;  %1068 = vrot.lane.b32.xlu1 %v1051_v8, %s6757_s20 }
 0x1f8   :  { %1028 = vrot.lane.b32.xlu0 %v1010_v9, %s6758_s21  ;;  %986 = vrot.lane.b32.xlu1 %v968_v10, %s6752_s11 }
 0x1fc   :  { %948 = vrot.lane.b32.xlu0 %v928_v11, %s6750_s23  ;;  %1070 = vrot.lane.b32.xlu1 %v1052_v12, %s6757_s20 }
 0x200   :  { %946 = vrot.lane.b32.xlu0 %v927_v13, %s6750_s23  ;;  %990 = vrot.lane.b32.xlu1 %v970_v14, %s6752_s11 }
 0x204   :  { %1030 = vrot.lane.b32.xlu0 %v1011_v15, %s6758_s21  ;;  %988 = vrot.lane.b32.xlu1 %v969_v16, %s6752_s11 }
 0x205   :  { %v791_v17 = vpop.permute.xlu1 %790 }
 0x206   :  { %v747_v18 = vpop.permute.xlu0 %746 }
 0x207   :  { %768 = vst.msk [vmem:[#allocation3] sm:$0xff] %vm767_vm14, %v747_v18 }
 0x208   :  { %1032 = vrot.lane.b32.xlu0 %v1012_v21, %s6758_s21  ;;  %812 = vst.msk [vmem:[#allocation3] sm:$0xff] %vm811_vm15, %v791_v17  ;;  %1072 = vrot.lane.b32.xlu1 %v1053_v22, %s6757_s20 }
 0x209   :  { %v879_v23 = vpop.permute.xlu1 %878 }
 0x20a   :  { %v835_v24 = vpop.permute.xlu0 %834 }
 0x20b   :  { %856 = vst.msk [vmem:[#allocation3] sm:$0xff] %vm855_vm0, %v835_v24 }
 0x20c   :  { %900 = vst.msk [vmem:[#allocation3] sm:$0xff] %vm899_vm1, %v879_v23  ;;  %1074 = vrot.lane.b32.xlu1 %v1054_v25, %s6757_s20 }
 0x212   :  { %v793_v26 = vpop.permute.xlu1 %792 }
 0x213   :  { %v749_v27 = vpop.permute.xlu0 %748  ;;  %v1090_v28 = vld [vmem:[#allocation3] sm:$0xff] }
 0x214   :  { %769 = vst.msk [vmem:[#allocation3 + $0x8] sm:$0xff] %vm767_vm14, %v749_v27  ;;  %5985 = vmatmul.mubr.msk.f32.vlgmr.msra.gmra.mrb[0].mxu1 %vm1107_vm2, %v1090_v28 }
 0x215   :  { %813 = vst.msk [vmem:[#allocation3 + $0x8] sm:$0xff] %vm811_vm15, %v793_v26  ;;  %5987 = vmatprep.mubr.msk.f32.mxu1 %vm6755_vm11, %v6756_v38 }
 0x216   :  { %v881_v29 = vpop.permute.xlu1 %880 }
 0x217   :  { %v837_v30 = vpop.permute.xlu0 %836 }
 0x218   :  { %857 = vst.msk [vmem:[#allocation3 + $0x8] sm:$0xff] %vm855_vm0, %v837_v30 }
 0x219   :  { %901 = vst.msk [vmem:[#allocation3 + $0x8] sm:$0xff] %vm899_vm1, %v881_v29  ;;  %v7423_v29 = vld [vmem:[%s8093_s1 + $0x68] ss:$0 sm:$0xff] }
 0x21a   :  { %v795_v31 = vpop.permute.xlu1 %794 }
 0x21b   :  { %v751_v32 = vpop.permute.xlu0 %750 }
 0x21c   :  { %770 = vst.msk [vmem:[#allocation3 + $0x10] sm:$0xff] %vm767_vm14, %v751_v32 }
 0x21d   :  { %814 = vst.msk [vmem:[#allocation3 + $0x10] sm:$0xff] %vm811_vm15, %v795_v31 }
 0x21e   :  { %v883_v33 = vpop.permute.xlu1 %882 }
 0x21f   :  { %v839_v34 = vpop.permute.xlu0 %838 }
 0x220   :  { %858 = vst.msk [vmem:[#allocation3 + $0x10] sm:$0xff] %vm855_vm0, %v839_v34  ;;  %v1091_v35 = vld [vmem:[#allocation3 + $0x8] sm:$0xff]  ;;  %v61_v34 = vld [vmem:[%s8093_s1 + $0x70] sm:$0xff] }
 0x221   :  { %902 = vst.msk [vmem:[#allocation3 + $0x10] sm:$0xff] %vm899_vm1, %v883_v33  ;;  %5988 = vmatmul.mubr.msk.f32.gmra.mrb[2].mxu1 %vm1107_vm2, %v1091_v35  ;;  %v62_v35 = vld [vmem:[%s8093_s1 + $0x78] sm:$0xff] }
 0x222   :  { %5990 = vmatprep.mubr.msk.f32.mxu1 %vm6755_vm11, %v6756_v38  ;;  %v797_v36 = vpop.permute.xlu1 %796 }
 0x223   :  { %v753_v37 = vpop.permute.xlu0 %752 }
 0x224   :  { %771 = vst.msk [vmem:[#allocation3 + $0x18] sm:$0xff] %vm767_vm14, %v753_v37  ;;  %v63_v37 = vld [vmem:[%s8093_s1 + $0x80] sm:$0xff] }
 0x225   :  { %815 = vst.msk [vmem:[#allocation3 + $0x18] sm:$0xff] %vm811_vm15, %v797_v36  ;;  %v6113_v36 = vpack.c.bf16 %v62_v35, %v61_v34 }
 0x226   :  { %v885_v39 = vpop.permute.xlu1 %884 }
 0x227   :  { %v841_v40 = vpop.permute.xlu0 %840  ;;  %6114 = vmatprep.subr.bf16.mxu0 %v6113_v36 }
 0x228   :  { %859 = vst.msk [vmem:[#allocation3 + $0x18] sm:$0xff] %vm855_vm0, %v841_v40  ;;  %v1092_v41 = vld [vmem:[#allocation3 + $0x10] sm:$0xff]  ;;  %6116 = vmatpush3.bf16.msra.mxu0 %v6113_v36 }
 0x229   :  { %903 = vst.msk [vmem:[#allocation3 + $0x18] sm:$0xff] %vm899_vm1, %v885_v39  ;;  %5991 = vmatmul.mubr.msk.f32.gmra.mrb[4].mxu1 %vm1107_vm2, %v1092_v41  ;;  %v64_v39 = vld [vmem:[%s8093_s1 + $0x88] sm:$0xff] }
 0x22a   :  { %5993 = vmatprep.mubr.msk.f32.mxu1 %vm6755_vm11, %v6756_v38  ;;  %v799_v42 = vpop.permute.xlu1 %798  ;;  %v6117_v40 = vpack.c.bf16 %v64_v39, %v63_v37 }
 0x22b   :  { %v755_v43 = vpop.permute.xlu0 %754 }
 0x22c   :  { %772 = vst.msk [vmem:[#allocation3 + $0x20] sm:$0xff] %vm767_vm14, %v755_v43  ;;  %6118 = vmatprep.subr.bf16.mxu0 %v6117_v40  ;;  %v65_v43 = vld [vmem:[%s8093_s1 + $0x90] sm:$0xff] }
 0x22d   :  { %816 = vst.msk [vmem:[#allocation3 + $0x20] sm:$0xff] %vm811_vm15, %v799_v42  ;;  %6120 = vmatpush3.bf16.msra.mxu0 %v6117_v40 }
 0x22e   :  { %v887_v44 = vpop.permute.xlu1 %886 }
 0x22f   :  { %v843_v45 = vpop.permute.xlu0 %842 }
 0x230   :  { %860 = vst.msk [vmem:[#allocation3 + $0x20] sm:$0xff] %vm855_vm0, %v843_v45  ;;  %v1093_v46 = vld [vmem:[#allocation3 + $0x18] sm:$0xff] }
 0x231   :  { %904 = vst.msk [vmem:[#allocation3 + $0x20] sm:$0xff] %vm899_vm1, %v887_v44  ;;  %5994 = vmatmul.mubr.msk.f32.gmra.mrb[6].mxu1 %vm1107_vm2, %v1093_v46  ;;  %v66_v44 = vld [vmem:[%s8093_s1 + $0x98] sm:$0xff] }
 0x232   :  { %5996 = vmatprep.mubr.msk.f32.mxu1 %vm6755_vm11, %v6756_v38 }
 0x235   :  { %v801_v47 = vpop.permute.xlu1 %800 }
 0x236   :  { %v757_v48 = vpop.permute.xlu0 %756 }
 0x237   :  { %773 = vst.msk [vmem:[#allocation3 + $0x28] sm:$0xff] %vm767_vm14, %v757_v48 }
 0x238   :  { %817 = vst.msk [vmem:[#allocation3 + $0x28] sm:$0xff] %vm811_vm15, %v801_v47  ;;  %v1094_v49 = vld [vmem:[#allocation3 + $0x20] sm:$0xff]  ;;  %v6121_v47 = vpack.c.bf16 %v66_v44, %v65_v43 }
 0x239   :  { %5997 = vmatmul.mubr.msk.f32.gmra.mrb[8].mxu1 %vm1107_vm2, %v1094_v49  ;;  %v889_v50 = vpop.permute.xlu1 %888  ;;  %v67_v49 = vld [vmem:[%s8093_s1 + $0xa0] sm:$0xff] }
 0x23a   :  { %v845_v51 = vpop.permute.xlu0 %844  ;;  %5999 = vmatprep.mubr.msk.f32.mxu1 %vm6755_vm11, %v6756_v38  ;;  %6122 = vmatprep.subr.bf16.mxu0 %v6121_v47 }
 0x23b   :  { %861 = vst.msk [vmem:[#allocation3 + $0x28] sm:$0xff] %vm855_vm0, %v845_v51  ;;  %6124 = vmatpush3.bf16.msra.mxu0 %v6121_v47 }
 0x23c   :  { %905 = vst.msk [vmem:[#allocation3 + $0x28] sm:$0xff] %vm899_vm1, %v889_v50  ;;  %v68_v50 = vld [vmem:[%s8093_s1 + $0xa8] sm:$0xff] }
 0x23d   :  { %v6125_v51 = vpack.c.bf16 %v68_v50, %v67_v49 }
 0x23e   :  { %v759_v52 = vpop.permute.xlu0 %758 }
 0x23f   :  { %775 = vst.msk [vmem:[#allocation3 + $0x30] sm:$0xf] %vm774_vm3, %v759_v52  ;;  %6126 = vmatprep.subr.bf16.mxu0 %v6125_v51 }
 0x240   :  { %6128 = vmatpush3.bf16.msra.mxu0 %v6125_v51 }
 0x242   :  { %v803_v53 = vpop.permute.xlu0 %802  ;;  %v937_v54 = vpop.permute.xlu1 %936 }
 0x243   :  { %819 = vst.msk [vmem:[#allocation3 + $0x30] sm:$0xf] %vm818_vm4, %v803_v53  ;;  %v1095_v55 = vld [vmem:[#allocation3 + $0x28] sm:$0xff]  ;;  %v69_v53 = vld [vmem:[%s8093_s1 + $0xb0] sm:$0xff] }
 0x244   :  { %957 = vst.msk [vmem:[#allocation3 + $0x34] sm:$0xff] %vm767_vm14, %v937_v54  ;;  %6000 = vmatmul.mubr.msk.f32.gmra.mrb[10].mxu1 %vm1107_vm2, %v1095_v55  ;;  %v70_v54 = vld [vmem:[%s8093_s1 + $0xb8] sm:$0xff] }
 0x245   :  { %6002 = vmatprep.mubr.msk.f32.mxu1 %vm6755_vm11, %v6756_v38 }
 0x246   :  { %v847_v56 = vpop.permute.xlu0 %846  ;;  %v979_v57 = vpop.permute.xlu1 %978 }
 0x247   :  { %863 = vst.msk [vmem:[#allocation3 + $0x30] sm:$0xf] %vm862_vm5, %v847_v56 }
 0x248   :  { %999 = vst.msk [vmem:[#allocation3 + $0x34] sm:$0xff] %vm811_vm15, %v979_v57  ;;  %v6129_v57 = vpack.c.bf16 %v70_v54, %v69_v53 }
 0x24a   :  { %v891_v58 = vpop.permute.xlu0 %890  ;;  %v1021_v59 = vpop.permute.xlu1 %1020  ;;  %6130 = vmatprep.subr.bf16.mxu0 %v6129_v57 }
 0x24b   :  { %907 = vst.msk [vmem:[#allocation3 + $0x30] sm:$0xf] %vm906_vm6, %v891_v58  ;;  %6132 = vmatpush3.bf16.msra.mxu0 %v6129_v57 }
 0x24c   :  { %1041 = vst.msk [vmem:[#allocation3 + $0x34] sm:$0xff] %vm855_vm0, %v1021_v59 }
 0x24e   :  { %v939_v60 = vpop.permute.xlu0 %938  ;;  %v1063_v61 = vpop.permute.xlu1 %1062 }
 0x24f   :  { %958 = vst.msk [vmem:[#allocation3 + $0x3c] sm:$0xff] %vm767_vm14, %v939_v60 }
 0x250   :  { %1083 = vst.msk [vmem:[#allocation3 + $0x34] sm:$0xff] %vm899_vm1, %v1063_v61  ;;  %v71_v61 = vld [vmem:[%s8093_s1 + $0xc0] sm:$0xff] }
 0x252   :  { %v1023_v62 = vpop.permute.xlu0 %1022  ;;  %v981_v63 = vpop.permute.xlu1 %980 }
 0x253   :  { %1000 = vst.msk [vmem:[#allocation3 + $0x3c] sm:$0xff] %vm811_vm15, %v981_v63 }
 0x254   :  { %1042 = vst.msk [vmem:[#allocation3 + $0x3c] sm:$0xff] %vm855_vm0, %v1023_v62  ;;  %v72_v62 = vld [vmem:[%s8093_s1 + $0xc8] sm:$0xff] }
 0x255   :  { %v6133_v63 = vpack.c.bf16 %v72_v62, %v71_v61 }
 0x256   :  { %v941_v0 = vpop.permute.xlu0 %940  ;;  %v1065_v1 = vpop.permute.xlu1 %1064 }
 0x257   :  { %959 = vst.msk [vmem:[#allocation3 + $0x44] sm:$0xff] %vm767_vm14, %v941_v0  ;;  %v1096_v2 = vld [vmem:[#allocation3 + $0x30] sm:$0xff]  ;;  %6134 = vmatprep.subr.bf16.mxu0 %v6133_v63 }
 0x258   :  { %1084 = vst.msk [vmem:[#allocation3 + $0x3c] sm:$0xff] %vm899_vm1, %v1065_v1  ;;  %6003 = vmatmul.mubr.msk.f32.gmra.mrb[12].mxu1 %vm1107_vm2, %v1096_v2  ;;  %6136 = vmatpush3.bf16.msra.mxu0 %v6133_v63 }
 0x259   :  { %6005 = vmatprep.mubr.msk.f32.mxu1 %vm6755_vm11, %v6756_v38 }
 0x25a   :  { %v1025_v3 = vpop.permute.xlu0 %1024  ;;  %v983_v20 = vpop.permute.xlu1 %982 }
 0x25b   :  { %1001 = vst.msk [vmem:[#allocation3 + $0x44] sm:$0xff] %vm811_vm15, %v983_v20  ;;  %v73_v20 = vld [vmem:[%s8093_s1 + $0xd0] sm:$0xff] }
 0x25c   :  { %1043 = vst.msk [vmem:[#allocation3 + $0x44] sm:$0xff] %vm855_vm0, %v1025_v3 }
 0x25e   :  { %v943_v4 = vpop.permute.xlu0 %942  ;;  %v1067_v5 = vpop.permute.xlu1 %1066 }
 0x25f   :  { %960 = vst.msk [vmem:[#allocation3 + $0x4c] sm:$0xff] %vm767_vm14, %v943_v4  ;;  %v1097_v6 = vld [vmem:[#allocation3 + $0x38] sm:$0xff]  ;;  %v74_v4 = vld [vmem:[%s8093_s1 + $0xd8] sm:$0xff] }
 0x260   :  { %1085 = vst.msk [vmem:[#allocation3 + $0x44] sm:$0xff] %vm899_vm1, %v1067_v5  ;;  %6006 = vmatmul.mubr.msk.f32.gmra.mrb[14].mxu1 %vm1107_vm2, %v1097_v6  ;;  %v6137_v5 = vpack.c.bf16 %v74_v4, %v73_v20 }
 0x261   :  { %6008 = vmatprep.mubr.msk.f32.mxu1 %vm6755_vm11, %v6756_v38 }
 0x262   :  { %v1027_v7 = vpop.permute.xlu0 %1026  ;;  %v985_v8 = vpop.permute.xlu1 %984  ;;  %6138 = vmatprep.subr.bf16.mxu0 %v6137_v5 }
 0x263   :  { %1002 = vst.msk [vmem:[#allocation3 + $0x4c] sm:$0xff] %vm811_vm15, %v985_v8  ;;  %6140 = vmatpush3.bf16.msra.mxu0 %v6137_v5 }
 0x264   :  { %1044 = vst.msk [vmem:[#allocation3 + $0x4c] sm:$0xff] %vm855_vm0, %v1027_v7 }
 0x266   :  { %v945_v9 = vpop.permute.xlu0 %944  ;;  %v1069_v10 = vpop.permute.xlu1 %1068 }
 0x267   :  { %961 = vst.msk [vmem:[#allocation3 + $0x54] sm:$0xff] %vm767_vm14, %v945_v9  ;;  %v1098_v11 = vld [vmem:[#allocation3 + $0x40] sm:$0xff] }
 0x268   :  { %1086 = vst.msk [vmem:[#allocation3 + $0x4c] sm:$0xff] %vm899_vm1, %v1069_v10  ;;  %6009 = vmatmul.mubr.msk.f32.gmra.mrb[16].mxu1 %vm1107_vm2, %v1098_v11  ;;  %v75_v10 = vld [vmem:[%s8093_s1 + $0xe0] sm:$0xff] }
 0x269   :  { %6011 = vmatprep.mubr.msk.f32.mxu1 %vm6755_vm11, %v6756_v38  ;;  %6051 = vmatprep.subr.mxu0 %v75_v10 }
 0x26a   :  { %v1029_v12 = vpop.permute.xlu0 %1028  ;;  %v987_v13 = vpop.permute.xlu1 %986  ;;  %6052 = vmatpush3.msra.mxu0 %v75_v10 }
 0x26b   :  { %1003 = vst.msk [vmem:[#allocation3 + $0x54] sm:$0xff] %vm811_vm15, %v987_v13 }
 0x26c   :  { %1045 = vst.msk [vmem:[#allocation3 + $0x54] sm:$0xff] %vm855_vm0, %v1029_v12 }
 0x26e   :  { %v949_v14 = vpop.permute.xlu0 %948  ;;  %v1071_v15 = vpop.permute.xlu1 %1070 }
 0x26f   :  { %963 = vst.msk [vmem:[#allocation3 + $0x64] sm:$0xf] %vm774_vm3, %v949_v14  ;;  %v1099_v16 = vld [vmem:[#allocation3 + $0x48] sm:$0xff]  ;;  %vm1842_vm3 = vcmask 778624  }
 0x270   :  { %1087 = vst.msk [vmem:[#allocation3 + $0x54] sm:$0xff] %vm899_vm1, %v1071_v15  ;;  %6012 = vmatmul.mubr.msk.f32.gmra.mrb[18].mxu1 %vm1107_vm2, %v1099_v16 }
 0x271   :  { %6014 = vmatprep.mubr.msk.f32.mxu1 %vm6755_vm11, %v6756_v38 }
 0x272   :  { %v947_v17 = vpop.permute.xlu0 %946  ;;  %v991_v18 = vpop.permute.xlu1 %990 }
 0x273   :  { %962 = vst.msk [vmem:[#allocation3 + $0x5c] sm:$0xff] %vm767_vm14, %v947_v17  ;;  %vm1814_vm14 = vcmask 392192  }
 0x274   :  { %1005 = vst.msk [vmem:[#allocation3 + $0x64] sm:$0xf] %vm818_vm4, %v991_v18 }
 0x276   :  { %v1031_v21 = vpop.permute.xlu0 %1030  ;;  %v989_v22 = vpop.permute.xlu1 %988 }
 0x277   :  { %v1100_v23 = vld [vmem:[#allocation3 + $0x50] sm:$0xff]  ;;  %1004 = vst.msk [vmem:[#allocation3 + $0x5c] sm:$0xff] %vm811_vm15, %v989_v22  ;;  %vm1828_vm15 = vcmask 385024  }
 0x278   :  { %6015 = vmatmul.mubr.msk.f32.gmra.mrb[20].mxu1 %vm1107_vm2, %v1100_v23  ;;  %1046 = vst.msk [vmem:[#allocation3 + $0x5c] sm:$0xff] %vm855_vm0, %v1031_v21  ;;  %vm1859_vm0 = vcmask 1041152  }
 0x279   :  { %6017 = vmatprep.mubr.msk.f32.mxu1 %vm6755_vm11, %v6756_v38 }
 0x27a   :  { %v1033_v24 = vpop.permute.xlu0 %1032  ;;  %v1073_v25 = vpop.permute.xlu1 %1072 }
 0x27b   :  { %1047 = vst.msk [vmem:[#allocation3 + $0x64] sm:$0xf] %vm862_vm5, %v1033_v24  ;;  %vm1875_vm5 = vcmask 516224  }
 0x27c   :  { %1088 = vst.msk [vmem:[#allocation3 + $0x5c] sm:$0xff] %vm899_vm1, %v1073_v25  ;;  %vm1860_vm1 = vcmask 124930  }
 0x27d   :  { %vm7697_vm4 = vmor %vm1860_vm1, %vm1859_vm0 }
 0x27e   :  { %v1075_v26 = vpop.permute.xlu1 %1074 }
 0x27f   :  { %1089 = vst.msk [vmem:[#allocation3 + $0x64] sm:$0xf] %vm906_vm6, %v1075_v26  ;;  %vm1906_vm6 = vcmask 1041280  }
 0x283   :  { %v1101_v27 = vld [vmem:[#allocation3 + $0x58] sm:$0xff] }
 0x284   :  { %6018 = vmatmul.mubr.msk.f32.gmra.mrb[22].mxu1 %vm1107_vm2, %v1101_v27 }
 0x285   :  { %6020 = vmatprep.mubr.msk.f32.mxu1 %vm6755_vm11, %v6756_v38 }
 0x286   :  { %v1102_v28 = vld [vmem:[#allocation3 + $0x60] sm:$0xff] }
 0x288   :  { %6021 = vmatmul.mubr.msk.f32.gmra.mrb[24].mxu1 %vm1107_vm2, %v1102_v28  ;;  %vm1856_vm2 = vcmask 785408  }
 0x2e7   :  { %v1217_v30 = vpop.f32.mrb[0].mxu1 }
 0x2e8   :  { %v1218_v31 = vadd.f32 %v7423_v29, %v1217_v30  ;;  %v5986_v32 = vpop.f32.mrb[1].mxu1 }
 0x2ea   :  { %v1281_v33 = vmax.f32 %v1218_v31, 0.0 }
 0x2ec   :  { %1295 = vst.msk [vmem:[#allocation6] sm:$0xff] %vm1294_vm7, %v1281_v33 }
 0x2f3   :  { %v1308_v41 = vld [vmem:[#allocation6] sm:$0xff] }
 0x2f4   :  { %v1222_v42 = vpop.f32.mrb[2].mxu1  ;;  %1314 = vst.msk [vmem:[#allocation4] sm:$0xff] %vm1294_vm7, %v1308_v41 }
 0x2f5   :  { %v1223_v45 = vadd.f32 %v7423_v29, %v1222_v42  ;;  %v5989_v46 = vpop.f32.mrb[3].mxu1 }
 0x2f7   :  { %v1282_v48 = vmax.f32 %v1223_v45, 0.0 }
 0x2f9   :  { %1296 = vst.msk [vmem:[#allocation6 + $0x8] sm:$0xff] %vm1294_vm7, %v1282_v48 }
 0x2fc   :  { %v1227_v52 = vpop.f32.mrb[4].mxu1 }
 0x2fd   :  { %v1228_v55 = vadd.f32 %v7423_v29, %v1227_v52  ;;  %v5992_v56 = vpop.f32.mrb[5].mxu1 }
 0x2ff   :  { %v1283_v58 = vmax.f32 %v1228_v55, 0.0 }
 0x300   :  { %v1320_v59 = vld [vmem:[#allocation6 + $0x1] sm:$0xff] }
 0x301   :  { %1297 = vst.msk [vmem:[#allocation6 + $0x10] sm:$0xff] %vm1294_vm7, %v1283_v58  ;;  %1332 = vrot.lane.b32.xlu0 %v1320_v59, %s6752_s11  ;;  %v1309_v60 = vld [vmem:[#allocation6 + $0x8] sm:$0xff] }
 0x302   :  { %1315 = vst.msk [vmem:[#allocation4 + $0x8] sm:$0xff] %vm1294_vm7, %v1309_v60  ;;  %v1357_v1 = vld [vmem:[#allocation6 + $0x2] sm:$0xff] }
 0x303   :  { %v1394_v7 = vld [vmem:[#allocation6 + $0x3] sm:$0xff] }
 0x304   :  { %v1232_v0 = vpop.f32.mrb[6].mxu1  ;;  %v1431_v12 = vld [vmem:[#allocation6 + $0x4] sm:$0xff] }
 0x305   :  { %v1233_v2 = vadd.f32 %v7423_v29, %v1232_v0  ;;  %1369 = vrot.lane.b32.xlu0 %v1357_v1, %s6757_s20  ;;  %v5995_v3 = vpop.f32.mrb[7].mxu1 }
 0x307   :  { %v1284_v6 = vmax.f32 %v1233_v2, 0.0 }
 0x308   :  { %v1321_v8 = vld [vmem:[#allocation6 + $0x9] sm:$0xff] }
 0x309   :  { %1298 = vst.msk [vmem:[#allocation6 + $0x18] sm:$0xff] %vm1294_vm7, %v1284_v6  ;;  %1406 = vrot.lane.b32.xlu0 %v1394_v7, %s6759_s26  ;;  %1334 = vrot.lane.b32.xlu1 %v1321_v8, %s6752_s11  ;;  %v1310_v9 = vld [vmem:[#allocation6 + $0x10] sm:$0xff] }
 0x30a   :  { %1316 = vst.msk [vmem:[#allocation4 + $0x10] sm:$0xff] %vm1294_vm7, %v1310_v9  ;;  %v1358_v13 = vld [vmem:[#allocation6 + $0xa] sm:$0xff] }
 0x30b   :  { %v1432_v17 = vld [vmem:[#allocation6 + $0xc] sm:$0xff] }
 0x30c   :  { %v1237_v11 = vpop.f32.mrb[8].mxu1  ;;  %v1395_v18 = vld [vmem:[#allocation6 + $0xb] sm:$0xff] }
 0x30d   :  { %v1238_v14 = vadd.f32 %v7423_v29, %v1237_v11  ;;  %1443 = vrot.lane.b32.xlu0 %v1431_v12, %s6760_s0  ;;  %1371 = vrot.lane.b32.xlu1 %v1358_v13, %s6757_s20  ;;  %v5998_v15 = vpop.f32.mrb[9].mxu1 }
 0x30f   :  { %v1285_v16 = vmax.f32 %v1238_v14, 0.0 }
 0x310   :  { %v1311_v21 = vld [vmem:[#allocation6 + $0x18] sm:$0xff] }
 0x311   :  { %1299 = vst.msk [vmem:[#allocation6 + $0x20] sm:$0xff] %vm1294_vm7, %v1285_v16  ;;  %1445 = vrot.lane.b32.xlu0 %v1432_v17, %s6760_s0  ;;  %1408 = vrot.lane.b32.xlu1 %v1395_v18, %s6759_s26  ;;  %1317 = vst.msk [vmem:[#allocation4 + $0x18] sm:$0xff] %vm1294_vm7, %v1311_v21  ;;  %v1359_v22 = vld [vmem:[#allocation6 + $0x12] sm:$0xff] }
 0x312   :  { %v1322_v23 = vld [vmem:[#allocation6 + $0x11] sm:$0xff] }
 0x313   :  { %v1396_v27 = vld [vmem:[#allocation6 + $0x13] sm:$0xff] }
 0x314   :  { %v1433_v32 = vld [vmem:[#allocation6 + $0x14] sm:$0xff] }
 0x315   :  { %1373 = vrot.lane.b32.xlu0 %v1359_v22, %s6757_s20  ;;  %1336 = vrot.lane.b32.xlu1 %v1322_v23, %s6752_s11 }
 0x317   :  { %v1242_v24 = vpop.f32.mrb[10].mxu1 }
 0x318   :  { %v1243_v25 = vadd.f32 %v7423_v29, %v1242_v24  ;;  %v6001_v26 = vpop.f32.mrb[11].mxu1  ;;  %v1323_v28 = vld [vmem:[#allocation6 + $0x19] sm:$0xff] }
 0x319   :  { %1410 = vrot.lane.b32.xlu0 %v1396_v27, %s6759_s26  ;;  %1338 = vrot.lane.b32.xlu1 %v1323_v28, %s6752_s11  ;;  %v1312_v30 = vld [vmem:[#allocation6 + $0x20] sm:$0xff] }
 0x31a   :  { %v1286_v31 = vmax.f32 %v1243_v25, 0.0  ;;  %1318 = vst.msk [vmem:[#allocation4 + $0x20] sm:$0xff] %vm1294_vm7, %v1312_v30  ;;  %v1360_v33 = vld [vmem:[#allocation6 + $0x1a] sm:$0xff] }
 0x31b   :  { %v1434_v34 = vld [vmem:[#allocation6 + $0x1c] sm:$0xff] }
 0x31c   :  { %1300 = vst.msk [vmem:[#allocation6 + $0x28] sm:$0xff] %vm1294_vm7, %v1286_v31  ;;  %v1397_v35 = vld [vmem:[#allocation6 + $0x1b] sm:$0xff] }
 0x31d   :  { %1447 = vrot.lane.b32.xlu0 %v1433_v32, %s6760_s0  ;;  %1375 = vrot.lane.b32.xlu1 %v1360_v33, %s6757_s20 }
 0x321   :  { %1449 = vrot.lane.b32.xlu0 %v1434_v34, %s6760_s0  ;;  %1412 = vrot.lane.b32.xlu1 %v1397_v35, %s6759_s26 }
 0x323   :  { %v1361_v36 = vld [vmem:[#allocation6 + $0x22] sm:$0xff] }
 0x324   :  { %v1324_v37 = vld [vmem:[#allocation6 + $0x21] sm:$0xff] }
 0x325   :  { %v1313_v39 = vld [vmem:[#allocation6 + $0x28] sm:$0xff]  ;;  %1377 = vrot.lane.b32.xlu0 %v1361_v36, %s6757_s20  ;;  %1340 = vrot.lane.b32.xlu1 %v1324_v37, %s6752_s11 }
 0x326   :  { %1319 = vst.msk [vmem:[#allocation4 + $0x28] sm:$0xff] %vm1294_vm7, %v1313_v39  ;;  %v1398_v40 = vld [vmem:[#allocation6 + $0x23] sm:$0xff] }
 0x327   :  { %v1435_v44 = vld [vmem:[#allocation6 + $0x24] sm:$0xff] }
 0x329   :  { %1414 = vrot.lane.b32.xlu0 %v1398_v40, %s6759_s26 }
 0x32b   :  { %v1247_v41 = vpop.f32.mrb[12].mxu1 }
 0x32c   :  { %v1248_v42 = vadd.f32 %v7423_v29, %v1247_v41  ;;  %v6004_v43 = vpop.f32.mrb[13].mxu1 }
 0x32d   :  { %1451 = vrot.lane.b32.xlu0 %v1435_v44, %s6760_s0 }
 0x32e   :  { %v1287_v45 = vmax.f32 %v1248_v42, 0.0 }
 0x330   :  { %1301 = vst.msk [vmem:[#allocation6 + $0x30] sm:$0xff] %vm1294_vm7, %v1287_v45 }
 0x333   :  { %v1252_v46 = vpop.f32.mrb[14].mxu1 }
 0x334   :  { %v1253_v47 = vadd.f32 %v7423_v29, %v1252_v46  ;;  %v6007_v48 = vpop.f32.mrb[15].mxu1 }
 0x336   :  { %v1288_v49 = vmax.f32 %v1253_v47, 0.0 }
 0x337   :  { %v1325_v50 = vld [vmem:[#allocation6 + $0x29] sm:$0xff] }
 0x338   :  { %1302 = vst.msk [vmem:[#allocation6 + $0x38] sm:$0xff] %vm1294_vm7, %v1288_v49  ;;  %1342 = vrot.lane.b32.xlu1 %v1325_v50, %s6752_s11  ;;  %v1362_v52 = vld [vmem:[#allocation6 + $0x2a] sm:$0xff] }
 0x339   :  { %v1399_v56 = vld [vmem:[#allocation6 + $0x2b] sm:$0xff] }
 0x33a   :  { %v1436_v60 = vld [vmem:[#allocation6 + $0x2c] sm:$0xff] }
 0x33b   :  { %v1257_v51 = vpop.f32.mrb[16].mxu1 }
 0x33c   :  { %v1258_v53 = vadd.f32 %v7423_v29, %v1257_v51  ;;  %1379 = vrot.lane.b32.xlu1 %v1362_v52, %s6757_s20  ;;  %v6010_v54 = vpop.f32.mrb[17].mxu1 }
 0x33e   :  { %v1289_v55 = vmax.f32 %v1258_v53, 0.0 }
 0x33f   :  { %v1480_v57 = vld [vmem:[#allocation6 + $0x35] sm:$0xff] }
 0x340   :  { %1303 = vst.msk [vmem:[#allocation6 + $0x40] sm:$0xff] %vm1294_vm7, %v1289_v55  ;;  %1416 = vrot.lane.b32.xlu1 %v1399_v56, %s6759_s26  ;;  %1492 = vrot.lane.b32.xlu0 %v1480_v57, %s6752_s11  ;;  %v1468_v58 = vld [vmem:[#allocation6 + $0x34] sm:$0xff] }
 0x341   :  { %1474 = vst.msk [vmem:[#allocation4 + $0x30] sm:$0xff] %vm1294_vm7, %v1468_v58  ;;  %v1516_v61 = vld [vmem:[#allocation6 + $0x36] sm:$0xff] }
 0x342   :  { %v1552_v1 = vld [vmem:[#allocation6 + $0x37] sm:$0xff] }
 0x343   :  { %v1262_v59 = vpop.f32.mrb[18].mxu1  ;;  %v1588_v4 = vld [vmem:[#allocation6 + $0x38] sm:$0xff] }
 0x344   :  { %v1263_v62 = vadd.f32 %v7423_v29, %v1262_v59  ;;  %1453 = vrot.lane.b32.xlu1 %v1436_v60, %s6760_s0  ;;  %1528 = vrot.lane.b32.xlu0 %v1516_v61, %s6757_s20  ;;  %v6013_v63 = vpop.f32.mrb[19].mxu1 }
 0x346   :  { %v1290_v0 = vmax.f32 %v1263_v62, 0.0 }
 0x347   :  { %v1481_v2 = vld [vmem:[#allocation6 + $0x3d] sm:$0xff] }
 0x348   :  { %1304 = vst.msk [vmem:[#allocation6 + $0x48] sm:$0xff] %vm1294_vm7, %v1290_v0  ;;  %1564 = vrot.lane.b32.xlu0 %v1552_v1, %s6759_s26  ;;  %1494 = vrot.lane.b32.xlu1 %v1481_v2, %s6752_s11  ;;  %v1469_v3 = vld [vmem:[#allocation6 + $0x3c] sm:$0xff] }
 0x349   :  { %1475 = vst.msk [vmem:[#allocation4 + $0x38] sm:$0xff] %vm1294_vm7, %v1469_v3  ;;  %v1517_v5 = vld [vmem:[#allocation6 + $0x3e] sm:$0xff] }
 0x34a   :  { %v1589_v9 = vld [vmem:[#allocation6 + $0x40] sm:$0xff] }
 0x34b   :  { %v1267_v20 = vpop.f32.mrb[20].mxu1  ;;  %v1553_v10 = vld [vmem:[#allocation6 + $0x3f] sm:$0xff] }
 0x34c   :  { %v1268_v6 = vadd.f32 %v7423_v29, %v1267_v20  ;;  %1600 = vrot.lane.b32.xlu0 %v1588_v4, %s6760_s0  ;;  %1530 = vrot.lane.b32.xlu1 %v1517_v5, %s6757_s20  ;;  %v6016_v7 = vpop.f32.mrb[21].mxu1 }
 0x34e   :  { %v1291_v8 = vmax.f32 %v1268_v6, 0.0 }
 0x34f   :  { %v1470_v11 = vld [vmem:[#allocation6 + $0x44] sm:$0xff] }
 0x350   :  { %1305 = vst.msk [vmem:[#allocation6 + $0x50] sm:$0xff] %vm1294_vm7, %v1291_v8  ;;  %1602 = vrot.lane.b32.xlu0 %v1589_v9, %s6760_s0  ;;  %1566 = vrot.lane.b32.xlu1 %v1553_v10, %s6759_s26  ;;  %1476 = vst.msk [vmem:[#allocation4 + $0x40] sm:$0xff] %vm1294_vm7, %v1470_v11  ;;  %v1518_v12 = vld [vmem:[#allocation6 + $0x46] sm:$0xff] }
 0x351   :  { %v1482_v13 = vld [vmem:[#allocation6 + $0x45] sm:$0xff] }
 0x352   :  { %v1554_v15 = vld [vmem:[#allocation6 + $0x47] sm:$0xff] }
 0x353   :  { %v1590_v24 = vld [vmem:[#allocation6 + $0x48] sm:$0xff] }
 0x354   :  { %1532 = vrot.lane.b32.xlu0 %v1518_v12, %s6757_s20  ;;  %1496 = vrot.lane.b32.xlu1 %v1482_v13, %s6752_s11 }
 0x357   :  { %v1272_v14 = vpop.f32.mrb[22].mxu1  ;;  %v1483_v16 = vld [vmem:[#allocation6 + $0x4d] sm:$0xff] }
 0x358   :  { %v1273_v17 = vadd.f32 %v7423_v29, %v1272_v14  ;;  %1568 = vrot.lane.b32.xlu0 %v1554_v15, %s6759_s26  ;;  %1498 = vrot.lane.b32.xlu1 %v1483_v16, %s6752_s11  ;;  %v6019_v18 = vpop.f32.mrb[23].mxu1  ;;  %v1471_v21 = vld [vmem:[#allocation6 + $0x4c] sm:$0xff] }
 0x359   :  { %1477 = vst.msk [vmem:[#allocation4 + $0x48] sm:$0xff] %vm1294_vm7, %v1471_v21  ;;  %v1519_v25 = vld [vmem:[#allocation6 + $0x4e] sm:$0xff] }
 0x35a   :  { %v1292_v22 = vmax.f32 %v1273_v17, 0.0  ;;  %v1555_v30 = vld [vmem:[#allocation6 + $0x4f] sm:$0xff] }
 0x35b   :  { %v1277_v23 = vpop.f32.mrb[24].mxu1  ;;  %v1591_v31 = vld [vmem:[#allocation6 + $0x50] sm:$0xff] }
 0x35c   :  { %1306 = vst.msk [vmem:[#allocation6 + $0x58] sm:$0xff] %vm1294_vm7, %v1292_v22  ;;  %v1278_v26 = vadd.f32 %v7423_v29, %v1277_v23  ;;  %1604 = vrot.lane.b32.xlu0 %v1590_v24, %s6760_s0  ;;  %1534 = vrot.lane.b32.xlu1 %v1519_v25, %s6757_s20  ;;  %v6022_v27 = vpop.f32.mrb[25].mxu1 }
 0x35e   :  { %v1293_v28 = vmax.f32 %v1278_v26, 0.0 }
 0x360   :  { %1307 = vst.msk [vmem:[#allocation6 + $0x60] sm:$0xff] %vm1294_vm7, %v1293_v28  ;;  %1570 = vrot.lane.b32.xlu1 %v1555_v30, %s6759_s26 }
 0x363   :  { %v1484_v32 = vld [vmem:[#allocation6 + $0x55] sm:$0xff] }
 0x364   :  { %1606 = vrot.lane.b32.xlu1 %v1591_v31, %s6760_s0  ;;  %1500 = vrot.lane.b32.xlu0 %v1484_v32, %s6752_s11  ;;  %v1472_v33 = vld [vmem:[#allocation6 + $0x54] sm:$0xff] }
 0x365   :  { %1478 = vst.msk [vmem:[#allocation4 + $0x50] sm:$0xff] %vm1294_vm7, %v1472_v33  ;;  %v1520_v29 = vld [vmem:[#allocation6 + $0x56] sm:$0xff] }
 0x366   :  { %v1556_v36 = vld [vmem:[#allocation6 + $0x57] sm:$0xff] }
 0x367   :  { %v1485_v34 = vld [vmem:[#allocation6 + $0x5d] sm:$0xff] }
 0x368   :  { %1536 = vrot.lane.b32.xlu0 %v1520_v29, %s6757_s20  ;;  %1502 = vrot.lane.b32.xlu1 %v1485_v34, %s6752_s11  ;;  %v1473_v35 = vld [vmem:[#allocation6 + $0x5c] sm:$0xff] }
 0x369   :  { %1479 = vst.msk [vmem:[#allocation4 + $0x58] sm:$0xff] %vm1294_vm7, %v1473_v35  ;;  %v1521_v37 = vld [vmem:[#allocation6 + $0x5e] sm:$0xff]  ;;  %vm1907_vm7 = vcmask 256002  }
 0x36a   :  { %v1592_v39 = vld [vmem:[#allocation6 + $0x58] sm:$0xff]  ;;  %v1593_v42 = vld [vmem:[#allocation6 + $0x60] sm:$0xff] }
 0x36b   :  { %v1557_v40 = vld [vmem:[#allocation6 + $0x5f] sm:$0xff] }
 0x36c   :  { %1572 = vrot.lane.b32.xlu0 %v1556_v36, %s6759_s26  ;;  %1538 = vrot.lane.b32.xlu1 %v1521_v37, %s6757_s20 }
 0x370   :  { %1608 = vrot.lane.b32.xlu0 %v1592_v39, %s6760_s0  ;;  %1574 = vrot.lane.b32.xlu1 %v1557_v40, %s6759_s26  ;;  %v7619_v40 = vld [vmem:[%s8093_s1 + $0xe8] ss:$0 sm:$0xff]  ;;  %s6761_s1 = smov 112  }
 0x373   :  { %v1333_v41 = vpop.permute.xlu0 %1332 }
 0x374   :  { %1351 = vst.msk [vmem:[#allocation4] sm:$0xff] %vm1350_vm8, %v1333_v41  ;;  %1610 = vrot.lane.b32.xlu1 %v1593_v42, %s6760_s0 }
 0x377   :  { %v1370_v43 = vpop.permute.xlu0 %1369 }
 0x378   :  { %1388 = vst.msk [vmem:[#allocation4] sm:$0xff] %vm1387_vm9, %v1370_v43 }
 0x37b   :  { %v1407_v44 = vpop.permute.xlu0 %1406  ;;  %v1335_v45 = vpop.permute.xlu1 %1334 }
 0x37c   :  { %1425 = vst.msk [vmem:[#allocation4] sm:$0xff] %vm1424_vm10, %v1407_v44 }
 0x37d   :  { %1352 = vst.msk [vmem:[#allocation4 + $0x8] sm:$0xff] %vm1350_vm8, %v1335_v45 }
 0x37f   :  { %v1444_v46 = vpop.permute.xlu0 %1443  ;;  %v1372_v47 = vpop.permute.xlu1 %1371 }
 0x380   :  { %1462 = vst.msk [vmem:[#allocation4] sm:$0xff] %vm1461_vm12, %v1444_v46 }
 0x381   :  { %1389 = vst.msk [vmem:[#allocation4 + $0x8] sm:$0xff] %vm1387_vm9, %v1372_v47 }
 0x383   :  { %v1446_v48 = vpop.permute.xlu0 %1445  ;;  %v1409_v49 = vpop.permute.xlu1 %1408 }
 0x384   :  { %1426 = vst.msk [vmem:[#allocation4 + $0x8] sm:$0xff] %vm1424_vm10, %v1409_v49 }
 0x385   :  { %1463 = vst.msk [vmem:[#allocation4 + $0x8] sm:$0xff] %vm1461_vm12, %v1446_v48 }
 0x387   :  { %v1374_v50 = vpop.permute.xlu0 %1373  ;;  %v1337_v51 = vpop.permute.xlu1 %1336  ;;  %v1624_v52 = vld [vmem:[#allocation4] sm:$0xff] }
 0x388   :  { %1353 = vst.msk [vmem:[#allocation4 + $0x10] sm:$0xff] %vm1350_vm8, %v1337_v51  ;;  %6053 = vmatprep.mubr.msk.f32.mxu0 %vm1640_vm13, %v1624_v52 }
 0x389   :  { %1390 = vst.msk [vmem:[#allocation4 + $0x10] sm:$0xff] %vm1387_vm9, %v1374_v50 }
 0x38b   :  { %v1411_v53 = vpop.permute.xlu0 %1410  ;;  %v1339_v54 = vpop.permute.xlu1 %1338 }
 0x38c   :  { %1427 = vst.msk [vmem:[#allocation4 + $0x10] sm:$0xff] %vm1424_vm10, %v1411_v53  ;;  %v1625_v55 = vld [vmem:[#allocation4 + $0x8] sm:$0xff] }
 0x38d   :  { %1354 = vst.msk [vmem:[#allocation4 + $0x18] sm:$0xff] %vm1350_vm8, %v1339_v54  ;;  %6054 = vmatmul.mubr.msk.f32.vlgmr.msra.gmra.mrb[14].mxu0 %vm1640_vm13, %v1625_v55 }
 0x38f   :  { %v1448_v56 = vpop.permute.xlu0 %1447  ;;  %v1376_v57 = vpop.permute.xlu1 %1375 }
 0x390   :  { %1464 = vst.msk [vmem:[#allocation4 + $0x10] sm:$0xff] %vm1461_vm12, %v1448_v56 }
 0x391   :  { %1391 = vst.msk [vmem:[#allocation4 + $0x18] sm:$0xff] %vm1387_vm9, %v1376_v57 }
 0x393   :  { %v1450_v58 = vpop.permute.xlu0 %1449  ;;  %v1413_v59 = vpop.permute.xlu1 %1412 }
 0x394   :  { %1428 = vst.msk [vmem:[#allocation4 + $0x18] sm:$0xff] %vm1424_vm10, %v1413_v59 }
 0x395   :  { %1465 = vst.msk [vmem:[#allocation4 + $0x18] sm:$0xff] %vm1461_vm12, %v1450_v58 }
 0x397   :  { %v1378_v60 = vpop.permute.xlu0 %1377  ;;  %v1341_v61 = vpop.permute.xlu1 %1340  ;;  %v1626_v62 = vld [vmem:[#allocation4 + $0x10] sm:$0xff] }
 0x398   :  { %1355 = vst.msk [vmem:[#allocation4 + $0x20] sm:$0xff] %vm1350_vm8, %v1341_v61  ;;  %6056 = vmatprep.mubr.msk.f32.mxu0 %vm1640_vm13, %v1626_v62 }
 0x399   :  { %1392 = vst.msk [vmem:[#allocation4 + $0x20] sm:$0xff] %vm1387_vm9, %v1378_v60 }
 0x39b   :  { %v1415_v63 = vpop.permute.xlu0 %1414 }
 0x39c   :  { %1429 = vst.msk [vmem:[#allocation4 + $0x20] sm:$0xff] %vm1424_vm10, %v1415_v63  ;;  %v1627_v0 = vld [vmem:[#allocation4 + $0x18] sm:$0xff] }
 0x39d   :  { %6057 = vmatmul.mubr.msk.f32.gmra.mrb[16].mxu0 %vm1640_vm13, %v1627_v0 }
 0x39f   :  { %v1452_v1 = vpop.permute.xlu0 %1451 }
 0x3a0   :  { %1466 = vst.msk [vmem:[#allocation4 + $0x20] sm:$0xff] %vm1461_vm12, %v1452_v1 }
 0x3a7   :  { %v1628_v2 = vld [vmem:[#allocation4 + $0x20] sm:$0xff] }
 0x3a8   :  { %6059 = vmatprep.mubr.msk.f32.mxu0 %vm1640_vm13, %v1628_v2 }
 0x3aa   :  { %v1343_v3 = vpop.permute.xlu1 %1342 }
 0x3ab   :  { %1356 = vst.msk [vmem:[#allocation4 + $0x28] sm:$0xff] %vm1350_vm8, %v1343_v3 }
 0x3ae   :  { %v1380_v20 = vpop.permute.xlu1 %1379 }
 0x3af   :  { %1393 = vst.msk [vmem:[#allocation4 + $0x28] sm:$0xff] %vm1387_vm9, %v1380_v20 }
 0x3b2   :  { %v1417_v4 = vpop.permute.xlu1 %1416  ;;  %v1493_v5 = vpop.permute.xlu0 %1492 }
 0x3b3   :  { %1430 = vst.msk [vmem:[#allocation4 + $0x28] sm:$0xff] %vm1424_vm10, %v1417_v4 }
 0x3b4   :  { %1510 = vst.msk [vmem:[#allocation4 + $0x30] sm:$0xff] %vm1350_vm8, %v1493_v5 }
 0x3b6   :  { %v1454_v6 = vpop.permute.xlu1 %1453  ;;  %v1529_v7 = vpop.permute.xlu0 %1528 }
 0x3b7   :  { %1467 = vst.msk [vmem:[#allocation4 + $0x28] sm:$0xff] %vm1461_vm12, %v1454_v6 }
 0x3b8   :  { %1546 = vst.msk [vmem:[#allocation4 + $0x30] sm:$0xff] %vm1387_vm9, %v1529_v7 }
 0x3ba   :  { %v1565_v8 = vpop.permute.xlu0 %1564  ;;  %v1495_v9 = vpop.permute.xlu1 %1494 }
 0x3bb   :  { %1582 = vst.msk [vmem:[#allocation4 + $0x30] sm:$0xff] %vm1424_vm10, %v1565_v8 }
 0x3bc   :  { %1511 = vst.msk [vmem:[#allocation4 + $0x38] sm:$0xff] %vm1350_vm8, %v1495_v9 }
 0x3be   :  { %v1601_v10 = vpop.permute.xlu0 %1600  ;;  %v1531_v11 = vpop.permute.xlu1 %1530  ;;  %v1629_v12 = vld [vmem:[#allocation4 + $0x28] sm:$0xff] }
 0x3bf   :  { %1618 = vst.msk [vmem:[#allocation4 + $0x30] sm:$0xff] %vm1461_vm12, %v1601_v10  ;;  %6060 = vmatmul.mubr.msk.f32.gmra.mrb[18].mxu0 %vm1640_vm13, %v1629_v12  ;;  %v6240_v12 = vld [vmem:[#allocation9 + $0x400] ss:$8 sps:$4 sm:$0xff]  }
 0x3c0   :  { %1547 = vst.msk [vmem:[#allocation4 + $0x38] sm:$0xff] %vm1387_vm9, %v1531_v11 }
 0x3c2   :  { %v1603_v13 = vpop.permute.xlu0 %1602  ;;  %v1567_v14 = vpop.permute.xlu1 %1566 }
 0x3c3   :  { %1583 = vst.msk [vmem:[#allocation4 + $0x38] sm:$0xff] %vm1424_vm10, %v1567_v14  ;;  %v6243_v14 = vld [vmem:[#allocation9 + $0x410] ss:$8 sps:$4 sm:$0xff]  }
 0x3c4   :  { %1619 = vst.msk [vmem:[#allocation4 + $0x38] sm:$0xff] %vm1461_vm12, %v1603_v13  ;;  %v6242_v13 = vld [vmem:[#allocation9 + $0x404] ss:$8 sps:$4 sm:$0xff]  }
 0x3c5   :  { %5031 = vmatprep.subr.bf16.mxu1 %v6242_v13  ;;  %v6285_v13 = vld [vmem:[#allocation9 + $0x30] ss:$8 sps:$4 sm:$0xff]  }
 0x3c6   :  { %v1533_v15 = vpop.permute.xlu0 %1532  ;;  %v1497_v16 = vpop.permute.xlu1 %1496  ;;  %v1630_v17 = vld [vmem:[#allocation4 + $0x30] sm:$0xff]  ;;  %5032 = vmatpush1.bf16.msra.mxu1 %v6240_v12 }
 0x3c7   :  { %1512 = vst.msk [vmem:[#allocation4 + $0x40] sm:$0xff] %vm1350_vm8, %v1497_v16  ;;  %6062 = vmatprep.mubr.msk.f32.mxu0 %vm1640_vm13, %v1630_v17  ;;  %v6287_v12 = vld [vmem:[#allocation9 + $0x34] ss:$8 sps:$4 sm:$0xff]  }
 0x3c8   :  { %1548 = vst.msk [vmem:[#allocation4 + $0x40] sm:$0xff] %vm1387_vm9, %v1533_v15  ;;  %v6245_v15 = vld [vmem:[#allocation9 + $0x414] ss:$8 sps:$4 sm:$0xff]  }
 0x3c9   :  { %5033 = vmatprep.subr.bf16.mxu1 %v6245_v15 }
 0x3ca   :  { %v1569_v18 = vpop.permute.xlu0 %1568  ;;  %v1499_v21 = vpop.permute.xlu1 %1498  ;;  %5034 = vmatpush1.bf16.msra.mxu1 %v6243_v14  ;;  %v6290_v14 = vld [vmem:[#allocation9 + $0x4c4] ss:$8 sps:$4 sm:$0xff]  }
 0x3cb   :  { %1584 = vst.msk [vmem:[#allocation4 + $0x40] sm:$0xff] %vm1424_vm10, %v1569_v18  ;;  %v1631_v22 = vld [vmem:[#allocation4 + $0x38] sm:$0xff] }
 0x3cc   :  { %1513 = vst.msk [vmem:[#allocation4 + $0x48] sm:$0xff] %vm1350_vm8, %v1499_v21  ;;  %6063 = vmatmul.mubr.msk.f32.gmra.mrb[20].mxu0 %vm1640_vm13, %v1631_v22 }
 0x3ce   :  { %v1605_v23 = vpop.permute.xlu0 %1604  ;;  %v1535_v24 = vpop.permute.xlu1 %1534 }
 0x3cf   :  { %1620 = vst.msk [vmem:[#allocation4 + $0x40] sm:$0xff] %vm1461_vm12, %v1605_v23 }
 0x3d0   :  { %1549 = vst.msk [vmem:[#allocation4 + $0x48] sm:$0xff] %vm1387_vm9, %v1535_v24 }
 0x3d2   :  { %v1571_v25 = vpop.permute.xlu1 %1570 }
 0x3d3   :  { %1585 = vst.msk [vmem:[#allocation4 + $0x48] sm:$0xff] %vm1424_vm10, %v1571_v25  ;;  %v6246_v25 = vld [vmem:[#allocation9 + $0x420] ss:$8 sps:$4 sm:$0xff]  }
 0x3d6   :  { %v1607_v26 = vpop.permute.xlu1 %1606  ;;  %v1501_v27 = vpop.permute.xlu0 %1500  ;;  %v1632_v28 = vld [vmem:[#allocation4 + $0x40] sm:$0xff] }
 0x3d7   :  { %1621 = vst.msk [vmem:[#allocation4 + $0x48] sm:$0xff] %vm1461_vm12, %v1607_v26  ;;  %6065 = vmatprep.mubr.msk.f32.mxu0 %vm1640_vm13, %v1632_v28  ;;  %v6248_v26 = vld [vmem:[#allocation9 + $0x424] ss:$8 sps:$4 sm:$0xff]   ;;  %v6249_v28 = vld [vmem:[#allocation9 + $0x430] ss:$8 sps:$4 sm:$0xff]  }
 0x3d8   :  { %1514 = vst.msk [vmem:[#allocation4 + $0x50] sm:$0xff] %vm1350_vm8, %v1501_v27  ;;  %5035 = vmatprep.subr.bf16.mxu1 %v6248_v26  ;;  %v6251_v27 = vld [vmem:[#allocation9 + $0x434] ss:$8 sps:$4 sm:$0xff]   ;;  %v6294_v26 = vld [vmem:[#allocation9 + $0x4d0] ss:$8 sps:$4 sm:$0xff]  }
 0x3d9   :  { %5036 = vmatpush1.bf16.msra.mxu1 %v6246_v25 }
 0x3da   :  { %v1537_v30 = vpop.permute.xlu0 %1536  ;;  %v1503_v31 = vpop.permute.xlu1 %1502  ;;  %5037 = vmatprep.subr.bf16.mxu1 %v6251_v27  ;;  %v6302_v27 = vld [vmem:[#allocation9 + $0x4e4] ss:$8 sps:$4 sm:$0xff]  }
 0x3db   :  { %1550 = vst.msk [vmem:[#allocation4 + $0x50] sm:$0xff] %vm1387_vm9, %v1537_v30 }
 0x3dc   :  { %1515 = vst.msk [vmem:[#allocation4 + $0x58] sm:$0xff] %vm1350_vm8, %v1503_v31  ;;  %v6254_v31 = vld [vmem:[#allocation9 + $0x444] ss:$8 sps:$4 sm:$0xff]   ;;  %vm1903_vm8 = vcmask 916480  }
 0x3dd   :  { %5038 = vmatpush1.bf16.msra.mxu1 %v6249_v28  ;;  %v6297_v28 = vld [vmem:[#allocation9 + $0x50] ss:$8 sps:$4 sm:$0xff]  }
 0x3de   :  { %v1573_v32 = vpop.permute.xlu0 %1572  ;;  %v1539_v33 = vpop.permute.xlu1 %1538  ;;  %v1633_v29 = vld [vmem:[#allocation4 + $0x48] sm:$0xff]  ;;  %5039 = vmatprep.subr.bf16.mxu1 %v6254_v31 }
 0x3df   :  { %1586 = vst.msk [vmem:[#allocation4 + $0x50] sm:$0xff] %vm1424_vm10, %v1573_v32  ;;  %6066 = vmatmul.mubr.msk.f32.gmra.mrb[22].mxu0 %vm1640_vm13, %v1633_v29  ;;  %v6252_v32 = vld [vmem:[#allocation9 + $0x440] ss:$8 sps:$4 sm:$0xff]   ;;  %v6257_v29 = vld [vmem:[#allocation9 + $0x454] ss:$8 sps:$4 sm:$0xff]  }
 0x3e0   :  { %1551 = vst.msk [vmem:[#allocation4 + $0x58] sm:$0xff] %vm1387_vm9, %v1539_v33  ;;  %v6305_v31 = vld [vmem:[#allocation9 + $0x64] ss:$8 sps:$4 sm:$0xff]   ;;  %vm1889_vm9 = vcmask 909824  }
 0x3e1   :  { %5040 = vmatpush1.bf16.msra.mxu1 %v6252_v32 }
 0x3e2   :  { %v1609_v34 = vpop.permute.xlu0 %1608  ;;  %v1575_v35 = vpop.permute.xlu1 %1574  ;;  %5041 = vmatprep.subr.bf16.mxu1 %v6257_v29  ;;  %v6308_v29 = vld [vmem:[#allocation9 + $0x4f4] ss:$8 sps:$4 sm:$0xff]  }
 0x3e3   :  { %1622 = vst.msk [vmem:[#allocation4 + $0x50] sm:$0xff] %vm1461_vm12, %v1609_v34 }
 0x3e4   :  { %1587 = vst.msk [vmem:[#allocation4 + $0x58] sm:$0xff] %vm1424_vm10, %v1575_v35  ;;  %v6255_v35 = vld [vmem:[#allocation9 + $0x450] ss:$8 sps:$4 sm:$0xff]   ;;  %vm7717_vm10 = vmor %vm1907_vm7, %vm1906_vm6 }
 0x3e5   :  { %5042 = vmatpush1.bf16.msra.mxu1 %v6255_v35 }
 0x3e6   :  { %v1611_v36 = vpop.permute.xlu1 %1610 }
 0x3e7   :  { %1623 = vst.msk [vmem:[#allocation4 + $0x58] sm:$0xff] %vm1461_vm12, %v1611_v36  ;;  %v6260_v36 = vld [vmem:[#allocation9 + $0x464] ss:$8 sps:$4 sm:$0xff]   ;;  %vm1922_vm12 = vcmask 647424  }
 0x3e8   :  { %5043 = vmatprep.subr.bf16.mxu1 %v6260_v36  ;;  %v6311_v36 = vld [vmem:[#allocation9 + $0x74] ss:$8 sps:$4 sm:$0xff]  }
 0x3ea   :  { %v1634_v37 = vld [vmem:[#allocation4 + $0x50] sm:$0xff] }
 0x3eb   :  { %6068 = vmatprep.mubr.msk.f32.mxu0 %vm1640_vm13, %v1634_v37 }
 0x3ee   :  { %v1635_v39 = vld [vmem:[#allocation4 + $0x58] sm:$0xff] }
 0x3ef   :  { %6069 = vmatmul.mubr.msk.f32.gmra.mrb[24].mxu0 %vm1640_vm13, %v1635_v39  ;;  %vm1936_vm13 = vcmask 1041024  }
 0x460   :  { %v6055_v41 = vpop.f32.mrb[14].mxu0 }
 0x461   :  { %v1749_v42 = vadd.f32 %v6055_v41, %v7619_v40  ;;  %v1743_v43 = vpop.f32.mrb[15].mxu0 }
 0x462   :  { %v1744_v44 = vadd.f32 %v7619_v40, %v1743_v43 }
 0x463   :  { %v1803_v45 = vmax.f32 %v1749_v42, 0.0  ;;  %v6258_v42 = vld [vmem:[#allocation9 + $0x460] ss:$8 sps:$4 sm:$0xff]  }
 0x464   :  { %v1802_v46 = vmax.f32 %v1744_v44, 0.0  ;;  %5044 = vmatpush1.bf16.msra.mxu1 %v6258_v42 }
 0x465   :  { %1816 = vst.msk [vmem:[#allocation7 + $0x8] sm:$0xff] %vm1814_vm14, %v1803_v45 }
 0x466   :  { %1815 = vst.msk [vmem:[#allocation7] sm:$0xff] %vm1814_vm14, %v1802_v46  ;;  %v6261_v46 = vld [vmem:[#allocation9 + $0x470] ss:$8 sps:$4 sm:$0xff]  }
 0x46c   :  { %v1938_v47 = vld [vmem:[#allocation7 + $0x8] sm:$0x1] }
 0x46d   :  { %v1827_v48 = vld [vmem:[#allocation7] sm:$0x1]  ;;  %1939 = vst.msk [vmem:[#allocation8 + $0x6] sm:$0x1] %vm1828_vm15, %v1938_v47 }
 0x46e   :  { %1829 = vst.msk [vmem:[#allocation8] sm:$0x1] %vm1828_vm15, %v1827_v48  ;;  %v6263_v47 = vld [vmem:[#allocation9 + $0x474] ss:$8 sps:$4 sm:$0xff]   ;;  %v6266_v48 = vld [vmem:[#allocation9 + $0x484] ss:$8 sps:$4 sm:$0xff]  }
 0x46f   :  { %5045 = vmatprep.subr.bf16.mxu1 %v6263_v47  ;;  %v5453_v47 = vld.sshfl [vmem:[#allocation7 + $0x1] sm:$0x1 pattern:$0x76325410] }
 0x470   :  { %v6058_v49 = vpop.f32.mrb[16].mxu0  ;;  %5046 = vmatpush1.bf16.msra.mxu1 %v6261_v46 }
 0x471   :  { %v1759_v50 = vadd.f32 %v6058_v49, %v7619_v40  ;;  %v1753_v51 = vpop.f32.mrb[17].mxu0  ;;  %v6264_v49 = vld [vmem:[#allocation9 + $0x480] ss:$8 sps:$4 sm:$0xff]   ;;  %5047 = vmatprep.subr.bf16.mxu1 %v6266_v48 }
 0x472   :  { %v1754_v52 = vadd.f32 %v7619_v40, %v1753_v51  ;;  %v6269_v51 = vld [vmem:[#allocation9 + $0x4] ss:$8 sps:$4 sm:$0xff]   ;;  %v6315_v48 = vld [vmem:[#allocation9 + $0x80] ss:$8 sps:$4 sm:$0xff]  }
 0x473   :  { %v1805_v53 = vmax.f32 %v1759_v50, 0.0  ;;  %v6267_v50 = vld [vmem:[#allocation9] ss:$8 sps:$4 sm:$0xff]   ;;  %4867 = vmatprep.subr.bf16.mxu0 %v6269_v51 }
 0x474   :  { %v1804_v54 = vmax.f32 %v1754_v52, 0.0  ;;  %v6270_v52 = vld [vmem:[#allocation9 + $0x490] ss:$8 sps:$4 sm:$0xff]   ;;  %5048 = vmatpush1.bf16.msra.mxu1 %v6264_v49  ;;  %4868 = vmatpush1.bf16.msra.mxu0 %v6267_v50  ;;  %v6323_v50 = vld [vmem:[#allocation9 + $0x94] ss:$8 sps:$4 sm:$0xff]  }
 0x475   :  { %1818 = vst.msk [vmem:[#allocation7 + $0x18] sm:$0xff] %vm1814_vm14, %v1805_v53  ;;  %v5457_v51 = vld.sshfl [vmem:[#allocation7 + $0x5] sm:$0x1 pattern:$0x76325410] }
 0x476   :  { %1817 = vst.msk [vmem:[#allocation7 + $0x10] sm:$0xff] %vm1814_vm14, %v1804_v54 }
 0x47c   :  { %v5475_v55 = vld.sshfl [vmem:[#allocation7 + $0x1a] sm:$0x1 pattern:$0x76325410]  ;;  %v2132_v56 = vld [vmem:[#allocation7 + $0x18] sm:$0x1] }
 0x47d   :  { %2156 = vrot.lane.b32.xlu1 %v5475_v55, %s6760_s0  ;;  %v5468_v57 = vld.sshfl [vmem:[#allocation7 + $0x12] sm:$0x1 pattern:$0x76325410]  ;;  %2133 = vst.msk [vmem:[#allocation8 + $0x12] sm:$0x1] %vm1828_vm15, %v2132_v56 }
 0x47e   :  { %v2035_v58 = vld [vmem:[#allocation7 + $0x10] sm:$0x1]  ;;  %2059 = vrot.lane.b32.xlu0 %v5468_v57, %s6760_s0  ;;  %v5474_v59 = vld.sshfl [vmem:[#allocation7 + $0x19] sm:$0x1 pattern:$0x76325410] }
 0x47f   :  { %2036 = vst.msk [vmem:[#allocation8 + $0xc] sm:$0x1] %vm1828_vm15, %v2035_v58  ;;  %v5467_v60 = vld.sshfl [vmem:[#allocation7 + $0x11] sm:$0x1 pattern:$0x76325410] }
 0x480   :  { %v5478_v61 = vld.sshfl [vmem:[#allocation7 + $0x1d] sm:$0x1 pattern:$0x76325410]  ;;  %v6272_v57 = vld [vmem:[#allocation9 + $0x494] ss:$8 sps:$4 sm:$0xff]  }
 0x481   :  { %2143 = vrot.lane.b32.xlu1 %v5474_v59, %s6757_s20  ;;  %v5471_v62 = vld.sshfl [vmem:[#allocation7 + $0x15] sm:$0x1 pattern:$0x76325410]  ;;  %5049 = vmatprep.subr.bf16.mxu1 %v6272_v57 }
 0x482   :  { %2046 = vrot.lane.b32.xlu0 %v5467_v60, %s6757_s20  ;;  %v5476_v63 = vld.sshfl [vmem:[#allocation7 + $0x1b] sm:$0x1 pattern:$0x76325410]  ;;  %5050 = vmatpush1.bf16.msra.mxu1 %v6270_v52  ;;  %v6321_v52 = vld [vmem:[#allocation9 + $0x90] ss:$8 sps:$4 sm:$0xff]  }
 0x483   :  { %v5469_v0 = vld.sshfl [vmem:[#allocation7 + $0x13] sm:$0x1 pattern:$0x76325410] }
 0x484   :  { %v5477_v1 = vld.sshfl [vmem:[#allocation7 + $0x1c] sm:$0x1 pattern:$0x76325410] }
 0x485   :  { %2197 = vrot.lane.b32.xlu1 %v5478_v61, %s6761_s1  ;;  %v5470_v2 = vld.sshfl [vmem:[#allocation7 + $0x14] sm:$0x1 pattern:$0x76325410] }
 0x486   :  { %2100 = vrot.lane.b32.xlu0 %v5471_v62, %s6761_s1  ;;  %v5479_v3 = vld.sshfl [vmem:[#allocation7 + $0x1e] sm:$0x1 pattern:$0x76325410] }
 0x487   :  { %v5472_v20 = vld.sshfl [vmem:[#allocation7 + $0x16] sm:$0x1 pattern:$0x76325410] }
 0x488   :  { %v5480_v8 = vld.sshfl [vmem:[#allocation7 + $0x1f] sm:$0x1 pattern:$0x76325410] }
 0x489   :  { %2171 = vrot.lane.b32.xlu1 %v5476_v63, %s6762_s6  ;;  %v5473_v10 = vld.sshfl [vmem:[#allocation7 + $0x17] sm:$0x1 pattern:$0x76325410] }
 0x48a   :  { %2074 = vrot.lane.b32.xlu0 %v5469_v0, %s6762_s6  ;;  %v6273_v63 = vld [vmem:[#allocation9 + $0x10] ss:$8 sps:$4 sm:$0xff]   ;;  %v5461_v57 = vld.sshfl [vmem:[#allocation7 + $0xa] sm:$0x1 pattern:$0x76325410] }
 0x48d   :  { %2184 = vrot.lane.b32.xlu1 %v5477_v1, %s6763_s29  ;;  %v6275_v1 = vld [vmem:[#allocation9 + $0x14] ss:$8 sps:$4 sm:$0xff]  }
 0x48e   :  { %2087 = vrot.lane.b32.xlu0 %v5470_v2, %s6763_s29  ;;  %4869 = vmatprep.subr.bf16.mxu0 %v6275_v1 }
 0x48f   :  { %4870 = vmatpush1.bf16.msra.mxu0 %v6273_v63 }
 0x491   :  { %2212 = vrot.lane.b32.xlu1 %v5479_v3, %s6764_s30 }
 0x492   :  { %v6061_v4 = vpop.f32.mrb[18].mxu0  ;;  %2115 = vrot.lane.b32.xlu0 %v5472_v20, %s6764_s30 }
 0x493   :  { %v1769_v5 = vadd.f32 %v6061_v4, %v7619_v40  ;;  %v1763_v6 = vpop.f32.mrb[19].mxu0 }
 0x494   :  { %v1764_v7 = vadd.f32 %v7619_v40, %v1763_v6  ;;  %v6278_v6 = vld [vmem:[#allocation9 + $0x4a4] ss:$8 sps:$4 sm:$0xff]  }
 0x495   :  { %v1807_v9 = vmax.f32 %v1769_v5, 0.0  ;;  %2225 = vrot.lane.b32.xlu1 %v5480_v8, %s6765_s7  ;;  %v6276_v5 = vld [vmem:[#allocation9 + $0x4a0] ss:$8 sps:$4 sm:$0xff]   ;;  %5051 = vmatprep.subr.bf16.mxu1 %v6278_v6  ;;  %v6281_v8 = vld [vmem:[#allocation9 + $0x24] ss:$8 sps:$4 sm:$0xff]  }
 0x496   :  { %v1806_v11 = vmax.f32 %v1764_v7, 0.0  ;;  %2128 = vrot.lane.b32.xlu0 %v5473_v10, %s6765_s7  ;;  %5052 = vmatpush1.bf16.msra.mxu1 %v6276_v5  ;;  %v6282_v10 = vld [vmem:[#allocation9 + $0x4b0] ss:$8 sps:$4 sm:$0xff]   ;;  %v6347_v6 = vld [vmem:[#allocation9 + $0xd4] ss:$8 sps:$4 sm:$0xff]  }
 0x497   :  { %1820 = vst.msk [vmem:[#allocation7 + $0x28] sm:$0xff] %vm1814_vm14, %v1807_v9  ;;  %4871 = vmatprep.subr.bf16.mxu0 %v6281_v8  ;;  %v6395_v5 = vld [vmem:[#allocation9 + $0x154] ss:$8 sps:$4 sm:$0xff]  }
 0x498   :  { %1819 = vst.msk [vmem:[#allocation7 + $0x20] sm:$0xff] %vm1814_vm14, %v1806_v11  ;;  %v6284_v11 = vld [vmem:[#allocation9 + $0x4b4] ss:$8 sps:$4 sm:$0xff]  }
 0x499   :  { %5053 = vmatprep.subr.bf16.mxu1 %v6284_v11  ;;  %v6345_v11 = vld [vmem:[#allocation9 + $0xd0] ss:$8 sps:$4 sm:$0xff]  }
 0x49a   :  { %5054 = vmatpush1.bf16.msra.mxu1 %v6282_v10 }
 0x49b   :  { %5055 = vmatprep.subr.bf16.mxu1 %v6290_v14 }
 0x49e   :  { %v2326_v16 = vld [vmem:[#allocation7 + $0x28] sm:$0x1] }
 0x49f   :  { %v6064_v17 = vpop.f32.mrb[20].mxu0  ;;  %2327 = vst.msk [vmem:[#allocation8 + $0x1e] sm:$0x1] %vm1828_vm15, %v2326_v16  ;;  %v2229_v30 = vld [vmem:[#allocation7 + $0x20] sm:$0x1] }
 0x4a0   :  { %v1779_v18 = vadd.f32 %v6064_v17, %v7619_v40  ;;  %v1773_v21 = vpop.f32.mrb[21].mxu0  ;;  %2230 = vst.msk [vmem:[#allocation8 + $0x18] sm:$0x1] %vm1828_vm15, %v2229_v30  ;;  %v6293_v16 = vld [vmem:[#allocation9 + $0x44] ss:$8 sps:$4 sm:$0xff]  }
 0x4a1   :  { %v1774_v22 = vadd.f32 %v7619_v40, %v1773_v21  ;;  %v6296_v21 = vld [vmem:[#allocation9 + $0x4d4] ss:$8 sps:$4 sm:$0xff]  }
 0x4a2   :  { %v1809_v23 = vmax.f32 %v1779_v18, 0.0  ;;  %v6288_v18 = vld [vmem:[#allocation9 + $0x4c0] ss:$8 sps:$4 sm:$0xff]  }
 0x4a3   :  { %v1808_v24 = vmax.f32 %v1774_v22, 0.0  ;;  %v6291_v22 = vld [vmem:[#allocation9 + $0x40] ss:$8 sps:$4 sm:$0xff]   ;;  %5056 = vmatpush1.bf16.msra.mxu1 %v6288_v18 }
 0x4a4   :  { %1822 = vst.msk [vmem:[#allocation7 + $0x38] sm:$0xff] %vm1814_vm14, %v1809_v23  ;;  %5057 = vmatprep.subr.bf16.mxu1 %v6296_v21  ;;  %v6359_v21 = vld [vmem:[#allocation9 + $0xf4] ss:$8 sps:$4 sm:$0xff]  }
 0x4a5   :  { %1821 = vst.msk [vmem:[#allocation7 + $0x30] sm:$0xff] %vm1814_vm14, %v1808_v24  ;;  %v6299_v24 = vld [vmem:[#allocation9 + $0x54] ss:$8 sps:$4 sm:$0xff]  }
 0x4a7   :  { %5058 = vmatpush1.bf16.msra.mxu1 %v6294_v26 }
 0x4a8   :  { %5059 = vmatprep.subr.bf16.mxu1 %v6302_v27  ;;  %v6357_v27 = vld [vmem:[#allocation9 + $0xf0] ss:$8 sps:$4 sm:$0xff]  }
 0x4ab   :  { %v2520_v33 = vld [vmem:[#allocation7 + $0x38] sm:$0x1] }
 0x4ac   :  { %2521 = vst.msk [vmem:[#allocation8 + $0x7] sm:$0x1] %vm1828_vm15, %v2520_v33  ;;  %v2423_v34 = vld [vmem:[#allocation7 + $0x30] sm:$0x1]  ;;  %v6300_v33 = vld [vmem:[#allocation9 + $0x4e0] ss:$8 sps:$4 sm:$0xff]  }
 0x4ad   :  { %2424 = vst.msk [vmem:[#allocation8 + $0x1] sm:$0x1] %vm1828_vm15, %v2423_v34  ;;  %v6303_v34 = vld [vmem:[#allocation9 + $0x60] ss:$8 sps:$4 sm:$0xff]   ;;  %5060 = vmatpush1.bf16.msra.mxu1 %v6300_v33 }
 0x4ae   :  { %v5496_v35 = vld.sshfl [vmem:[#allocation7 + $0x32] sm:$0x1 pattern:$0x76325410]  ;;  %5061 = vmatprep.subr.bf16.mxu1 %v6308_v29 }
 0x4af   :  { %v5495_v42 = vld.sshfl [vmem:[#allocation7 + $0x31] sm:$0x1 pattern:$0x76325410] }
 0x4b0   :  { %v5499_v49 = vld.sshfl [vmem:[#allocation7 + $0x35] sm:$0x1 pattern:$0x76325410] }
 0x4b1   :  { %v5501_v18 = vld.sshfl [vmem:[#allocation7 + $0x37] sm:$0x1 pattern:$0x76325410] }
 0x4b2   :  { %v6067_v37 = vpop.f32.mrb[22].mxu0  ;;  %v5482_v33 = vld.sshfl [vmem:[#allocation7 + $0x22] sm:$0x1 pattern:$0x76325410] }
 0x4b3   :  { %v1789_v39 = vadd.f32 %v6067_v37, %v7619_v40  ;;  %v1783_v41 = vpop.f32.mrb[23].mxu0  ;;  %v5454_v37 = vld.sshfl [vmem:[#allocation7 + $0x2] sm:$0x1 pattern:$0x76325410] }
 0x4b4   :  { %v1784_v43 = vadd.f32 %v7619_v40, %v1783_v41  ;;  %v6314_v41 = vld [vmem:[#allocation9 + $0x504] ss:$8 sps:$4 sm:$0xff]  }
 0x4b5   :  { %v1811_v44 = vmax.f32 %v1789_v39, 0.0  ;;  %v6306_v39 = vld [vmem:[#allocation9 + $0x4f0] ss:$8 sps:$4 sm:$0xff]  }
 0x4b6   :  { %v1810_v45 = vmax.f32 %v1784_v43, 0.0  ;;  %v6309_v43 = vld [vmem:[#allocation9 + $0x70] ss:$8 sps:$4 sm:$0xff]   ;;  %5062 = vmatpush1.bf16.msra.mxu1 %v6306_v39 }
 0x4b7   :  { %1824 = vst.msk [vmem:[#allocation7 + $0x48] sm:$0xff] %vm1814_vm14, %v1811_v44  ;;  %v6317_v44 = vld [vmem:[#allocation9 + $0x84] ss:$8 sps:$4 sm:$0xff]   ;;  %5072 = vmatprep.subr.bf16.mxu1 %v6314_v41 }
 0x4b8   :  { %1823 = vst.msk [vmem:[#allocation7 + $0x40] sm:$0xff] %vm1814_vm14, %v1810_v45  ;;  %v5481_v39 = vld.sshfl [vmem:[#allocation7 + $0x21] sm:$0x1 pattern:$0x76325410] }
 0x4be   :  { %v5517_v53 = vld.sshfl [vmem:[#allocation7 + $0x4a] sm:$0x1 pattern:$0x76325410]  ;;  %v2714_v54 = vld [vmem:[#allocation7 + $0x48] sm:$0x1] }
 0x4bf   :  { %2738 = vrot.lane.b32.xlu1 %v5517_v53, %s6760_s0  ;;  %v5510_v55 = vld.sshfl [vmem:[#allocation7 + $0x42] sm:$0x1 pattern:$0x76325410]  ;;  %2715 = vst.msk [vmem:[#allocation8 + $0x13] sm:$0x1] %vm1828_vm15, %v2714_v54 }
 0x4c0   :  { %v2617_v56 = vld [vmem:[#allocation7 + $0x40] sm:$0x1]  ;;  %2641 = vrot.lane.b32.xlu0 %v5510_v55, %s6760_s0  ;;  %v5516_v58 = vld.sshfl [vmem:[#allocation7 + $0x49] sm:$0x1 pattern:$0x76325410] }
 0x4c1   :  { %2618 = vst.msk [vmem:[#allocation8 + $0xd] sm:$0x1] %vm1828_vm15, %v2617_v56  ;;  %v5509_v60 = vld.sshfl [vmem:[#allocation7 + $0x41] sm:$0x1 pattern:$0x76325410] }
 0x4c2   :  { %v6070_v59 = vpop.f32.mrb[24].mxu0  ;;  %v5520_v20 = vld.sshfl [vmem:[#allocation7 + $0x4d] sm:$0x1 pattern:$0x76325410] }
 0x4c3   :  { %v1799_v61 = vadd.f32 %v6070_v59, %v7619_v40  ;;  %2725 = vrot.lane.b32.xlu1 %v5516_v58, %s6757_s20  ;;  %v1793_v62 = vpop.f32.mrb[25].mxu0  ;;  %v5513_v4 = vld.sshfl [vmem:[#allocation7 + $0x45] sm:$0x1 pattern:$0x76325410] }
 0x4c4   :  { %v1794_v0 = vadd.f32 %v7619_v40, %v1793_v62  ;;  %2628 = vrot.lane.b32.xlu0 %v5509_v60, %s6757_s20  ;;  %v6279_v40 = vld [vmem:[#allocation9 + $0x20] ss:$8 sps:$4 sm:$0xff]   ;;  %v5518_v7 = vld.sshfl [vmem:[#allocation7 + $0x4b] sm:$0x1 pattern:$0x76325410] }
 0x4c5   :  { %v1813_v2 = vmax.f32 %v1799_v61, 0.0  ;;  %v5511_v9 = vld.sshfl [vmem:[#allocation7 + $0x43] sm:$0x1 pattern:$0x76325410]  ;;  %4872 = vmatpush1.bf16.msra.mxu0 %v6279_v40 }
 0x4c6   :  { %v1812_v3 = vmax.f32 %v1794_v0, 0.0  ;;  %v5519_v15 = vld.sshfl [vmem:[#allocation7 + $0x4c] sm:$0x1 pattern:$0x76325410]  ;;  %4873 = vmatprep.subr.bf16.mxu0 %v6287_v12 }
 0x4c7   :  { %1826 = vst.msk [vmem:[#allocation7 + $0x58] sm:$0xff] %vm1814_vm14, %v1813_v2  ;;  %2779 = vrot.lane.b32.xlu1 %v5520_v20, %s6761_s1  ;;  %v5512_v17 = vld.sshfl [vmem:[#allocation7 + $0x44] sm:$0x1 pattern:$0x76325410] }
 0x4c8   :  { %1825 = vst.msk [vmem:[#allocation7 + $0x50] sm:$0xff] %vm1814_vm14, %v1812_v3  ;;  %2682 = vrot.lane.b32.xlu0 %v5513_v4, %s6761_s1  ;;  %v5521_v23 = vld.sshfl [vmem:[#allocation7 + $0x4e] sm:$0x1 pattern:$0x76325410]  ;;  %vm5391_vm14 = vcmask 25600  }
 0x4c9   :  { %4874 = vmatpush1.bf16.msra.mxu0 %v6285_v13  ;;  %v5514_v25 = vld.sshfl [vmem:[#allocation7 + $0x46] sm:$0x1 pattern:$0x76325410]  ;;  %v6329_v54 = vld [vmem:[#allocation9 + $0xa4] ss:$8 sps:$4 sm:$0xff]  }
 0x4ca   :  { %4875 = vmatprep.subr.bf16.mxu0 %v6293_v16  ;;  %v5522_v30 = vld.sshfl [vmem:[#allocation7 + $0x4f] sm:$0x1 pattern:$0x76325410]  ;;  %v6335_v58 = vld [vmem:[#allocation9 + $0xb4] ss:$8 sps:$4 sm:$0xff]  }
 0x4cb   :  { %2753 = vrot.lane.b32.xlu1 %v5518_v7, %s6762_s6  ;;  %v5515_v32 = vld.sshfl [vmem:[#allocation7 + $0x47] sm:$0x1 pattern:$0x76325410]  ;;  %v6333_v60 = vld [vmem:[#allocation9 + $0xb0] ss:$8 sps:$4 sm:$0xff]  }
 0x4cc   :  { %2656 = vrot.lane.b32.xlu0 %v5511_v9, %s6762_s6  ;;  %v5497_v53 = vld.sshfl [vmem:[#allocation7 + $0x33] sm:$0x1 pattern:$0x76325410]  ;;  %v6327_v56 = vld [vmem:[#allocation9 + $0xa0] ss:$8 sps:$4 sm:$0xff]  }
 0x4cd   :  { %4876 = vmatpush1.bf16.msra.mxu0 %v6291_v22  ;;  %v5455_v55 = vld.sshfl [vmem:[#allocation7 + $0x3] sm:$0x1 pattern:$0x76325410]  ;;  %v6341_v62 = vld [vmem:[#allocation9 + $0xc4] ss:$8 sps:$4 sm:$0xff]  }
 0x4ce   :  { %4877 = vmatprep.subr.bf16.mxu0 %v6299_v24  ;;  %v2908_v45 = vld [vmem:[#allocation7 + $0x58] sm:$0x1]  ;;  %v5456_v59 = vld.sshfl [vmem:[#allocation7 + $0x4] sm:$0x1 pattern:$0x76325410] }
 0x4cf   :  { %2766 = vrot.lane.b32.xlu1 %v5519_v15, %s6763_s29  ;;  %v2811_v46 = vld [vmem:[#allocation7 + $0x50] sm:$0x1]  ;;  %2909 = vst.msk [vmem:[#allocation8 + $0x1f] sm:$0x1] %vm1828_vm15, %v2908_v45  ;;  %v6339_v20 = vld [vmem:[#allocation9 + $0xc0] ss:$8 sps:$4 sm:$0xff]  }
 0x4d0   :  { %2669 = vrot.lane.b32.xlu0 %v5512_v17, %s6763_s29  ;;  %2812 = vst.msk [vmem:[#allocation8 + $0x19] sm:$0x1] %vm1828_vm15, %v2811_v46  ;;  %v5503_v61 = vld.sshfl [vmem:[#allocation7 + $0x3a] sm:$0x1 pattern:$0x76325410] }
 0x4d1   :  { %4878 = vmatpush1.bf16.msra.mxu0 %v6297_v28  ;;  %v5498_v0 = vld.sshfl [vmem:[#allocation7 + $0x34] sm:$0x1 pattern:$0x76325410]  ;;  %v6353_v13 = vld [vmem:[#allocation9 + $0xe4] ss:$8 sps:$4 sm:$0xff]  }
 0x4d2   :  { %4879 = vmatprep.subr.bf16.mxu0 %v6305_v31  ;;  %v5460_v4 = vld.sshfl [vmem:[#allocation7 + $0x9] sm:$0x1 pattern:$0x76325410]  ;;  %v6351_v17 = vld [vmem:[#allocation9 + $0xe0] ss:$8 sps:$4 sm:$0xff]  }
 0x4d3   :  { %2794 = vrot.lane.b32.xlu1 %v5521_v23, %s6764_s30  ;;  %v5458_v7 = vld.sshfl [vmem:[#allocation7 + $0x6] sm:$0x1 pattern:$0x76325410]  ;;  %v6365_v31 = vld [vmem:[#allocation9 + $0x104] ss:$8 sps:$4 sm:$0xff]  }
 0x4d4   :  { %2697 = vrot.lane.b32.xlu0 %v5514_v25, %s6764_s30  ;;  %v5502_v12 = vld.sshfl [vmem:[#allocation7 + $0x39] sm:$0x1 pattern:$0x76325410] }
 0x4d5   :  { %4880 = vmatpush1.bf16.msra.mxu0 %v6303_v34  ;;  %v5500_v15 = vld.sshfl [vmem:[#allocation7 + $0x36] sm:$0x1 pattern:$0x76325410] }
 0x4d6   :  { %4881 = vmatprep.subr.bf16.mxu0 %v6311_v36  ;;  %v5459_v23 = vld.sshfl [vmem:[#allocation7 + $0x7] sm:$0x1 pattern:$0x76325410] }
 0x4d7   :  { %2807 = vrot.lane.b32.xlu1 %v5522_v30, %s6765_s7  ;;  %v5489_v28 = vld.sshfl [vmem:[#allocation7 + $0x2a] sm:$0x1 pattern:$0x76325410] }
 0x4d8   :  { %2710 = vrot.lane.b32.xlu0 %v5515_v32, %s6765_s7  ;;  %v5488_v36 = vld.sshfl [vmem:[#allocation7 + $0x29] sm:$0x1 pattern:$0x76325410] }
 0x4d9   :  { %4882 = vmatpush1.bf16.msra.mxu0 %v6309_v43  ;;  %v5530_v46 = vld.sshfl [vmem:[#allocation7 + $0x59] sm:$0x1 pattern:$0x76325410]  ;;  %v6461_v30 = vld [vmem:[#allocation9 + $0x204] ss:$8 sps:$4 sm:$0xff]  }
 0x4da   :  { %4883 = vmatprep.subr.bf16.mxu0 %v6317_v44  ;;  %v5485_v44 = vld.sshfl [vmem:[#allocation7 + $0x25] sm:$0x1 pattern:$0x76325410] }
 0x4db   :  { %2447 = vrot.lane.b32.xlu1 %v5496_v35, %s6760_s0 }
 0x4dc   :  { %1853 = vrot.lane.b32.xlu0 %v5454_v37, %s6760_s0 }
 0x4dd   :  { %4884 = vmatpush1.bf16.msra.mxu0 %v6315_v48  ;;  %v5524_v48 = vld.sshfl [vmem:[#allocation7 + $0x52] sm:$0x1 pattern:$0x76325410] }
 0x4de   :  { %4885 = vmatprep.subr.bf16.mxu0 %v6323_v50  ;;  %v5523_v50 = vld.sshfl [vmem:[#allocation7 + $0x51] sm:$0x1 pattern:$0x76325410] }
 0x4df   :  { %2434 = vrot.lane.b32.xlu1 %v5495_v42, %s6757_s20  ;;  %v5531_v42 = vld.sshfl [vmem:[#allocation7 + $0x5a] sm:$0x1 pattern:$0x76325410] }
 0x4e0   :  { %1839 = vrot.lane.b32.xlu0 %v5453_v47, %s6757_s20  ;;  %v5483_v47 = vld.sshfl [vmem:[#allocation7 + $0x23] sm:$0x1 pattern:$0x76325410] }
 0x4e1   :  { %4886 = vmatpush1.bf16.msra.mxu0 %v6321_v52  ;;  %v5527_v52 = vld.sshfl [vmem:[#allocation7 + $0x55] sm:$0x1 pattern:$0x76325410] }
 0x4e2   :  { %4887 = vmatprep.subr.bf16.mxu0 %v6329_v54  ;;  %v5525_v54 = vld.sshfl [vmem:[#allocation7 + $0x53] sm:$0x1 pattern:$0x76325410] }
 0x4e3   :  { %2488 = vrot.lane.b32.xlu1 %v5499_v49, %s6761_s1  ;;  %v5484_v49 = vld.sshfl [vmem:[#allocation7 + $0x24] sm:$0x1 pattern:$0x76325410] }
 0x4e4   :  { %1900 = vrot.lane.b32.xlu0 %v5457_v51, %s6761_s1  ;;  %v5486_v51 = vld.sshfl [vmem:[#allocation7 + $0x26] sm:$0x1 pattern:$0x76325410] }
 0x4e5   :  { %4888 = vmatpush1.bf16.msra.mxu0 %v6327_v56  ;;  %v5529_v56 = vld.sshfl [vmem:[#allocation7 + $0x57] sm:$0x1 pattern:$0x76325410] }
 0x4e6   :  { %4889 = vmatprep.subr.bf16.mxu0 %v6335_v58  ;;  %v5506_v58 = vld.sshfl [vmem:[#allocation7 + $0x3d] sm:$0x1 pattern:$0x76325410] }
 0x4e7   :  { %2462 = vrot.lane.b32.xlu1 %v5497_v53, %s6762_s6  ;;  %v5526_v53 = vld.sshfl [vmem:[#allocation7 + $0x54] sm:$0x1 pattern:$0x76325410] }
 0x4e8   :  { %1872 = vrot.lane.b32.xlu0 %v5455_v55, %s6762_s6  ;;  %v5528_v55 = vld.sshfl [vmem:[#allocation7 + $0x56] sm:$0x1 pattern:$0x76325410] }
 0x4e9   :  { %4890 = vmatpush1.bf16.msra.mxu0 %v6333_v60  ;;  %v5504_v60 = vld.sshfl [vmem:[#allocation7 + $0x3b] sm:$0x1 pattern:$0x76325410] }
 0x4ea   :  { %4891 = vmatprep.subr.bf16.mxu0 %v6341_v62  ;;  %v5505_v62 = vld.sshfl [vmem:[#allocation7 + $0x3c] sm:$0x1 pattern:$0x76325410] }
 0x4eb   :  { %1962 = vrot.lane.b32.xlu1 %v5461_v57, %s6760_s0  ;;  %v5487_v57 = vld.sshfl [vmem:[#allocation7 + $0x27] sm:$0x1 pattern:$0x76325410] }
 0x4ec   :  { %1886 = vrot.lane.b32.xlu0 %v5456_v59, %s6763_s29  ;;  %v5464_v59 = vld.sshfl [vmem:[#allocation7 + $0xd] sm:$0x1 pattern:$0x76325410] }
 0x4ed   :  { %4892 = vmatpush1.bf16.msra.mxu0 %v6339_v20 }
 0x4ee   :  { %4893 = vmatprep.subr.bf16.mxu0 %v6347_v6 }
 0x4ef   :  { %2544 = vrot.lane.b32.xlu1 %v5503_v61, %s6760_s0  ;;  %v2157_v63 = vpop.permute.xlu1 %2156  ;;  %v5462_v61 = vld.sshfl [vmem:[#allocation7 + $0xb] sm:$0x1 pattern:$0x76325410] }
 0x4f0   :  { %v2158_v1 = vrot.slane %v2157_v63, 6  ;;  %2475 = vrot.lane.b32.xlu0 %v5498_v0, %s6763_s29  ;;  %v2060_v2 = vpop.permute.xlu0 %2059  ;;  %v5507_v0 = vld.sshfl [vmem:[#allocation7 + $0x3e] sm:$0x1 pattern:$0x76325410] }
 0x4f1   :  { %v2061_v3 = vrot.slane %v2060_v2, 6  ;;  %4894 = vmatpush1.bf16.msra.mxu0 %v6345_v11 }
 0x4f2   :  { %v2159_v8 = vsel %vm1856_vm2, %v2158_v1, %v2157_v63  ;;  %4895 = vmatprep.subr.bf16.mxu0 %v6353_v13  ;;  %v5463_v63 = vld.sshfl [vmem:[#allocation7 + $0xc] sm:$0x1 pattern:$0x76325410] }
 0x4f3   :  { %1949 = vrot.lane.b32.xlu1 %v5460_v4, %s6757_s20  ;;  %v2144_v40 = vpop.permute.xlu1 %2143  ;;  %v2062_v10 = vsel %vm1856_vm2, %v2061_v3, %v2060_v2  ;;  %v5465_v1 = vld.sshfl [vmem:[#allocation7 + $0xe] sm:$0x1 pattern:$0x76325410] }
 0x4f4   :  { %2146 = vst.msk [vmem:[#allocation8 + $0x12] sm:$0x1] %vm1842_vm3, %v2144_v40  ;;  %1919 = vrot.lane.b32.xlu0 %v5458_v7, %s6764_s30  ;;  %v2047_v9 = vpop.permute.xlu0 %2046  ;;  %v5508_v4 = vld.sshfl [vmem:[#allocation7 + $0x3f] sm:$0x1 pattern:$0x76325410] }
 0x4f5   :  { %2049 = vst.msk [vmem:[#allocation8 + $0xc] sm:$0x1] %vm1842_vm3, %v2047_v9  ;;  %4896 = vmatpush1.bf16.msra.mxu0 %v6351_v17  ;;  %v5466_v40 = vld.sshfl [vmem:[#allocation7 + $0xf] sm:$0x1 pattern:$0x76325410] }
 0x4f6   :  { %2161 = vst.msk [vmem:[#allocation8 + $0x12] sm:$0x5] %vm7697_vm4, %v2159_v8  ;;  %2064 = vst.msk [vmem:[#allocation8 + $0xc] sm:$0x5] %vm7697_vm4, %v2062_v10  ;;  %4897 = vmatprep.subr.bf16.mxu0 %v6359_v21 }
 0x4f7   :  { %2531 = vrot.lane.b32.xlu1 %v5502_v12, %s6757_s20  ;;  %v2198_v14 = vpop.permute.xlu1 %2197  ;;  %v5534_v10 = vld.sshfl [vmem:[#allocation7 + $0x5d] sm:$0x1 pattern:$0x76325410] }
 0x4f8   :  { %2503 = vrot.lane.b32.xlu0 %v5500_v15, %s6764_s30  ;;  %v2101_v16 = vpop.permute.xlu0 %2100  ;;  %v2199_v24 = vrot.slane %v2198_v14, 6  ;;  %v5492_v12 = vld.sshfl [vmem:[#allocation7 + $0x2d] sm:$0x1 pattern:$0x76325410] }
 0x4f9   :  { %v2102_v26 = vrot.slane %v2101_v16, 6  ;;  %4898 = vmatpush1.bf16.msra.mxu0 %v6357_v27  ;;  %v5532_v15 = vld.sshfl [vmem:[#allocation7 + $0x5b] sm:$0x1 pattern:$0x76325410] }
 0x4fa   :  { %v2200_v29 = vsel %vm1903_vm8, %v2199_v24, %v2198_v14  ;;  %4908 = vmatprep.subr.bf16.mxu0 %v6365_v31  ;;  %v5491_v24 = vld.sshfl [vmem:[#allocation7 + $0x2c] sm:$0x1 pattern:$0x76325410] }
 0x4fb   :  { %2516 = vrot.lane.b32.xlu1 %v5501_v18, %s6765_s7  ;;  %v2172_v22 = vpop.permute.xlu1 %2171  ;;  %v2103_v35 = vsel %vm1903_vm8, %v2102_v26, %v2101_v16  ;;  %v5490_v16 = vld.sshfl [vmem:[#allocation7 + $0x2b] sm:$0x1 pattern:$0x76325410] }
 0x4fc   :  { %2174 = vst.msk [vmem:[#allocation8 + $0x14] sm:$0x1] %vm1875_vm5, %v2172_v22  ;;  %1933 = vrot.lane.b32.xlu0 %v5459_v23, %s6765_s7  ;;  %v2075_v25 = vpop.permute.xlu0 %2074  ;;  %v5533_v22 = vld.sshfl [vmem:[#allocation7 + $0x5c] sm:$0x1 pattern:$0x76325410] }
 0x4fd   :  { %2077 = vst.msk [vmem:[#allocation8 + $0xe] sm:$0x1] %vm1875_vm5, %v2075_v25 }
 0x4ff   :  { %2350 = vrot.lane.b32.xlu1 %v5489_v28, %s6760_s0  ;;  %v2185_v32 = vpop.permute.xlu1 %2184  ;;  %v5535_v28 = vld.sshfl [vmem:[#allocation7 + $0x5e] sm:$0x1 pattern:$0x76325410] }
 0x500   :  { %2187 = vst.msk [vmem:[#allocation8 + $0x14] sm:$0x1] %vm1889_vm9, %v2185_v32  ;;  %2253 = vrot.lane.b32.xlu0 %v5482_v33, %s6760_s0  ;;  %v2088_v34 = vpop.permute.xlu0 %2087  ;;  %v5493_v32 = vld.sshfl [vmem:[#allocation7 + $0x2e] sm:$0x1 pattern:$0x76325410] }
 0x501   :  { %2090 = vst.msk [vmem:[#allocation8 + $0xe] sm:$0x1] %vm1889_vm9, %v2088_v34  ;;  %v5536_v34 = vld.sshfl [vmem:[#allocation7 + $0x5f] sm:$0x1 pattern:$0x76325410] }
 0x502   :  { %2202 = vst.msk [vmem:[#allocation8 + $0x14] sm:$0x5] %vm7717_vm10, %v2200_v29  ;;  %2105 = vst.msk [vmem:[#allocation8 + $0xe] sm:$0x5] %vm7717_vm10, %v2103_v35 }
 0x503   :  { %2337 = vrot.lane.b32.xlu1 %v5488_v36, %s6757_s20  ;;  %v2213_v37 = vpop.permute.xlu1 %2212  ;;  %v5494_v35 = vld.sshfl [vmem:[#allocation7 + $0x2f] sm:$0x1 pattern:$0x76325410]  ;;  %v6766_v36 = vmov 1983009808  }
 0x504   :  { %2215 = vst.msk [vmem:[#allocation8 + $0x16] sm:$0x1] %vm1922_vm12, %v2213_v37  ;;  %2240 = vrot.lane.b32.xlu0 %v5481_v39, %s6757_s20  ;;  %v2116_v41 = vpop.permute.xlu0 %2115  ;;  %v3017_v37 = vunpack.c.l.s4 %v6766_v36  ;;  %v3019_v39 = vlaneseq  ;;  %v6356_v36 = vld [vmem:[#allocation9 + $0x574] ss:$8 sps:$4 sm:$0xff]  }
 0x505   :  { %2118 = vst.msk [vmem:[#allocation8 + $0x10] sm:$0x1] %vm1922_vm12, %v2116_v41 }
 0x507   :  { %v2226_v43 = vpop.permute.xlu1 %2225  ;;  %2932 = vrot.lane.b32.xlu1 %v5531_v42, %s6760_s0 }
 0x508   :  { %2228 = vst.msk [vmem:[#allocation8 + $0x16] sm:$0x1] %vm1936_vm13, %v2226_v43  ;;  %2294 = vrot.lane.b32.xlu0 %v5485_v44, %s6761_s1  ;;  %v2129_v45 = vpop.permute.xlu0 %2128  ;;  %v3018_v43 = vunpack.c.0.s8 %v3017_v37  ;;  %v7793_v44 = vshrl.u32 %v3019_v39, 7 }
 0x509   :  { %2131 = vst.msk [vmem:[#allocation8 + $0x10] sm:$0x1] %vm1936_vm13, %v2129_v45 }
 0x50b   :  { %2919 = vrot.lane.b32.xlu1 %v5530_v46, %s6757_s20 }
 0x50c   :  { %2268 = vrot.lane.b32.xlu0 %v5483_v47, %s6762_s6 }
 0x50f   :  { %2835 = vrot.lane.b32.xlu1 %v5524_v48, %s6760_s0 }
 0x510   :  { %2281 = vrot.lane.b32.xlu0 %v5484_v49, %s6763_s29  ;;  %v7796_v49 = vsub.s32 %v3018_v43, %v7793_v44  ;;  %v6354_v43 = vld [vmem:[#allocation9 + $0x570] ss:$8 sps:$4 sm:$0xff]  }
 0x513   :  { %2822 = vrot.lane.b32.xlu1 %v5523_v50, %s6757_s20 }
 0x514   :  { %2309 = vrot.lane.b32.xlu0 %v5486_v51, %s6764_s30 }
 0x517   :  { %2876 = vrot.lane.b32.xlu1 %v5527_v52, %s6761_s1 }
 0x518   :  { %2863 = vrot.lane.b32.xlu0 %v5526_v53, %s6763_s29 }
 0x51b   :  { %2850 = vrot.lane.b32.xlu1 %v5525_v54, %s6762_s6 }
 0x51c   :  { %2891 = vrot.lane.b32.xlu0 %v5528_v55, %s6764_s30 }
 0x51f   :  { %2904 = vrot.lane.b32.xlu1 %v5529_v56, %s6765_s7 }
 0x520   :  { %2322 = vrot.lane.b32.xlu0 %v5487_v57, %s6765_s7 }
 0x523   :  { %2585 = vrot.lane.b32.xlu1 %v5506_v58, %s6761_s1 }
 0x524   :  { %2003 = vrot.lane.b32.xlu0 %v5464_v59, %s6761_s1 }
 0x527   :  { %2559 = vrot.lane.b32.xlu1 %v5504_v60, %s6762_s6 }
 0x528   :  { %1977 = vrot.lane.b32.xlu0 %v5462_v61, %s6762_s6 }
 0x52b   :  { %2572 = vrot.lane.b32.xlu1 %v5505_v62, %s6763_s29  ;;  %v6312_v62 = vld [vmem:[#allocation9 + $0x500] ss:$8 sps:$4 sm:$0xff]  }
 0x52c   :  { %1990 = vrot.lane.b32.xlu0 %v5463_v63, %s6763_s29 }
 0x52f   :  { %2600 = vrot.lane.b32.xlu1 %v5507_v0, %s6764_s30 }
 0x530   :  { %2018 = vrot.lane.b32.xlu0 %v5465_v1, %s6764_s30  ;;  %v6320_v1 = vld [vmem:[#allocation9 + $0x514] ss:$8 sps:$4 sm:$0xff]  }
 0x531   :  { %v2739_v2 = vpop.permute.xlu1 %2738 }
 0x532   :  { %v2740_v3 = vrot.slane %v2739_v2, 6  ;;  %v2642_v20 = vpop.permute.xlu0 %2641 }
 0x533   :  { %v2643_v6 = vrot.slane %v2642_v20, 6  ;;  %2613 = vrot.lane.b32.xlu1 %v5508_v4, %s6765_s7 }
 0x534   :  { %2031 = vrot.lane.b32.xlu0 %v5466_v40, %s6765_s7  ;;  %v2741_v8 = vsel %vm1856_vm2, %v2740_v3, %v2739_v2  ;;  %v6326_v40 = vld [vmem:[#allocation9 + $0x524] ss:$8 sps:$4 sm:$0xff]  }
 0x535   :  { %v2726_v7 = vpop.permute.xlu1 %2725  ;;  %v2644_v11 = vsel %vm1856_vm2, %v2643_v6, %v2642_v20  ;;  %v6318_v6 = vld [vmem:[#allocation9 + $0x510] ss:$8 sps:$4 sm:$0xff]  }
 0x536   :  { %2728 = vst.msk [vmem:[#allocation8 + $0x13] sm:$0x1] %vm1842_vm3, %v2726_v7  ;;  %v2629_v9 = vpop.permute.xlu0 %2628 }
 0x537   :  { %2743 = vst.msk [vmem:[#allocation8 + $0x13] sm:$0x5] %vm7697_vm4, %v2741_v8  ;;  %2973 = vrot.lane.b32.xlu1 %v5534_v10, %s6761_s1 }
 0x538   :  { %2631 = vst.msk [vmem:[#allocation8 + $0xd] sm:$0x1] %vm1842_vm3, %v2629_v9  ;;  %2391 = vrot.lane.b32.xlu0 %v5492_v12, %s6761_s1  ;;  %v6332_v12 = vld [vmem:[#allocation9 + $0x534] ss:$8 sps:$4 sm:$0xff]  }
 0x539   :  { %2646 = vst.msk [vmem:[#allocation8 + $0xd] sm:$0x5] %vm7697_vm4, %v2644_v11  ;;  %v2780_v13 = vpop.permute.xlu1 %2779  ;;  %v6324_v11 = vld [vmem:[#allocation9 + $0x520] ss:$8 sps:$4 sm:$0xff]  }
 0x53a   :  { %v2683_v14 = vpop.permute.xlu0 %2682  ;;  %v2781_v18 = vrot.slane %v2780_v13, 6 }
 0x53b   :  { %2947 = vrot.lane.b32.xlu1 %v5532_v15, %s6762_s6  ;;  %v2684_v23 = vrot.slane %v2683_v14, 6 }
 0x53c   :  { %2365 = vrot.lane.b32.xlu0 %v5490_v16, %s6762_s6  ;;  %v2782_v26 = vsel %vm1903_vm8, %v2781_v18, %v2780_v13  ;;  %v6338_v18 = vld [vmem:[#allocation9 + $0x544] ss:$8 sps:$4 sm:$0xff]  }
 0x53d   :  { %v2754_v17 = vpop.permute.xlu1 %2753  ;;  %v2685_v31 = vsel %vm1903_vm8, %v2684_v23, %v2683_v14 }
 0x53e   :  { %2756 = vst.msk [vmem:[#allocation8 + $0x15] sm:$0x1] %vm1875_vm5, %v2754_v17  ;;  %v2657_v21 = vpop.permute.xlu0 %2656  ;;  %v6330_v17 = vld [vmem:[#allocation9 + $0x530] ss:$8 sps:$4 sm:$0xff]  }
 0x53f   :  { %2659 = vst.msk [vmem:[#allocation8 + $0xf] sm:$0x1] %vm1875_vm5, %v2657_v21  ;;  %2960 = vrot.lane.b32.xlu1 %v5533_v22, %s6763_s29 }
 0x540   :  { %2378 = vrot.lane.b32.xlu0 %v5491_v24, %s6763_s29  ;;  %s6767_s29 = smov [#allocation14]  }
 0x541   :  { %v2767_v25 = vpop.permute.xlu1 %2766 }
 0x542   :  { %2769 = vst.msk [vmem:[#allocation8 + $0x15] sm:$0x1] %vm1889_vm9, %v2767_v25  ;;  %v2670_v27 = vpop.permute.xlu0 %2669  ;;  %v6336_v25 = vld [vmem:[#allocation9 + $0x540] ss:$8 sps:$4 sm:$0xff]  }
 0x543   :  { %2784 = vst.msk [vmem:[#allocation8 + $0x15] sm:$0x5] %vm7717_vm10, %v2782_v26  ;;  %2988 = vrot.lane.b32.xlu1 %v5535_v28, %s6764_s30  ;;  %v6344_v26 = vld [vmem:[#allocation9 + $0x554] ss:$8 sps:$4 sm:$0xff]  }
 0x544   :  { %2672 = vst.msk [vmem:[#allocation8 + $0xf] sm:$0x1] %vm1889_vm9, %v2670_v27  ;;  %2406 = vrot.lane.b32.xlu0 %v5493_v32, %s6764_s30  ;;  %v6342_v32 = vld [vmem:[#allocation9 + $0x550] ss:$8 sps:$4 sm:$0xff]   ;;  %s5399_s30 = sshll.u32 %s6767_s29, 4  ;;  %s5400_s30 = int_to_ptr.vmem [resolvable:$true] %s5399_s30 }
 0x545   :  { %2687 = vst.msk [vmem:[#allocation8 + $0xf] sm:$0x5] %vm7717_vm10, %v2685_v31  ;;  %v2795_v33 = vpop.permute.xlu1 %2794  ;;  %p6722_p3 = scmp.lt.s32.totalorder %s5400_s30, %s5400_s30 }
 0x546   :  { %2797 = vst.msk [vmem:[#allocation8 + $0x17] sm:$0x1] %vm1922_vm12, %v2795_v33  ;;  %v2698_v29 = vpop.permute.xlu0 %2697  ;;  %v6350_v33 = vld [vmem:[#allocation9 + $0x564] ss:$8 sps:$4 sm:$0xff]  }
 0x547   :  { %2700 = vst.msk [vmem:[#allocation8 + $0x11] sm:$0x1] %vm1922_vm12, %v2698_v29  ;;  %3001 = vrot.lane.b32.xlu1 %v5536_v34, %s6765_s7 }
 0x548   :  { %2419 = vrot.lane.b32.xlu0 %v5494_v35, %s6765_s7  ;;  %v6348_v35 = vld [vmem:[#allocation9 + $0x560] ss:$8 sps:$4 sm:$0xff]   ;;  %s6717_s7 = scalar_lea.vmem %s5400_s30, 32 }
 0x549   :  { %v2808_v41 = vpop.permute.xlu1 %2807  ;;  %p6718_p2 = scmp.ne.s32.totalorder %s5400_s30, %s6717_s7  ;;  %p6723_p4 = scmp.lt.s32.totalorder %s6717_s7, %s6717_s7 }
 0x54a   :  { %2810 = vst.msk [vmem:[#allocation8 + $0x17] sm:$0x1] %vm1936_vm13, %v2808_v41  ;;  %v2711_v42 = vpop.permute.xlu0 %2710 }
 0x54b   :  { %2713 = vst.msk [vmem:[#allocation8 + $0x11] sm:$0x1] %vm1936_vm13, %v2711_v42  ;;  %p6724_p5 = por %p6723_p4, %p6722_p3 }
 0x54d   :  { %v2448_v45 = vpop.permute.xlu1 %2447  ;;  %p6725_p6 = pnand %p6724_p5, %p6718_p2 }
 0x54e   :  { %v2449_v46 = vrot.slane %v2448_v45, 6  ;;  %v1854_v47 = vpop.permute.xlu0 %1853 }
 0x54f   :  { %v1855_v48 = vrot.slane %v1854_v47, 6 }
 0x550   :  { %v2450_v51 = vsel %vm1856_vm2, %v2449_v46, %v2448_v45  ;;  %v6362_v45 = vld [vmem:[#allocation9 + $0x584] ss:$8 sps:$4 sm:$0xff]  }
 0x551   :  { %v2435_v50 = vpop.permute.xlu1 %2434  ;;  %v1857_v54 = vsel %vm1856_vm2, %v1855_v48, %v1854_v47 }
 0x552   :  { %2437 = vst.msk [vmem:[#allocation8 + $0x1] sm:$0x1] %vm1842_vm3, %v2435_v50  ;;  %v1840_v52 = vpop.permute.xlu0 %1839  ;;  %v3007_v53 = vld [vmem:[#allocation8 + $0x10] sm:$0xff] }
 0x553   :  { %2452 = vst.msk [vmem:[#allocation8 + $0x1] sm:$0x5] %vm7697_vm4, %v2450_v51  ;;  %v3056_v55 = vrot.slane %v3007_v53, %v7796_v49  ;;  %v3049_v56 = vcombine.high %v3007_v53, %v3007_v53 }
 0x554   :  { %1843 = vst.msk [vmem:[#allocation8] sm:$0x1] %vm1842_vm3, %v1840_v52  ;;  %v6360_v52 = vld [vmem:[#allocation9 + $0x580] ss:$8 sps:$4 sm:$0xff]  }
 0x555   :  { %1862 = vst.msk [vmem:[#allocation8] sm:$0x5] %vm7697_vm4, %v1857_v54  ;;  %v2489_v57 = vpop.permute.xlu1 %2488  ;;  %v3064_v58 = vcombine.high %v3056_v55, %v3056_v55  ;;  %v7808_v59 = vrot.slane %v3049_v56, %v7796_v49  ;;  %v3117_v0 = vpack.c.bf16 %v3056_v55, %v3056_v55  ;;  %v6368_v55 = vld [vmem:[#allocation9 + $0x594] ss:$8 sps:$4 sm:$0xff]  }
 0x556   :  { %v1901_v60 = vpop.permute.xlu0 %1900  ;;  %v2490_v9 = vrot.slane %v2489_v57, 6 }
 0x557   :  { %v3118_v61 = vpack.c.bf16 %v3064_v58, %v3064_v58  ;;  %v3065_v63 = vcombine.high %v7808_v59, %v7808_v59  ;;  %v1902_v4 = vrot.slane %v1901_v60, 6 }
 0x558   :  { %v2491_v16 = vsel %vm1903_vm8, %v2490_v9, %v2489_v57  ;;  %v6369_v9 = vld [vmem:[#allocation9 + $0x110] ss:$8 sps:$4 sm:$0xff]  }
 0x559   :  { %5063 = vmatprep.mubr.bf16.mxu1 %v3118_v61  ;;  %v2463_v2 = vpop.permute.xlu1 %2462  ;;  %v3120_v3 = vpack.c.bf16 %v3065_v63, %v3065_v63  ;;  %v1904_v10 = vsel %vm1903_vm8, %v1902_v4, %v1901_v60  ;;  %v6363_v63 = vld [vmem:[#allocation9 + $0x100] ss:$8 sps:$4 sm:$0xff]  }
 0x55a   :  { %2465 = vst.msk [vmem:[#allocation8 + $0x3] sm:$0x1] %vm1875_vm5, %v2463_v2  ;;  %v1873_v20 = vpop.permute.xlu0 %1872  ;;  %5064 = vmatmul.mubr.bf16.vlgmr.msra.gmra.mrb[28].mxu1 %v3117_v0  ;;  %v6366_v0 = vld [vmem:[#allocation9 + $0x590] ss:$8 sps:$4 sm:$0xff]  }
 0x55b   :  { %1876 = vst.msk [vmem:[#allocation8 + $0x2] sm:$0x1] %vm1875_vm5, %v1873_v20  ;;  %5073 = vmatpush1.bf16.msra.mxu1 %v6312_v62  ;;  %5104 = vmatprep.mubr.bf16.mxu1 %v3120_v3  ;;  %v6371_v3 = vld [vmem:[#allocation9 + $0x114] ss:$8 sps:$4 sm:$0xff]  }
 0x55c   :  { %5074 = vmatprep.subr.bf16.mxu1 %v6320_v1 }
 0x55d   :  { %v1963_v7 = vpop.permute.xlu1 %1962 }
 0x55e   :  { %v1887_v8 = vpop.permute.xlu0 %1886  ;;  %v1964_v14 = vrot.slane %v1963_v7, 6 }
 0x55f   :  { %1890 = vst.msk [vmem:[#allocation8 + $0x2] sm:$0x1] %vm1889_vm9, %v1887_v8  ;;  %5075 = vmatpush1.bf16.msra.mxu1 %v6318_v6  ;;  %v6374_v6 = vld [vmem:[#allocation9 + $0x5a4] ss:$8 sps:$4 sm:$0xff]  }
 0x560   :  { %1909 = vst.msk [vmem:[#allocation8 + $0x2] sm:$0x5] %vm7717_vm10, %v1904_v10  ;;  %5076 = vmatprep.subr.bf16.mxu1 %v6326_v40  ;;  %v1965_v22 = vsel %vm1856_vm2, %v1964_v14, %v1963_v7  ;;  %v6372_v10 = vld [vmem:[#allocation9 + $0x5a0] ss:$8 sps:$4 sm:$0xff]  }
 0x561   :  { %v2545_v13 = vpop.permute.xlu1 %2544 }
 0x562   :  { %v2476_v15 = vpop.permute.xlu0 %2475  ;;  %v2546_v23 = vrot.slane %v2545_v13, 6 }
 0x563   :  { %2478 = vst.msk [vmem:[#allocation8 + $0x3] sm:$0x1] %vm1889_vm9, %v2476_v15  ;;  %5077 = vmatpush1.bf16.msra.mxu1 %v6324_v11  ;;  %v6377_v11 = vld [vmem:[#allocation9 + $0x124] ss:$8 sps:$4 sm:$0xff]  }
 0x564   :  { %2493 = vst.msk [vmem:[#allocation8 + $0x3] sm:$0x5] %vm7717_vm10, %v2491_v16  ;;  %5078 = vmatprep.subr.bf16.mxu1 %v6332_v12  ;;  %v2547_v28 = vsel %vm1856_vm2, %v2546_v23, %v2545_v13  ;;  %v6380_v12 = vld [vmem:[#allocation9 + $0x5b4] ss:$8 sps:$4 sm:$0xff]  }
 0x565   :  { %v1950_v21 = vpop.permute.xlu1 %1949 }
 0x566   :  { %1952 = vst.msk [vmem:[#allocation8 + $0x6] sm:$0x1] %vm1842_vm3, %v1950_v21  ;;  %v1920_v24 = vpop.permute.xlu0 %1919  ;;  %v6383_v21 = vld [vmem:[#allocation9 + $0x134] ss:$8 sps:$4 sm:$0xff]  }
 0x567   :  { %1967 = vst.msk [vmem:[#allocation8 + $0x6] sm:$0x5] %vm7697_vm4, %v1965_v22  ;;  %5079 = vmatpush1.bf16.msra.mxu1 %v6330_v17  ;;  %v6375_v17 = vld [vmem:[#allocation9 + $0x120] ss:$8 sps:$4 sm:$0xff]   ;;  %v6386_v22 = vld [vmem:[#allocation9 + $0x5c4] ss:$8 sps:$4 sm:$0xff]  }
 0x568   :  { %1923 = vst.msk [vmem:[#allocation8 + $0x4] sm:$0x1] %vm1922_vm12, %v1920_v24  ;;  %5080 = vmatprep.subr.bf16.mxu1 %v6338_v18  ;;  %v6378_v18 = vld [vmem:[#allocation9 + $0x5b0] ss:$8 sps:$4 sm:$0xff]  }
 0x569   :  { %v2532_v27 = vpop.permute.xlu1 %2531 }
 0x56a   :  { %2534 = vst.msk [vmem:[#allocation8 + $0x7] sm:$0x1] %vm1842_vm3, %v2532_v27  ;;  %v2504_v31 = vpop.permute.xlu0 %2503  ;;  %v6384_v27 = vld [vmem:[#allocation9 + $0x5c0] ss:$8 sps:$4 sm:$0xff]  }
 0x56b   :  { %2549 = vst.msk [vmem:[#allocation8 + $0x7] sm:$0x5] %vm7697_vm4, %v2547_v28  ;;  %5081 = vmatpush1.bf16.msra.mxu1 %v6336_v25  ;;  %v6389_v28 = vld [vmem:[#allocation9 + $0x144] ss:$8 sps:$4 sm:$0xff]  }
 0x56c   :  { %2506 = vst.msk [vmem:[#allocation8 + $0x5] sm:$0x1] %vm1922_vm12, %v2504_v31  ;;  %5082 = vmatprep.subr.bf16.mxu1 %v6344_v26  ;;  %v6381_v26 = vld [vmem:[#allocation9 + $0x130] ss:$8 sps:$4 sm:$0xff]   ;;  %v6392_v31 = vld [vmem:[#allocation9 + $0x5d4] ss:$8 sps:$4 sm:$0xff]  }
 0x56d   :  { %v2517_v29 = vpop.permute.xlu1 %2516 }
 0x56e   :  { %2519 = vst.msk [vmem:[#allocation8 + $0x5] sm:$0x1] %vm1936_vm13, %v2517_v29  ;;  %v1934_v34 = vpop.permute.xlu0 %1933 }
 0x56f   :  { %1937 = vst.msk [vmem:[#allocation8 + $0x4] sm:$0x1] %vm1936_vm13, %v1934_v34  ;;  %5083 = vmatpush1.bf16.msra.mxu1 %v6342_v32  ;;  %v6387_v34 = vld [vmem:[#allocation9 + $0x140] ss:$8 sps:$4 sm:$0xff]  }
 0x570   :  { %5084 = vmatprep.subr.bf16.mxu1 %v6350_v33 }
 0x571   :  { %v2351_v37 = vpop.permute.xlu1 %2350 }
 0x572   :  { %v2352_v39 = vrot.slane %v2351_v37, 6  ;;  %v2254_v41 = vpop.permute.xlu0 %2253 }
 0x573   :  { %v2255_v42 = vrot.slane %v2254_v41, 6  ;;  %5085 = vmatpush1.bf16.msra.mxu1 %v6348_v35  ;;  %v6390_v35 = vld [vmem:[#allocation9 + $0x5d0] ss:$8 sps:$4 sm:$0xff]  }
 0x574   :  { %5086 = vmatprep.subr.bf16.mxu1 %v6356_v36  ;;  %v2353_v47 = vsel %vm1856_vm2, %v2352_v39, %v2351_v37  ;;  %v6398_v36 = vld [vmem:[#allocation9 + $0x5e4] ss:$8 sps:$4 sm:$0xff]  }
 0x575   :  { %v2338_v46 = vpop.permute.xlu1 %2337  ;;  %v2256_v51 = vsel %vm1856_vm2, %v2255_v42, %v2254_v41  ;;  %v6393_v42 = vld [vmem:[#allocation9 + $0x150] ss:$8 sps:$4 sm:$0xff]  }
 0x576   :  { %2340 = vst.msk [vmem:[#allocation8 + $0x1e] sm:$0x1] %vm1842_vm3, %v2338_v46  ;;  %v2241_v48 = vpop.permute.xlu0 %2240  ;;  %v3005_v50 = vld [vmem:[#allocation8] sm:$0xff] }
 0x577   :  { %2355 = vst.msk [vmem:[#allocation8 + $0x1e] sm:$0x5] %vm7697_vm4, %v2353_v47  ;;  %5087 = vmatpush1.bf16.msra.mxu1 %v6354_v43  ;;  %v3022_v53 = vrot.slane %v3005_v50, %v7796_v49  ;;  %v3015_v54 = vcombine.high %v3005_v50, %v3005_v50  ;;  %v6396_v43 = vld [vmem:[#allocation9 + $0x5e0] ss:$8 sps:$4 sm:$0xff]   ;;  %v6404_v46 = vld [vmem:[#allocation9 + $0x5f4] ss:$8 sps:$4 sm:$0xff]  }
 0x578   :  { %2243 = vst.msk [vmem:[#allocation8 + $0x18] sm:$0x1] %vm1842_vm3, %v2241_v48  ;;  %5088 = vmatprep.subr.bf16.mxu1 %v6362_v45  ;;  %v6401_v45 = vld [vmem:[#allocation9 + $0x164] ss:$8 sps:$4 sm:$0xff]   ;;  %v6399_v50 = vld [vmem:[#allocation9 + $0x160] ss:$8 sps:$4 sm:$0xff]  }
 0x579   :  { %2258 = vst.msk [vmem:[#allocation8 + $0x18] sm:$0x5] %vm7697_vm4, %v2256_v51  ;;  %v2933_v56 = vpop.permute.xlu1 %2932  ;;  %v3030_v57 = vcombine.high %v3022_v53, %v3022_v53  ;;  %v7844_v58 = vrot.slane %v3015_v54, %v7796_v49  ;;  %v3109_v2 = vpack.c.bf16 %v3022_v53, %v3022_v53  ;;  %v6402_v51 = vld [vmem:[#allocation9 + $0x5f0] ss:$8 sps:$4 sm:$0xff]   ;;  %v6410_v53 = vld [vmem:[#allocation9 + $0x604] ss:$8 sps:$4 sm:$0xff]  }
 0x57a   :  { %v2934_v60 = vrot.slane %v2933_v56, 6  ;;  %v2295_v61 = vpop.permute.xlu0 %2294 }
 0x57b   :  { %5089 = vmatpush1.bf16.msra.mxu1 %v6360_v52  ;;  %v3110_v62 = vpack.c.bf16 %v3030_v57, %v3030_v57  ;;  %v3031_v1 = vcombine.high %v7844_v58, %v7844_v58  ;;  %v2296_v8 = vrot.slane %v2295_v61, 6  ;;  %v6407_v52 = vld [vmem:[#allocation9 + $0x174] ss:$8 sps:$4 sm:$0xff]   ;;  %v6408_v57 = vld [vmem:[#allocation9 + $0x600] ss:$8 sps:$4 sm:$0xff]  }
 0x57c   :  { %5090 = vmatprep.subr.bf16.mxu1 %v6368_v55  ;;  %v2935_v40 = vsel %vm1856_vm2, %v2934_v60, %v2933_v56  ;;  %v6405_v56 = vld [vmem:[#allocation9 + $0x170] ss:$8 sps:$4 sm:$0xff]   ;;  %v3119_v60 = vpack.c.bf16 %v7808_v59, %v7808_v59 }
 0x57d   :  { %4899 = vmatprep.mubr.bf16.mxu0 %v3110_v62  ;;  %v2920_v20 = vpop.permute.xlu1 %2919  ;;  %v3112_v4 = vpack.c.bf16 %v3031_v1, %v3031_v1  ;;  %v2297_v16 = vsel %vm1903_vm8, %v2296_v8, %v2295_v61  ;;  %v6413_v61 = vld [vmem:[#allocation9 + $0x184] ss:$8 sps:$4 sm:$0xff]   ;;  %v6416_v62 = vld [vmem:[#allocation9 + $0x614] ss:$8 sps:$4 sm:$0xff]  }
 0x57e   :  { %2922 = vst.msk [vmem:[#allocation8 + $0x1f] sm:$0x1] %vm1842_vm3, %v2920_v20  ;;  %v2269_v7 = vpop.permute.xlu0 %2268  ;;  %4900 = vmatmul.mubr.bf16.vlgmr.msra.gmra.mrb[28].mxu0 %v3109_v2  ;;  %v6411_v20 = vld [vmem:[#allocation9 + $0x180] ss:$8 sps:$4 sm:$0xff]  }
 0x57f   :  { %2937 = vst.msk [vmem:[#allocation8 + $0x1f] sm:$0x5] %vm7697_vm4, %v2935_v40  ;;  %4909 = vmatpush1.bf16.msra.mxu0 %v6363_v63  ;;  %5091 = vmatpush1.bf16.msra.mxu1 %v6366_v0  ;;  %v6422_v40 = vld [vmem:[#allocation9 + $0x624] ss:$8 sps:$4 sm:$0xff]  }
 0x580   :  { %2271 = vst.msk [vmem:[#allocation8 + $0x1a] sm:$0x1] %vm1875_vm5, %v2269_v7  ;;  %4940 = vmatprep.mubr.bf16.mxu0 %v3112_v4  ;;  %4910 = vmatprep.subr.bf16.mxu0 %v6371_v3  ;;  %v6414_v4 = vld [vmem:[#allocation9 + $0x610] ss:$8 sps:$4 sm:$0xff]  }
 0x581   :  { %5092 = vmatprep.subr.bf16.mxu1 %v6374_v6  ;;  %v2836_v13 = vpop.permute.xlu1 %2835  ;;  %v6419_v6 = vld [vmem:[#allocation9 + $0x194] ss:$8 sps:$4 sm:$0xff]  }
 0x582   :  { %v2837_v14 = vrot.slane %v2836_v13, 6  ;;  %v2282_v15 = vpop.permute.xlu0 %2281 }
 0x583   :  { %2284 = vst.msk [vmem:[#allocation8 + $0x1a] sm:$0x1] %vm1889_vm9, %v2282_v15  ;;  %4911 = vmatpush1.bf16.msra.mxu0 %v6369_v9  ;;  %5093 = vmatpush1.bf16.msra.mxu1 %v6372_v10  ;;  %v6425_v15 = vld [vmem:[#allocation9 + $0x1a4] ss:$8 sps:$4 sm:$0xff]  }
 0x584   :  { %2299 = vst.msk [vmem:[#allocation8 + $0x1a] sm:$0x5] %vm7717_vm10, %v2297_v16  ;;  %4912 = vmatprep.subr.bf16.mxu0 %v6377_v11  ;;  %5094 = vmatprep.subr.bf16.mxu1 %v6380_v12  ;;  %v2838_v24 = vsel %vm1856_vm2, %v2837_v14, %v2836_v13  ;;  %v6417_v12 = vld [vmem:[#allocation9 + $0x190] ss:$8 sps:$4 sm:$0xff]   ;;  %v6420_v13 = vld [vmem:[#allocation9 + $0x620] ss:$8 sps:$4 sm:$0xff]  }
 0x585   :  { %v2823_v23 = vpop.permute.xlu1 %2822  ;;  %v6428_v16 = vld [vmem:[#allocation9 + $0x634] ss:$8 sps:$4 sm:$0xff]  }
 0x586   :  { %2825 = vst.msk [vmem:[#allocation8 + $0x19] sm:$0x1] %vm1842_vm3, %v2823_v23  ;;  %v2310_v25 = vpop.permute.xlu0 %2309  ;;  %v6431_v23 = vld [vmem:[#allocation9 + $0x1b4] ss:$8 sps:$4 sm:$0xff]  }
 0x587   :  { %2840 = vst.msk [vmem:[#allocation8 + $0x19] sm:$0x5] %vm7697_vm4, %v2838_v24  ;;  %4913 = vmatpush1.bf16.msra.mxu0 %v6375_v17  ;;  %5095 = vmatpush1.bf16.msra.mxu1 %v6378_v18  ;;  %v6434_v24 = vld [vmem:[#allocation9 + $0x644] ss:$8 sps:$4 sm:$0xff]  }
 0x588   :  { %2312 = vst.msk [vmem:[#allocation8 + $0x1c] sm:$0x1] %vm1922_vm12, %v2310_v25  ;;  %4914 = vmatprep.subr.bf16.mxu0 %v6383_v21  ;;  %5096 = vmatprep.subr.bf16.mxu1 %v6386_v22  ;;  %v6423_v21 = vld [vmem:[#allocation9 + $0x1a0] ss:$8 sps:$4 sm:$0xff]   ;;  %v6426_v22 = vld [vmem:[#allocation9 + $0x630] ss:$8 sps:$4 sm:$0xff]  }
 0x589   :  { %v2877_v32 = vpop.permute.xlu1 %2876 }
 0x58a   :  { %v2864_v33 = vpop.permute.xlu0 %2863  ;;  %v2878_v29 = vrot.slane %v2877_v32, 6 }
 0x58b   :  { %4915 = vmatpush1.bf16.msra.mxu0 %v6381_v26  ;;  %5097 = vmatpush1.bf16.msra.mxu1 %v6384_v27  ;;  %v6429_v27 = vld [vmem:[#allocation9 + $0x1b0] ss:$8 sps:$4 sm:$0xff]  }
 0x58c   :  { %4916 = vmatprep.subr.bf16.mxu0 %v6389_v28  ;;  %5098 = vmatprep.subr.bf16.mxu1 %v6392_v31  ;;  %v2879_v41 = vsel %vm1903_vm8, %v2878_v29, %v2877_v32  ;;  %v6432_v28 = vld [vmem:[#allocation9 + $0x640] ss:$8 sps:$4 sm:$0xff]   ;;  %v6437_v31 = vld [vmem:[#allocation9 + $0x1c4] ss:$8 sps:$4 sm:$0xff]   ;;  %v6440_v32 = vld [vmem:[#allocation9 + $0x654] ss:$8 sps:$4 sm:$0xff]  }
 0x58d   :  { %v2851_v37 = vpop.permute.xlu1 %2850 }
 0x58e   :  { %2853 = vst.msk [vmem:[#allocation8 + $0x1b] sm:$0x1] %vm1875_vm5, %v2851_v37  ;;  %v2892_v39 = vpop.permute.xlu0 %2891 }
 0x58f   :  { %2866 = vst.msk [vmem:[#allocation8 + $0x1b] sm:$0x1] %vm1889_vm9, %v2864_v33  ;;  %4917 = vmatpush1.bf16.msra.mxu0 %v6387_v34  ;;  %5099 = vmatpush1.bf16.msra.mxu1 %v6390_v35  ;;  %v6435_v34 = vld [vmem:[#allocation9 + $0x1c0] ss:$8 sps:$4 sm:$0xff]   ;;  %v6438_v35 = vld [vmem:[#allocation9 + $0x650] ss:$8 sps:$4 sm:$0xff]  }
 0x590   :  { %2881 = vst.msk [vmem:[#allocation8 + $0x1b] sm:$0x5] %vm7717_vm10, %v2879_v41  ;;  %4918 = vmatprep.subr.bf16.mxu0 %v6395_v5  ;;  %5100 = vmatprep.subr.bf16.mxu1 %v6398_v36  ;;  %v6443_v5 = vld [vmem:[#allocation9 + $0x1d4] ss:$8 sps:$4 sm:$0xff]   ;;  %v6446_v36 = vld [vmem:[#allocation9 + $0x664] ss:$8 sps:$4 sm:$0xff]  }
 0x591   :  { %2894 = vst.msk [vmem:[#allocation8 + $0x1d] sm:$0x1] %vm1922_vm12, %v2892_v39  ;;  %v2905_v47 = vpop.permute.xlu1 %2904 }
 0x592   :  { %2907 = vst.msk [vmem:[#allocation8 + $0x1d] sm:$0x1] %vm1936_vm13, %v2905_v47  ;;  %v2323_v48 = vpop.permute.xlu0 %2322  ;;  %v6452_v47 = vld [vmem:[#allocation9 + $0x674] ss:$8 sps:$4 sm:$0xff]  }
 0x593   :  { %4919 = vmatpush1.bf16.msra.mxu0 %v6393_v42  ;;  %5101 = vmatpush1.bf16.msra.mxu1 %v6396_v43  ;;  %2325 = vst.msk [vmem:[#allocation8 + $0x1c] sm:$0x1] %vm1936_vm13, %v2323_v48  ;;  %v6441_v43 = vld [vmem:[#allocation9 + $0x1d0] ss:$8 sps:$4 sm:$0xff]  }
 0x594   :  { %4920 = vmatprep.subr.bf16.mxu0 %v6401_v45  ;;  %5102 = vmatprep.subr.bf16.mxu1 %v6404_v46  ;;  %v6444_v45 = vld [vmem:[#allocation9 + $0x660] ss:$8 sps:$4 sm:$0xff]   ;;  %v6449_v46 = vld [vmem:[#allocation9 + $0x1e4] ss:$8 sps:$4 sm:$0xff]  }
 0x595   :  { %v2586_v54 = vpop.permute.xlu1 %2585 }
 0x596   :  { %v2004_v55 = vpop.permute.xlu0 %2003  ;;  %v2587_v0 = vrot.slane %v2586_v54, 6 }
 0x597   :  { %4921 = vmatpush1.bf16.msra.mxu0 %v6399_v50  ;;  %5103 = vmatpush1.bf16.msra.mxu1 %v6402_v51  ;;  %v2005_v3 = vrot.slane %v2004_v55, 6 }
 0x598   :  { %4922 = vmatprep.subr.bf16.mxu0 %v6407_v52  ;;  %5113 = vmatprep.subr.bf16.mxu1 %v6410_v53  ;;  %v2588_v9 = vsel %vm1903_vm8, %v2587_v0, %v2586_v54  ;;  %v6447_v54 = vld [vmem:[#allocation9 + $0x1e0] ss:$8 sps:$4 sm:$0xff]  }
 0x599   :  { %v2560_v63 = vpop.permute.xlu1 %2559  ;;  %v2006_v11 = vsel %vm1903_vm8, %v2005_v3, %v2004_v55  ;;  %v6450_v55 = vld [vmem:[#allocation9 + $0x670] ss:$8 sps:$4 sm:$0xff]   ;;  %v6456_v0 = vld [vmem:[#allocation9 + $0x680] ss:$8 sps:$4 sm:$0xff]  }
 0x59a   :  { %5105 = vmatmul.mubr.bf16.vlgmr.msra.gmra.mrb[28].mxu1 %v3119_v60  ;;  %2562 = vst.msk [vmem:[#allocation8 + $0x9] sm:$0x1] %vm1875_vm5, %v2560_v63  ;;  %v1978_v1 = vpop.permute.xlu0 %1977  ;;  %v7873_v2 = vld [vmem:[#allocation8 + $0x18] sm:$0xff] }
 0x59b   :  { %4923 = vmatpush1.bf16.msra.mxu0 %v6405_v56  ;;  %5114 = vmatpush1.bf16.msra.mxu1 %v6408_v57  ;;  %1980 = vst.msk [vmem:[#allocation8 + $0x8] sm:$0x1] %vm1875_vm5, %v1978_v1  ;;  %v7878_v59 = vrot.slane %v7873_v2, %v7796_v49  ;;  %v6455_v56 = vld [vmem:[#allocation9 + $0x1f4] ss:$8 sps:$4 sm:$0xff]   ;;  %v6458_v57 = vld [vmem:[#allocation9 + $0x684] ss:$8 sps:$4 sm:$0xff]  }
 0x59c   :  { %4924 = vmatprep.subr.bf16.mxu0 %v6413_v61  ;;  %5115 = vmatprep.subr.bf16.mxu1 %v6416_v62  ;;  %v6453_v63 = vld [vmem:[#allocation9 + $0x1f0] ss:$8 sps:$4 sm:$0xff]   ;;  %v6464_v1 = vld [vmem:[#allocation9 + $0x694] ss:$8 sps:$4 sm:$0xff]  }
 0x59d   :  { %v2573_v7 = vpop.permute.xlu1 %2572  ;;  %v3081_v8 = vcombine.high %v7878_v59, %v7878_v59 }
 0x59e   :  { %2575 = vst.msk [vmem:[#allocation8 + $0x9] sm:$0x1] %vm1889_vm9, %v2573_v7  ;;  %v1991_v10 = vpop.permute.xlu0 %1990  ;;  %v6462_v7 = vld [vmem:[#allocation9 + $0x690] ss:$8 sps:$4 sm:$0xff]  }
 0x59f   :  { %2590 = vst.msk [vmem:[#allocation8 + $0x9] sm:$0x5] %vm7717_vm10, %v2588_v9  ;;  %4925 = vmatpush1.bf16.msra.mxu0 %v6411_v20  ;;  %5116 = vmatpush1.bf16.msra.mxu1 %v6414_v4  ;;  %v3122_v14 = vpack.c.bf16 %v3081_v8, %v3081_v8  ;;  %v6467_v8 = vld [vmem:[#allocation9 + $0x214] ss:$8 sps:$4 sm:$0xff]  }
 0x5a0   :  { %1993 = vst.msk [vmem:[#allocation8 + $0x8] sm:$0x1] %vm1889_vm9, %v1991_v10  ;;  %4926 = vmatprep.subr.bf16.mxu0 %v6419_v6  ;;  %5117 = vmatprep.subr.bf16.mxu1 %v6422_v40  ;;  %v6459_v6 = vld [vmem:[#allocation9 + $0x200] ss:$8 sps:$4 sm:$0xff]   ;;  %v3111_v40 = vpack.c.bf16 %v7844_v58, %v7844_v58  ;;  %v6470_v10 = vld [vmem:[#allocation9 + $0x6a4] ss:$8 sps:$4 sm:$0xff]  }
 0x5a1   :  { %2008 = vst.msk [vmem:[#allocation8 + $0x8] sm:$0x5] %vm7717_vm10, %v2006_v11  ;;  %v2601_v17 = vpop.permute.xlu1 %2600  ;;  %5145 = vmatprep.mubr.bf16.mxu1 %v3122_v14  ;;  %v6465_v11 = vld [vmem:[#allocation9 + $0x210] ss:$8 sps:$4 sm:$0xff]   ;;  %v6476_v14 = vld [vmem:[#allocation9 + $0x6b4] ss:$8 sps:$4 sm:$0xff]  }
 0x5a2   :  { %2603 = vst.msk [vmem:[#allocation8 + $0xb] sm:$0x1] %vm1922_vm12, %v2601_v17  ;;  %v2019_v18 = vpop.permute.xlu0 %2018  ;;  %v6474_v58 = vld [vmem:[#allocation9 + $0x6b0] ss:$8 sps:$4 sm:$0xff]   ;;  %v6482_v17 = vld [vmem:[#allocation9 + $0x6c4] ss:$8 sps:$4 sm:$0xff]  }
 0x5a3   :  { %4927 = vmatpush1.bf16.msra.mxu0 %v6417_v12  ;;  %5118 = vmatpush1.bf16.msra.mxu1 %v6420_v13  ;;  %2021 = vst.msk [vmem:[#allocation8 + $0xa] sm:$0x1] %vm1922_vm12, %v2019_v18  ;;  %v6468_v12 = vld [vmem:[#allocation9 + $0x6a0] ss:$8 sps:$4 sm:$0xff]   ;;  %v6473_v13 = vld [vmem:[#allocation9 + $0x224] ss:$8 sps:$4 sm:$0xff]  }
 0x5a4   :  { %4928 = vmatprep.subr.bf16.mxu0 %v6425_v15  ;;  %5119 = vmatprep.subr.bf16.mxu1 %v6428_v16  ;;  %v6471_v15 = vld [vmem:[#allocation9 + $0x220] ss:$8 sps:$4 sm:$0xff]   ;;  %v6479_v16 = vld [vmem:[#allocation9 + $0x234] ss:$8 sps:$4 sm:$0xff]   ;;  %v6477_v18 = vld [vmem:[#allocation9 + $0x230] ss:$8 sps:$4 sm:$0xff]  }
 0x5a5   :  { %v2614_v25 = vpop.permute.xlu1 %2613 }
 0x5a6   :  { %2616 = vst.msk [vmem:[#allocation8 + $0xb] sm:$0x1] %vm1936_vm13, %v2614_v25  ;;  %v2032_v26 = vpop.permute.xlu0 %2031  ;;  %v6486_v25 = vld [vmem:[#allocation9 + $0x6d0] ss:$8 sps:$4 sm:$0xff]  }
 0x5a7   :  { %4929 = vmatpush1.bf16.msra.mxu0 %v6423_v21  ;;  %5120 = vmatpush1.bf16.msra.mxu1 %v6426_v22  ;;  %2034 = vst.msk [vmem:[#allocation8 + $0xa] sm:$0x1] %vm1936_vm13, %v2032_v26  ;;  %v6480_v21 = vld [vmem:[#allocation9 + $0x6c0] ss:$8 sps:$4 sm:$0xff]   ;;  %v6485_v22 = vld [vmem:[#allocation9 + $0x244] ss:$8 sps:$4 sm:$0xff]  }
 0x5a8   :  { %4930 = vmatprep.subr.bf16.mxu0 %v6431_v23  ;;  %5121 = vmatprep.subr.bf16.mxu1 %v6434_v24  ;;  %v6488_v23 = vld [vmem:[#allocation9 + $0x6d4] ss:$8 sps:$4 sm:$0xff]   ;;  %v6483_v24 = vld [vmem:[#allocation9 + $0x240] ss:$8 sps:$4 sm:$0xff]  }
 0x5a9   :  { %v2974_v33 = vpop.permute.xlu1 %2973  ;;  %v6491_v26 = vld [vmem:[#allocation9 + $0x254] ss:$8 sps:$4 sm:$0xff]  }
 0x5aa   :  { %v2392_v29 = vpop.permute.xlu0 %2391  ;;  %v2975_v39 = vrot.slane %v2974_v33, 6 }
 0x5ab   :  { %4931 = vmatpush1.bf16.msra.mxu0 %v6429_v27  ;;  %5122 = vmatpush1.bf16.msra.mxu1 %v6432_v28  ;;  %v2393_v42 = vrot.slane %v2392_v29, 6  ;;  %v6494_v27 = vld [vmem:[#allocation9 + $0x6e4] ss:$8 sps:$4 sm:$0xff]   ;;  %v3066_v28 = vcombine.high %v7873_v2, %v7873_v2 }
 0x5ac   :  { %4932 = vmatprep.subr.bf16.mxu0 %v6437_v31  ;;  %5123 = vmatprep.subr.bf16.mxu1 %v6440_v32  ;;  %v2976_v50 = vsel %vm1903_vm8, %v2975_v39, %v2974_v33  ;;  %v6489_v31 = vld [vmem:[#allocation9 + $0x250] ss:$8 sps:$4 sm:$0xff]   ;;  %v6492_v32 = vld [vmem:[#allocation9 + $0x6e0] ss:$8 sps:$4 sm:$0xff]   ;;  %v6497_v33 = vld [vmem:[#allocation9 + $0x264] ss:$8 sps:$4 sm:$0xff]  }
 0x5ad   :  { %v2948_v37 = vpop.permute.xlu1 %2947  ;;  %v2394_v53 = vsel %vm1903_vm8, %v2393_v42, %v2392_v29  ;;  %v6500_v29 = vld [vmem:[#allocation9 + $0x6f4] ss:$8 sps:$4 sm:$0xff]   ;;  %v6501_v39 = vld [vmem:[#allocation9 + $0x270] ss:$8 sps:$4 sm:$0xff]   ;;  %v3121_v42 = vpack.c.bf16 %v7878_v59, %v7878_v59  ;;  %v6521_v59 = vld [vmem:[#allocation9 + $0x2a4] ss:$8 sps:$4 sm:$0xff]  }
 0x5ae   :  { %2950 = vst.msk [vmem:[#allocation8 + $0x21] sm:$0x1] %vm1875_vm5, %v2948_v37  ;;  %v2366_v41 = vpop.permute.xlu0 %2365  ;;  %v7898_v52 = vld [vmem:[#allocation8 + $0x8] sm:$0xff] }
 0x5af   :  { %4933 = vmatpush1.bf16.msra.mxu0 %v6435_v34  ;;  %5124 = vmatpush1.bf16.msra.mxu1 %v6438_v35  ;;  %2368 = vst.msk [vmem:[#allocation8 + $0x20] sm:$0x1] %vm1875_vm5, %v2366_v41  ;;  %v7908_v61 = vrot.slane %v7898_v52, %v7796_v49  ;;  %v7921_v34 = vrot.slane %v3066_v28, %v7796_v49  ;;  %v6495_v35 = vld [vmem:[#allocation9 + $0x260] ss:$8 sps:$4 sm:$0xff]   ;;  %v6506_v37 = vld [vmem:[#allocation9 + $0x704] ss:$8 sps:$4 sm:$0xff]  }
 0x5b0   :  { %4934 = vmatprep.subr.bf16.mxu0 %v6443_v5  ;;  %5125 = vmatprep.subr.bf16.mxu1 %v6446_v36  ;;  %v6498_v5 = vld [vmem:[#allocation9 + $0x6f0] ss:$8 sps:$4 sm:$0xff]   ;;  %v6503_v36 = vld [vmem:[#allocation9 + $0x274] ss:$8 sps:$4 sm:$0xff]   ;;  %v6504_v41 = vld [vmem:[#allocation9 + $0x700] ss:$8 sps:$4 sm:$0xff]  }
 0x5b1   :  { %v2961_v48 = vpop.permute.xlu1 %2960  ;;  %v3047_v20 = vcombine.high %v7908_v61, %v7908_v61  ;;  %v3082_v2 = vcombine.high %v7921_v34, %v7921_v34  ;;  %v6570_v28 = vld [vmem:[#allocation9 + $0x324] ss:$8 sps:$4 sm:$0xff]  }
 0x5b2   :  { %2963 = vst.msk [vmem:[#allocation8 + $0x21] sm:$0x1] %vm1889_vm9, %v2961_v48  ;;  %v2379_v51 = vpop.permute.xlu0 %2378  ;;  %v6510_v48 = vld [vmem:[#allocation9 + $0x710] ss:$8 sps:$4 sm:$0xff]  }
 0x5b3   :  { %2978 = vst.msk [vmem:[#allocation8 + $0x21] sm:$0x5] %vm7717_vm10, %v2976_v50  ;;  %4935 = vmatpush1.bf16.msra.mxu0 %v6441_v43  ;;  %5126 = vmatpush1.bf16.msra.mxu1 %v6444_v45  ;;  %v3114_v9 = vpack.c.bf16 %v3047_v20, %v3047_v20  ;;  %v6509_v43 = vld [vmem:[#allocation9 + $0x284] ss:$8 sps:$4 sm:$0xff]   ;;  %v6512_v45 = vld [vmem:[#allocation9 + $0x714] ss:$8 sps:$4 sm:$0xff]  }
 0x5b4   :  { %2381 = vst.msk [vmem:[#allocation8 + $0x20] sm:$0x1] %vm1889_vm9, %v2379_v51  ;;  %4936 = vmatprep.subr.bf16.mxu0 %v6449_v46  ;;  %5127 = vmatprep.subr.bf16.mxu1 %v6452_v47  ;;  %v3124_v46 = vpack.c.bf16 %v3082_v2, %v3082_v2  ;;  %v6507_v47 = vld [vmem:[#allocation9 + $0x280] ss:$8 sps:$4 sm:$0xff]   ;;  %v6515_v50 = vld [vmem:[#allocation9 + $0x294] ss:$8 sps:$4 sm:$0xff]  }
 0x5b5   :  { %2396 = vst.msk [vmem:[#allocation8 + $0x20] sm:$0x5] %vm7717_vm10, %v2394_v53  ;;  %v2989_v60 = vpop.permute.xlu1 %2988  ;;  %v6518_v51 = vld [vmem:[#allocation9 + $0x724] ss:$8 sps:$4 sm:$0xff]   ;;  %v6513_v53 = vld [vmem:[#allocation9 + $0x290] ss:$8 sps:$4 sm:$0xff]  }
 0x5b6   :  { %2991 = vst.msk [vmem:[#allocation8 + $0x23] sm:$0x1] %vm1922_vm12, %v2989_v60  ;;  %v2407_v62 = vpop.permute.xlu0 %2406  ;;  %v6527_v60 = vld [vmem:[#allocation9 + $0x2b4] ss:$8 sps:$4 sm:$0xff]   ;;  %v6534_v20 = vld [vmem:[#allocation9 + $0x750] ss:$8 sps:$4 sm:$0xff]  }
 0x5b7   :  { %4937 = vmatpush1.bf16.msra.mxu0 %v6447_v54  ;;  %5128 = vmatpush1.bf16.msra.mxu1 %v6450_v55  ;;  %2409 = vst.msk [vmem:[#allocation8 + $0x22] sm:$0x1] %vm1922_vm12, %v2407_v62  ;;  %v6516_v54 = vld [vmem:[#allocation9 + $0x720] ss:$8 sps:$4 sm:$0xff]   ;;  %v6524_v55 = vld [vmem:[#allocation9 + $0x734] ss:$8 sps:$4 sm:$0xff]  }
 0x5b8   :  { %4938 = vmatprep.subr.bf16.mxu0 %v6455_v56  ;;  %5129 = vmatprep.subr.bf16.mxu1 %v6458_v57  ;;  %v6519_v56 = vld [vmem:[#allocation9 + $0x2a0] ss:$8 sps:$4 sm:$0xff]   ;;  %v6522_v57 = vld [vmem:[#allocation9 + $0x730] ss:$8 sps:$4 sm:$0xff]   ;;  %v6530_v62 = vld [vmem:[#allocation9 + $0x744] ss:$8 sps:$4 sm:$0xff]  }
 0x5b9   :  { %v3002_v3 = vpop.permute.xlu1 %3001  ;;  %v6580_v2 = vld [vmem:[#allocation9 + $0x340] ss:$8 sps:$4 sm:$0xff]  }
 0x5ba   :  { %3004 = vst.msk [vmem:[#allocation8 + $0x23] sm:$0x1] %vm1936_vm13, %v3002_v3  ;;  %v2420_v4 = vpop.permute.xlu0 %2419  ;;  %v6531_v3 = vld [vmem:[#allocation9 + $0x2c0] ss:$8 sps:$4 sm:$0xff]  }
 0x5bb   :  { %4939 = vmatpush1.bf16.msra.mxu0 %v6453_v63  ;;  %5130 = vmatpush1.bf16.msra.mxu1 %v6456_v0  ;;  %2422 = vst.msk [vmem:[#allocation8 + $0x22] sm:$0x1] %vm1936_vm13, %v2420_v4  ;;  %v6525_v63 = vld [vmem:[#allocation9 + $0x2b0] ss:$8 sps:$4 sm:$0xff]   ;;  %v6528_v0 = vld [vmem:[#allocation9 + $0x740] ss:$8 sps:$4 sm:$0xff]  }
 0x5bc   :  { %4949 = vmatprep.subr.bf16.mxu0 %v6461_v30  ;;  %5131 = vmatprep.subr.bf16.mxu1 %v6464_v1  ;;  %v6533_v30 = vld [vmem:[#allocation9 + $0x2c4] ss:$8 sps:$4 sm:$0xff]   ;;  %v6536_v1 = vld [vmem:[#allocation9 + $0x754] ss:$8 sps:$4 sm:$0xff]  }
 0x5bd   :  { %v6539_v4 = vld [vmem:[#allocation9 + $0x2d4] ss:$8 sps:$4 sm:$0xff]  }
 0x5be   :  { %4941 = vmatmul.mubr.bf16.vlgmr.msra.gmra.mrb[28].mxu0 %v3111_v40  ;;  %v6537_v40 = vld [vmem:[#allocation9 + $0x2d0] ss:$8 sps:$4 sm:$0xff]  }
 0x5bf   :  { %4950 = vmatpush1.bf16.msra.mxu0 %v6459_v6  ;;  %4981 = vmatprep.mubr.bf16.mxu0 %v3114_v9  ;;  %v6542_v6 = vld [vmem:[#allocation9 + $0x764] ss:$8 sps:$4 sm:$0xff]   ;;  %v6548_v9 = vld [vmem:[#allocation9 + $0x774] ss:$8 sps:$4 sm:$0xff]  }
 0x5c0   :  { %5132 = vmatpush1.bf16.msra.mxu1 %v6462_v7  ;;  %4951 = vmatprep.subr.bf16.mxu0 %v6467_v8  ;;  %v6540_v7 = vld [vmem:[#allocation9 + $0x760] ss:$8 sps:$4 sm:$0xff]   ;;  %v6545_v8 = vld [vmem:[#allocation9 + $0x2e4] ss:$8 sps:$4 sm:$0xff]  }
 0x5c1   :  { %5133 = vmatprep.subr.bf16.mxu1 %v6470_v10  ;;  %v3032_v10 = vcombine.high %v7898_v52, %v7898_v52 }
 0x5c3   :  { %4952 = vmatpush1.bf16.msra.mxu0 %v6465_v11  ;;  %v6543_v11 = vld [vmem:[#allocation9 + $0x2e0] ss:$8 sps:$4 sm:$0xff]  }
 0x5c4   :  { %5134 = vmatpush1.bf16.msra.mxu1 %v6468_v12  ;;  %4953 = vmatprep.subr.bf16.mxu0 %v6473_v13  ;;  %v6546_v12 = vld [vmem:[#allocation9 + $0x770] ss:$8 sps:$4 sm:$0xff]   ;;  %v6551_v13 = vld [vmem:[#allocation9 + $0x2f4] ss:$8 sps:$4 sm:$0xff]  }
 0x5c5   :  { %5135 = vmatprep.subr.bf16.mxu1 %v6476_v14  ;;  %v6554_v14 = vld [vmem:[#allocation9 + $0x784] ss:$8 sps:$4 sm:$0xff]  }
 0x5c7   :  { %4954 = vmatpush1.bf16.msra.mxu0 %v6471_v15  ;;  %v7930_v15 = vrot.slane %v3032_v10, %v7796_v49  ;;  %v6558_v49 = vld [vmem:[#allocation9 + $0x790] ss:$8 sps:$4 sm:$0xff]  }
 0x5c8   :  { %5136 = vmatpush1.bf16.msra.mxu1 %v6474_v58  ;;  %4955 = vmatprep.subr.bf16.mxu0 %v6479_v16  ;;  %v6549_v58 = vld [vmem:[#allocation9 + $0x2f0] ss:$8 sps:$4 sm:$0xff]   ;;  %v6552_v16 = vld [vmem:[#allocation9 + $0x780] ss:$8 sps:$4 sm:$0xff]  }
 0x5c9   :  { %5137 = vmatprep.subr.bf16.mxu1 %v6482_v17  ;;  %v6557_v17 = vld [vmem:[#allocation9 + $0x304] ss:$8 sps:$4 sm:$0xff]   ;;  %v3048_v52 = vcombine.high %v7930_v15, %v7930_v15  ;;  %v6622_v10 = vld [vmem:[#allocation9 + $0x3b0] ss:$8 sps:$4 sm:$0xff]  }
 0x5cb   :  { %4956 = vmatpush1.bf16.msra.mxu0 %v6477_v18  ;;  %v6560_v18 = vld [vmem:[#allocation9 + $0x794] ss:$8 sps:$4 sm:$0xff]  }
 0x5cc   :  { %5138 = vmatpush1.bf16.msra.mxu1 %v6480_v21  ;;  %4957 = vmatprep.subr.bf16.mxu0 %v6485_v22  ;;  %v6555_v21 = vld [vmem:[#allocation9 + $0x300] ss:$8 sps:$4 sm:$0xff]   ;;  %v3113_v22 = vpack.c.bf16 %v7908_v61, %v7908_v61  ;;  %v6571_v61 = vld [vmem:[#allocation9 + $0x7b0] ss:$8 sps:$4 sm:$0xff]  }
 0x5cd   :  { %5139 = vmatprep.subr.bf16.mxu1 %v6488_v23  ;;  %v6564_v23 = vld [vmem:[#allocation9 + $0x314] ss:$8 sps:$4 sm:$0xff]  }
 0x5cf   :  { %4958 = vmatpush1.bf16.msra.mxu0 %v6483_v24  ;;  %v3116_v24 = vpack.c.bf16 %v3048_v52, %v3048_v52  ;;  %v6637_v52 = vld [vmem:[#allocation9 + $0x860] ss:$8 sps:$4 sm:$0xff]  }
 0x5d0   :  { %5140 = vmatpush1.bf16.msra.mxu1 %v6486_v25  ;;  %4959 = vmatprep.subr.bf16.mxu0 %v6491_v26  ;;  %v6567_v25 = vld [vmem:[#allocation9 + $0x7a4] ss:$8 sps:$4 sm:$0xff]   ;;  %v6562_v26 = vld [vmem:[#allocation9 + $0x310] ss:$8 sps:$4 sm:$0xff]  }
 0x5d1   :  { %5141 = vmatprep.subr.bf16.mxu1 %v6494_v27  ;;  %v6565_v27 = vld [vmem:[#allocation9 + $0x7a0] ss:$8 sps:$4 sm:$0xff]  }
 0x5d3   :  { %4960 = vmatpush1.bf16.msra.mxu0 %v6489_v31  ;;  %v6573_v31 = vld [vmem:[#allocation9 + $0x7b4] ss:$8 sps:$4 sm:$0xff]  }
 0x5d4   :  { %5142 = vmatpush1.bf16.msra.mxu1 %v6492_v32  ;;  %4961 = vmatprep.subr.bf16.mxu0 %v6497_v33  ;;  %v6568_v32 = vld [vmem:[#allocation9 + $0x320] ss:$8 sps:$4 sm:$0xff]   ;;  %v6576_v33 = vld [vmem:[#allocation9 + $0x334] ss:$8 sps:$4 sm:$0xff]  }
 0x5d5   :  { %5143 = vmatprep.subr.bf16.mxu1 %v6500_v29  ;;  %v6579_v29 = vld [vmem:[#allocation9 + $0x7c4] ss:$8 sps:$4 sm:$0xff]  }
 0x5d7   :  { %4962 = vmatpush1.bf16.msra.mxu0 %v6495_v35  ;;  %v6574_v35 = vld [vmem:[#allocation9 + $0x330] ss:$8 sps:$4 sm:$0xff]  }
 0x5d8   :  { %5144 = vmatpush1.bf16.msra.mxu1 %v6498_v5  ;;  %4963 = vmatprep.subr.bf16.mxu0 %v6503_v36  ;;  %v6577_v5 = vld [vmem:[#allocation9 + $0x7c0] ss:$8 sps:$4 sm:$0xff]   ;;  %v6582_v36 = vld [vmem:[#allocation9 + $0x344] ss:$8 sps:$4 sm:$0xff]  }
 0x5d9   :  { %5154 = vmatprep.subr.bf16.mxu1 %v6506_v37  ;;  %v6585_v37 = vld [vmem:[#allocation9 + $0x7d4] ss:$8 sps:$4 sm:$0xff]  }
 0x5db   :  { %5146 = vmatmul.mubr.bf16.vlgmr.msra.gmra.mrb[28].mxu1 %v3121_v42  ;;  %4964 = vmatpush1.bf16.msra.mxu0 %v6501_v39  ;;  %v6583_v39 = vld [vmem:[#allocation9 + $0x7d0] ss:$8 sps:$4 sm:$0xff]   ;;  %v6591_v42 = vld [vmem:[#allocation9 + $0x7e4] ss:$8 sps:$4 sm:$0xff]  }
 0x5dc   :  { %5155 = vmatpush1.bf16.msra.mxu1 %v6504_v41  ;;  %5186 = vmatprep.mubr.bf16.mxu1 %v3124_v46  ;;  %v6588_v41 = vld [vmem:[#allocation9 + $0x354] ss:$8 sps:$4 sm:$0xff]   ;;  %v6594_v46 = vld [vmem:[#allocation9 + $0x364] ss:$8 sps:$4 sm:$0xff]  }
 0x5dd   :  { %4965 = vmatprep.subr.bf16.mxu0 %v6509_v43  ;;  %5156 = vmatprep.subr.bf16.mxu1 %v6512_v45  ;;  %v6586_v43 = vld [vmem:[#allocation9 + $0x350] ss:$8 sps:$4 sm:$0xff]   ;;  %v6589_v45 = vld [vmem:[#allocation9 + $0x7e0] ss:$8 sps:$4 sm:$0xff]  }
 0x5df   :  { %4966 = vmatpush1.bf16.msra.mxu0 %v6507_v47  ;;  %v6597_v47 = vld [vmem:[#allocation9 + $0x7f4] ss:$8 sps:$4 sm:$0xff]  }
 0x5e0   :  { %5157 = vmatpush1.bf16.msra.mxu1 %v6510_v48  ;;  %4967 = vmatprep.subr.bf16.mxu0 %v6515_v50  ;;  %v6592_v48 = vld [vmem:[#allocation9 + $0x360] ss:$8 sps:$4 sm:$0xff]   ;;  %v7936_v50 = vld.sshfl [vmem:[#allocation8 + $0x20] sm:$0x33 pattern:$0x76325410] }
 0x5e1   :  { %5158 = vmatprep.subr.bf16.mxu1 %v6518_v51  ;;  %v6595_v51 = vld [vmem:[#allocation9 + $0x7f0] ss:$8 sps:$4 sm:$0xff]  }
 0x5e3   :  { %4968 = vmatpush1.bf16.msra.mxu0 %v6513_v53  ;;  %v6600_v53 = vld [vmem:[#allocation9 + $0x374] ss:$8 sps:$4 sm:$0xff]  }
 0x5e4   :  { %5159 = vmatpush1.bf16.msra.mxu1 %v6516_v54  ;;  %4969 = vmatprep.subr.bf16.mxu0 %v6521_v59  ;;  %v6603_v54 = vld [vmem:[#allocation9 + $0x804] ss:$8 sps:$4 sm:$0xff]   ;;  %v3090_v59 = vcombine.high %v7936_v50, %v7936_v50 }
 0x5e5   :  { %5160 = vmatprep.subr.bf16.mxu1 %v6524_v55  ;;  %v6598_v55 = vld [vmem:[#allocation9 + $0x370] ss:$8 sps:$4 sm:$0xff]  }
 0x5e7   :  { %4970 = vmatpush1.bf16.msra.mxu0 %v6519_v56  ;;  %v6601_v56 = vld [vmem:[#allocation9 + $0x800] ss:$8 sps:$4 sm:$0xff]  }
 0x5e8   :  { %5161 = vmatpush1.bf16.msra.mxu1 %v6522_v57  ;;  %4971 = vmatprep.subr.bf16.mxu0 %v6527_v60  ;;  %v3123_v57 = vpack.c.bf16 %v7921_v34, %v7921_v34  ;;  %v6606_v60 = vld [vmem:[#allocation9 + $0x384] ss:$8 sps:$4 sm:$0xff]  }
 0x5e9   :  { %5162 = vmatprep.subr.bf16.mxu1 %v6530_v62  ;;  %v6609_v62 = vld [vmem:[#allocation9 + $0x814] ss:$8 sps:$4 sm:$0xff]   ;;  %v6618_v34 = vld [vmem:[#allocation9 + $0x3a4] ss:$8 sps:$4 sm:$0xff]  }
 0x5eb   :  { %4972 = vmatpush1.bf16.msra.mxu0 %v6525_v63  ;;  %v3126_v63 = vpack.c.bf16 %v3090_v59, %v3090_v59 }
 0x5ec   :  { %5163 = vmatpush1.bf16.msra.mxu1 %v6528_v0  ;;  %4973 = vmatprep.subr.bf16.mxu0 %v6533_v30  ;;  %v6604_v0 = vld [vmem:[#allocation9 + $0x380] ss:$8 sps:$4 sm:$0xff]   ;;  %v6607_v30 = vld [vmem:[#allocation9 + $0x810] ss:$8 sps:$4 sm:$0xff]  }
 0x5ed   :  { %5164 = vmatprep.subr.bf16.mxu1 %v6536_v1  ;;  %v6612_v1 = vld [vmem:[#allocation9 + $0x394] ss:$8 sps:$4 sm:$0xff]  }
 0x5ef   :  { %4974 = vmatpush1.bf16.msra.mxu0 %v6531_v3  ;;  %v6615_v3 = vld [vmem:[#allocation9 + $0x824] ss:$8 sps:$4 sm:$0xff]  }
 0x5f0   :  { %5165 = vmatpush1.bf16.msra.mxu1 %v6534_v20  ;;  %4975 = vmatprep.subr.bf16.mxu0 %v6539_v4  ;;  %v6610_v20 = vld [vmem:[#allocation9 + $0x390] ss:$8 sps:$4 sm:$0xff]   ;;  %v6613_v4 = vld [vmem:[#allocation9 + $0x820] ss:$8 sps:$4 sm:$0xff]  }
 0x5f1   :  { %5166 = vmatprep.subr.bf16.mxu1 %v6542_v6  ;;  %v6621_v6 = vld [vmem:[#allocation9 + $0x834] ss:$8 sps:$4 sm:$0xff]  }
 0x5f3   :  { %4976 = vmatpush1.bf16.msra.mxu0 %v6537_v40  ;;  %v6616_v40 = vld [vmem:[#allocation9 + $0x3a0] ss:$8 sps:$4 sm:$0xff]  }
 0x5f4   :  { %5167 = vmatpush1.bf16.msra.mxu1 %v6540_v7  ;;  %4977 = vmatprep.subr.bf16.mxu0 %v6545_v8  ;;  %v6619_v7 = vld [vmem:[#allocation9 + $0x830] ss:$8 sps:$4 sm:$0xff]   ;;  %v6624_v8 = vld [vmem:[#allocation9 + $0x3b4] ss:$8 sps:$4 sm:$0xff]  }
 0x5f5   :  { %5168 = vmatprep.subr.bf16.mxu1 %v6548_v9  ;;  %v6627_v9 = vld [vmem:[#allocation9 + $0x844] ss:$8 sps:$4 sm:$0xff]  }
 0x5f7   :  { %4978 = vmatpush1.bf16.msra.mxu0 %v6543_v11  ;;  %v6625_v11 = vld [vmem:[#allocation9 + $0x840] ss:$8 sps:$4 sm:$0xff]  }
 0x5f8   :  { %5169 = vmatpush1.bf16.msra.mxu1 %v6546_v12  ;;  %4979 = vmatprep.subr.bf16.mxu0 %v6551_v13  ;;  %v6630_v12 = vld [vmem:[#allocation9 + $0x3c4] ss:$8 sps:$4 sm:$0xff]   ;;  %v6633_v13 = vld [vmem:[#allocation9 + $0x854] ss:$8 sps:$4 sm:$0xff]  }
 0x5f9   :  { %5170 = vmatprep.subr.bf16.mxu1 %v6554_v14  ;;  %v6628_v14 = vld [vmem:[#allocation9 + $0x3c0] ss:$8 sps:$4 sm:$0xff]  }
 0x5fb   :  { %4980 = vmatpush1.bf16.msra.mxu0 %v6549_v58  ;;  %v6631_v58 = vld [vmem:[#allocation9 + $0x850] ss:$8 sps:$4 sm:$0xff]  }
 0x5fc   :  { %5171 = vmatpush1.bf16.msra.mxu1 %v6552_v16  ;;  %4990 = vmatprep.subr.bf16.mxu0 %v6557_v17  ;;  %v6636_v16 = vld [vmem:[#allocation9 + $0x3d4] ss:$8 sps:$4 sm:$0xff]   ;;  %v6639_v17 = vld [vmem:[#allocation9 + $0x864] ss:$8 sps:$4 sm:$0xff]  }
 0x5fd   :  { %5172 = vmatprep.subr.bf16.mxu1 %v6560_v18  ;;  %v6634_v18 = vld [vmem:[#allocation9 + $0x3d0] ss:$8 sps:$4 sm:$0xff]  }
 0x5fe   :  { %4982 = vmatmul.mubr.bf16.vlgmr.msra.gmra.mrb[28].mxu0 %v3113_v22  ;;  %v6645_v22 = vld [vmem:[#allocation9 + $0x874] ss:$8 sps:$4 sm:$0xff]  }
 0x5ff   :  { %4991 = vmatpush1.bf16.msra.mxu0 %v6555_v21  ;;  %5022 = vmatprep.mubr.bf16.mxu0 %v3116_v24  ;;  %v6642_v21 = vld [vmem:[#allocation9 + $0x3e4] ss:$8 sps:$4 sm:$0xff]   ;;  %v6648_v24 = vld [vmem:[#allocation9 + $0x3f4] ss:$8 sps:$4 sm:$0xff]  }
 0x600   :  { %5173 = vmatpush1.bf16.msra.mxu1 %v6558_v49  ;;  %4992 = vmatprep.subr.bf16.mxu0 %v6564_v23  ;;  %v6640_v49 = vld [vmem:[#allocation9 + $0x3e0] ss:$8 sps:$4 sm:$0xff]   ;;  %v6643_v23 = vld [vmem:[#allocation9 + $0x870] ss:$8 sps:$4 sm:$0xff]  }
 0x601   :  { %5174 = vmatprep.subr.bf16.mxu1 %v6567_v25  ;;  %v6651_v25 = vld [vmem:[#allocation9 + $0x884] ss:$8 sps:$4 sm:$0xff]  }
 0x603   :  { %4993 = vmatpush1.bf16.msra.mxu0 %v6562_v26  ;;  %v6646_v26 = vld [vmem:[#allocation9 + $0x3f0] ss:$8 sps:$4 sm:$0xff]  }
 0x604   :  { %5175 = vmatpush1.bf16.msra.mxu1 %v6565_v27  ;;  %4994 = vmatprep.subr.bf16.mxu0 %v6570_v28  ;;  %v6649_v27 = vld [vmem:[#allocation9 + $0x880] ss:$8 sps:$4 sm:$0xff]   ;;  %v6654_v28 = vld [vmem:[#allocation9 + $0x894] ss:$8 sps:$4 sm:$0xff]  }
 0x605   :  { %5176 = vmatprep.subr.bf16.mxu1 %v6573_v31  ;;  %v3115_v31 = vpack.c.bf16 %v7930_v15, %v7930_v15  ;;  %v6669_v15 = vld [vmem:[#allocation9 + $0x8e4] ss:$8 sps:$4 sm:$0xff]  }
 0x607   :  { %4995 = vmatpush1.bf16.msra.mxu0 %v6568_v32  ;;  %v6652_v32 = vld [vmem:[#allocation9 + $0x890] ss:$8 sps:$4 sm:$0xff]  }
 0x608   :  { %5177 = vmatpush1.bf16.msra.mxu1 %v6571_v61  ;;  %4996 = vmatprep.subr.bf16.mxu0 %v6576_v33  ;;  %v6657_v61 = vld [vmem:[#allocation9 + $0x8a4] ss:$8 sps:$4 sm:$0xff]   ;;  %v6655_v33 = vld [vmem:[#allocation9 + $0x8a0] ss:$8 sps:$4 sm:$0xff]  }
 0x609   :  { %5178 = vmatprep.subr.bf16.mxu1 %v6579_v29  ;;  %v6660_v29 = vld [vmem:[#allocation9 + $0x8b4] ss:$8 sps:$4 sm:$0xff]  }
 0x60b   :  { %4997 = vmatpush1.bf16.msra.mxu0 %v6574_v35  ;;  %v6658_v35 = vld [vmem:[#allocation9 + $0x8b0] ss:$8 sps:$4 sm:$0xff]  }
 0x60c   :  { %5179 = vmatpush1.bf16.msra.mxu1 %v6577_v5  ;;  %4998 = vmatprep.subr.bf16.mxu0 %v6582_v36  ;;  %v6663_v5 = vld [vmem:[#allocation9 + $0x8c4] ss:$8 sps:$4 sm:$0xff]   ;;  %v6661_v36 = vld [vmem:[#allocation9 + $0x8c0] ss:$8 sps:$4 sm:$0xff]  }
 0x60d   :  { %5180 = vmatprep.subr.bf16.mxu1 %v6585_v37  ;;  %v6666_v37 = vld [vmem:[#allocation9 + $0x8d4] ss:$8 sps:$4 sm:$0xff]  }
 0x60f   :  { %4999 = vmatpush1.bf16.msra.mxu0 %v6580_v2  ;;  %v6664_v2 = vld [vmem:[#allocation9 + $0x8d0] ss:$8 sps:$4 sm:$0xff]  }
 0x610   :  { %5181 = vmatpush1.bf16.msra.mxu1 %v6583_v39  ;;  %5000 = vmatprep.subr.bf16.mxu0 %v6588_v41  ;;  %v6667_v39 = vld [vmem:[#allocation9 + $0x8e0] ss:$8 sps:$4 sm:$0xff]   ;;  %v6672_v41 = vld [vmem:[#allocation9 + $0x8f4] ss:$8 sps:$4 sm:$0xff]  }
 0x611   :  { %5182 = vmatprep.subr.bf16.mxu1 %v6591_v42  ;;  %v6670_v42 = vld [vmem:[#allocation9 + $0x8f0] ss:$8 sps:$4 sm:$0xff]  }
 0x613   :  { %5001 = vmatpush1.bf16.msra.mxu0 %v6586_v43  ;;  %v3125_v43 = vpack.c.bf16 %v7936_v50, %v7936_v50  ;;  %v95_v50 = vld [vmem:[%s8096_s4 + $0x90] sm:$0xff] }
 0x614   :  { %5183 = vmatpush1.bf16.msra.mxu1 %v6589_v45  ;;  %5002 = vmatprep.subr.bf16.mxu0 %v6594_v46  ;;  %v93_v45 = vld [vmem:[%s8096_s4 + $0x80] sm:$0xff]  ;;  %v94_v46 = vld [vmem:[%s8096_s4 + $0x88] sm:$0xff] }
 0x615   :  { %5184 = vmatprep.subr.bf16.mxu1 %v6597_v47  ;;  %v77_v47 = vld [vmem:[%s8096_s4] sm:$0xff] }
 0x617   :  { %5003 = vmatpush1.bf16.msra.mxu0 %v6592_v48  ;;  %v6141_v48 = vpack.c.bf16 %v94_v46, %v93_v45  ;;  %v110_v46 = vld [vmem:[%s8096_s4 + $0x108] sm:$0xff] }
 0x618   :  { %5185 = vmatpush1.bf16.msra.mxu1 %v6595_v51  ;;  %5004 = vmatprep.subr.bf16.mxu0 %v6600_v53  ;;  %v78_v51 = vld [vmem:[%s8096_s4 + $0x8] sm:$0xff]  ;;  %v96_v53 = vld [vmem:[%s8096_s4 + $0x98] sm:$0xff] }
 0x619   :  { %5195 = vmatprep.subr.bf16.mxu1 %v6603_v54  ;;  %v6143_v54 = vpack.c.bf16 %v78_v51, %v77_v47  ;;  %v6145_v59 = vpack.c.bf16 %v96_v53, %v95_v50  ;;  %v111_v47 = vld [vmem:[%s8096_s4 + $0x110] sm:$0xff] }
 0x61b   :  { %5187 = vmatmul.mubr.bf16.vlgmr.msra.gmra.mrb[28].mxu1 %v3123_v57  ;;  %5005 = vmatpush1.bf16.msra.mxu0 %v6598_v55  ;;  %v79_v55 = vld [vmem:[%s8096_s4 + $0x10] sm:$0xff]  ;;  %v97_v57 = vld [vmem:[%s8096_s4 + $0xa0] sm:$0xff] }
 0x61c   :  { %5196 = vmatpush1.bf16.msra.mxu1 %v6601_v56  ;;  %5227 = vmatprep.mubr.bf16.mxu1 %v3126_v63  ;;  %v80_v56 = vld [vmem:[%s8096_s4 + $0x18] sm:$0xff] }
 0x61d   :  { %5006 = vmatprep.subr.bf16.mxu0 %v6606_v60  ;;  %5197 = vmatprep.subr.bf16.mxu1 %v6609_v62  ;;  %v98_v60 = vld [vmem:[%s8096_s4 + $0xa8] sm:$0xff]  ;;  %v6147_v62 = vpack.c.bf16 %v80_v56, %v79_v55  ;;  %v113_v55 = vld [vmem:[%s8096_s4 + $0x120] sm:$0xff] }
 0x61e   :  { %v6149_v63 = vpack.c.bf16 %v98_v60, %v97_v57  ;;  %v114_v57 = vld [vmem:[%s8096_s4 + $0x128] sm:$0xff]  ;;  %v115_v60 = vld [vmem:[%s8096_s4 + $0x130] sm:$0xff] }
 0x61f   :  { %5007 = vmatpush1.bf16.msra.mxu0 %v6604_v0  ;;  %v81_v0 = vld [vmem:[%s8096_s4 + $0x20] sm:$0xff] }
 0x620   :  { %5198 = vmatpush1.bf16.msra.mxu1 %v6607_v30  ;;  %5008 = vmatprep.subr.bf16.mxu0 %v6612_v1  ;;  %v82_v30 = vld [vmem:[%s8096_s4 + $0x28] sm:$0xff]  ;;  %v99_v1 = vld [vmem:[%s8096_s4 + $0xb0] sm:$0xff] }
 0x621   :  { %5199 = vmatprep.subr.bf16.mxu1 %v6615_v3  ;;  %v100_v3 = vld [vmem:[%s8096_s4 + $0xb8] sm:$0xff] }
 0x623   :  { %5009 = vmatpush1.bf16.msra.mxu0 %v6610_v20  ;;  %v6151_v20 = vpack.c.bf16 %v82_v30, %v81_v0 }
 0x624   :  { %5200 = vmatpush1.bf16.msra.mxu1 %v6613_v4  ;;  %5010 = vmatprep.subr.bf16.mxu0 %v6618_v34  ;;  %v6153_v4 = vpack.c.bf16 %v100_v3, %v99_v1  ;;  %v83_v34 = vld [vmem:[%s8096_s4 + $0x30] sm:$0xff]  ;;  %v5826_v1 = vld [vmem:[%s8096_s4 + $0x100] ss:$0 sm:$0xff] }
 0x625   :  { %5201 = vmatprep.subr.bf16.mxu1 %v6621_v6  ;;  %v84_v6 = vld [vmem:[%s8096_s4 + $0x38] sm:$0xff] }
 0x627   :  { %5011 = vmatpush1.bf16.msra.mxu0 %v6616_v40  ;;  %v101_v40 = vld [vmem:[%s8096_s4 + $0xc0] sm:$0xff] }
 0x628   :  { %5202 = vmatpush1.bf16.msra.mxu1 %v6619_v7  ;;  %5012 = vmatprep.subr.bf16.mxu0 %v6624_v8  ;;  %v102_v7 = vld [vmem:[%s8096_s4 + $0xc8] sm:$0xff]  ;;  %v6155_v8 = vpack.c.bf16 %v84_v6, %v83_v34 }
 0x629   :  { %5203 = vmatprep.subr.bf16.mxu1 %v6627_v9  ;;  %v6157_v9 = vpack.c.bf16 %v102_v7, %v101_v40  ;;  %v5827_v6 = vld [vmem:[%s8096_s4 + $0x148] ss:$0 sm:$0xff] }
 0x62b   :  { %5013 = vmatpush1.bf16.msra.mxu0 %v6622_v10  ;;  %v85_v10 = vld [vmem:[%s8096_s4 + $0x40] sm:$0xff] }
 0x62c   :  { %5204 = vmatpush1.bf16.msra.mxu1 %v6625_v11  ;;  %5014 = vmatprep.subr.bf16.mxu0 %v6630_v12  ;;  %v86_v11 = vld [vmem:[%s8096_s4 + $0x48] sm:$0xff]  ;;  %v103_v12 = vld [vmem:[%s8096_s4 + $0xd0] sm:$0xff] }
 0x62d   :  { %5205 = vmatprep.subr.bf16.mxu1 %v6633_v13  ;;  %v104_v13 = vld [vmem:[%s8096_s4 + $0xd8] sm:$0xff] }
 0x62f   :  { %5015 = vmatpush1.bf16.msra.mxu0 %v6628_v14  ;;  %v6159_v14 = vpack.c.bf16 %v86_v11, %v85_v10 }
 0x630   :  { %5206 = vmatpush1.bf16.msra.mxu1 %v6631_v58  ;;  %5016 = vmatprep.subr.bf16.mxu0 %v6636_v16  ;;  %v6161_v58 = vpack.c.bf16 %v104_v13, %v103_v12  ;;  %v87_v16 = vld [vmem:[%s8096_s4 + $0x50] sm:$0xff] }
 0x631   :  { %5207 = vmatprep.subr.bf16.mxu1 %v6639_v17  ;;  %v88_v17 = vld [vmem:[%s8096_s4 + $0x58] sm:$0xff] }
 0x633   :  { %5017 = vmatpush1.bf16.msra.mxu0 %v6634_v18  ;;  %v105_v18 = vld [vmem:[%s8096_s4 + $0xe0] sm:$0xff] }
 0x634   :  { %5208 = vmatpush1.bf16.msra.mxu1 %v6637_v52  ;;  %5018 = vmatprep.subr.bf16.mxu0 %v6642_v21  ;;  %v106_v52 = vld [vmem:[%s8096_s4 + $0xe8] sm:$0xff]  ;;  %v6163_v21 = vpack.c.bf16 %v88_v17, %v87_v16 }
 0x635   :  { %5209 = vmatprep.subr.bf16.mxu1 %v6645_v22  ;;  %v6165_v22 = vpack.c.bf16 %v106_v52, %v105_v18 }
 0x637   :  { %5019 = vmatpush1.bf16.msra.mxu0 %v6640_v49  ;;  %v89_v49 = vld [vmem:[%s8096_s4 + $0x60] sm:$0xff] }
 0x638   :  { %5210 = vmatpush1.bf16.msra.mxu1 %v6643_v23  ;;  %5020 = vmatprep.subr.bf16.mxu0 %v6648_v24  ;;  %v90_v23 = vld [vmem:[%s8096_s4 + $0x68] sm:$0xff] }
 0x639   :  { %5211 = vmatprep.subr.bf16.mxu1 %v6651_v25  ;;  %v6167_v24 = vpack.c.bf16 %v90_v23, %v89_v49  ;;  %v107_v25 = vld [vmem:[%s8096_s4 + $0xf0] sm:$0xff] }
 0x63b   :  { %5021 = vmatpush1.bf16.msra.mxu0 %v6646_v26  ;;  %v108_v26 = vld [vmem:[%s8096_s4 + $0xf8] sm:$0xff] }
 0x63c   :  { %5212 = vmatpush1.bf16.msra.mxu1 %v6649_v27  ;;  %6142 = vmatprep.subr.bf16.mxu0 %v6141_v48  ;;  %v91_v27 = vld [vmem:[%s8096_s4 + $0x70] sm:$0xff] }
 0x63d   :  { %5213 = vmatprep.subr.bf16.mxu1 %v6654_v28  ;;  %v6169_v28 = vpack.c.bf16 %v108_v26, %v107_v25 }
 0x63e   :  { %5023 = vmatmul.mubr.bf16.vlgmr.msra.gmra.mrb[28].mxu0 %v3115_v31  ;;  %v92_v31 = vld [vmem:[%s8096_s4 + $0x78] sm:$0xff] }
 0x63f   :  { %6144 = vmatpush3.bf16.msra.mxu0 %v6143_v54 }
 0x640   :  { %5214 = vmatpush1.bf16.msra.mxu1 %v6652_v32  ;;  %6146 = vmatprep.subr.bf16.mxu0 %v6145_v59  ;;  %v6171_v32 = vpack.c.bf16 %v92_v31, %v91_v27  ;;  %v112_v59 = vld [vmem:[%s8096_s4 + $0x118] sm:$0xff] }
 0x641   :  { %5215 = vmatprep.subr.bf16.mxu1 %v6657_v61  ;;  %v6177_v56 = vpack.c.bf16 %v113_v55, %v112_v59 }
 0x643   :  { %6148 = vmatpush3.bf16.msra.mxu0 %v6147_v62  ;;  %v116_v62 = vld [vmem:[%s8096_s4 + $0x138] sm:$0xff] }
 0x644   :  { %5216 = vmatpush1.bf16.msra.mxu1 %v6655_v33  ;;  %6150 = vmatprep.subr.bf16.mxu0 %v6149_v63  ;;  %v6180_v63 = vpack.c.bf16 %v115_v60, %v114_v57 }
 0x645   :  { %5217 = vmatprep.subr.bf16.mxu1 %v6660_v29 }
 0x647   :  { %6152 = vmatpush3.bf16.msra.mxu0 %v6151_v20 }
 0x648   :  { %5218 = vmatpush1.bf16.msra.mxu1 %v6658_v35  ;;  %6154 = vmatprep.subr.bf16.mxu0 %v6153_v4 }
 0x649   :  { %5219 = vmatprep.subr.bf16.mxu1 %v6663_v5  ;;  %v3419_v5 = vsub.s32 0, %v7793_v44 }
 0x64b   :  { %6156 = vmatpush3.bf16.msra.mxu0 %v6155_v8 }
 0x64c   :  { %5220 = vmatpush1.bf16.msra.mxu1 %v6661_v36  ;;  %6158 = vmatprep.subr.bf16.mxu0 %v6157_v9  ;;  %v3415_v36 = vld [vmem:[#allocation12] sm:$0x3] }
 0x64d   :  { %5221 = vmatprep.subr.bf16.mxu1 %v6666_v37  ;;  %v3423_v37 = vsub.s32 1, %v7793_v44  ;;  %v6174_v44 = vpack.c.bf16 %v111_v47, %v110_v46 }
 0x64f   :  { %6160 = vmatpush3.bf16.msra.mxu0 %v6159_v14 }
 0x650   :  { %5222 = vmatpush1.bf16.msra.mxu1 %v6664_v2  ;;  %6162 = vmatprep.subr.bf16.mxu0 %v6161_v58  ;;  %v3420_v2 = vrot.slane %v3415_v36, %v3419_v5 }
 0x651   :  { %5223 = vmatprep.subr.bf16.mxu1 %v6669_v15  ;;  %v3424_v15 = vrot.slane %v3415_v36, %v3423_v37 }
 0x653   :  { %6164 = vmatpush3.bf16.msra.mxu0 %v6163_v21 }
 0x654   :  { %5224 = vmatpush1.bf16.msra.mxu1 %v6667_v39  ;;  %6166 = vmatprep.subr.bf16.mxu0 %v6165_v22 }
 0x655   :  { %5225 = vmatprep.subr.bf16.mxu1 %v6672_v41 }
 0x657   :  { %6168 = vmatpush3.bf16.msra.mxu0 %v6167_v24 }
 0x658   :  { %5226 = vmatpush1.bf16.msra.mxu1 %v6670_v42  ;;  %6170 = vmatprep.subr.bf16.mxu0 %v6169_v28 }
 0x65b   :  { %5228 = vmatmul.mubr.bf16.vlgmr.msra.gmra.mrb[28].mxu1 %v3125_v43  ;;  %6172 = vmatpush3.bf16.msra.mxu0 %v6171_v32 }
 0x65c   :  { %6173 = vmatprep.subr.bf16.mxu0 %v6754_v19 }
 0x711   :  { %v5024_v61 = vpop.f32.mrb[28].mxu0 }
 0x712   :  { %v5026_v33 = vpop.f32.mrb[29].mxu0  ;;  %v6185_v39 = vadd.f32 %v5024_v61, %v3420_v2 }
 0x713   :  { %v5028_v29 = vpop.f32.mrb[30].mxu0  ;;  %v6187_v41 = vadd.f32 %v5026_v33, %v3424_v15 }
 0x714   :  { %v5029_v35 = vpop.f32.mrb[31].mxu0 }
 0x72e   :  { %v5229_v42 = vpop.f32.mrb[28].mxu1 }
 0x72f   :  { %v6186_v43 = vadd.f32 %v6185_v39, %v5229_v42  ;;  %v5231_v45 = vpop.f32.mrb[29].mxu1 }
 0x730   :  { %v6188_v48 = vadd.f32 %v6187_v41, %v5231_v45  ;;  %v5233_v51 = vpop.f32.mrb[30].mxu1 }
 0x731   :  { %v5234_v50 = vpop.f32.mrb[31].mxu1  ;;  %v5236_v54 = vmax.f32 %v6186_v43, 0.0 }
 0x732   :  { %v5237_v53 = vmax.f32 %v6188_v48, 0.0 }
 0x734   :  { %5306 = vmatprep.mubr.f32.mxu0 %v5237_v53 }
 0x735   :  { %5307 = vmatmul.mubr.f32.vlgmr.msra.gmra.mrb[26].mxu0 %v5236_v54 }
 0x736   :  { %6175 = vmatpush3.bf16.msra.mxu0 %v6174_v44  ;;  %6087 = vmatprep.mubr.msk.f32.mxu0 %vm6755_vm11, %v6756_v38  ;;  %v117_v38 = vld [vmem:[%s8096_s4 + $0x140] sm:$0xff]  ;;  %vm5317_vm11 = vcmask 523264  }
 0x737   :  { %6176 = vmatprep.subr.bf16.mxu0 %v6754_v19  ;;  %v6183_v0 = vpack.c.bf16 %v117_v38, %v116_v62 }
 0x73a   :  { %6178 = vmatpush3.bf16.msra.mxu0 %v6177_v56 }
 0x73b   :  { %6179 = vmatprep.subr.bf16.mxu0 %v6754_v19 }
 0x73e   :  { %6181 = vmatpush3.bf16.msra.mxu0 %v6180_v63 }
 0x73f   :  { %6182 = vmatprep.subr.bf16.mxu0 %v6754_v19 }
 0x742   :  { %6184 = vmatpush3.bf16.msra.mxu0 %v6183_v0 }
 0x808   :  { %v5927_v30 = vpop.f32.mrb[26].mxu0 }
 0x809   :  { %v5928_v3 = vpop.f32.mrb[27].mxu0 }
 0x80a   :  { %v5929_v20 = vadd.f32 %v5928_v3, %v5927_v30 }
 0x80c   :  { %v5309_v4 = vadd.f32 %v5929_v20, %v5826_v1 }
 0x80e   :  { %v5312_v34 = vmax.f32 %v5309_v4, 0.0 }
 0x810   :  { %6088 = vmatmul.mubr.msk.f32.vlgmr.msra.gmra.mrb[32].mxu0 %vm5317_vm11, %v5312_v34 }
 0x8e3   :  { %v5387_v40 = vpop.f32.mrb[32].mxu0 }
 0x8e4   :  { %v5388_v19 = vadd.f32 %v5827_v6, %v5387_v40  ;;  %v6089_v7 = vpop.f32.mrb[33].mxu0 }
 0x8e6   :  { %5392 = vst.msk [vmem:[#allocation14] sm:$0x3] %vm5391_vm14, %v5388_v19 }
 0x8e7   :  { %6728 = shalt.err (!%p6725_p6)
}
 0x8e8   :  { %s6729_s9 = scalar_lea.hbm %s8097_s5, 32 }
 0x8e9   :  { %p6730_p7 = scmp.ne.s32.totalorder %s8097_s5, %s6729_s9  ;;  %p6733_p8 = scmp.lt.u32.totalorder %s6729_s9, %s8097_s5 }
 0x8eb   :  { %p6735_p9 = pnand %p6733_p8, %p6730_p7 }
 0x8ed   :  { %6738 = shalt.err (!%p6735_p9)
}
 0x8ee   :  { %5402 = dma.vmem_to_hbm [thread:$0]  %s5400_s30, 32, %s8097_s5, [#allocation11]  }
 0x8ef   :  { %6743 = dma.done.wait [#allocation11], 32  }
 0x8f0   :  { %6744 = vsyncadd [#allocation11], 4294967264 }
 0x8f1   :  { %5406 = vsyncpa [#allocation10], 1 }
 0x8f2   :  { %5407 = vsyncpa [#allocation13], 1 }
 0x8f3   :  { %5408 = vsyncpa [#allocation11], 1 }

</bundles_post_ra>
